<compile_context>
chip_gen: v6e
topology: v6e:2x2x1
jax: 0.10.0
libtpu: 0.0.40
codegen_flags: <defaults>
</compile_context>

<pallas_src>
import jax
import jax.numpy as jnp
from jax import lax
from jax.experimental import pallas as pl
from jax.experimental.pallas import tpu as pltpu


# ---------------------------------------------------------------------------
# small helpers
# ---------------------------------------------------------------------------
def _round_up(x, m):
    return (x + m - 1) // m * m


def _pad_gate_cols(w, H, Hp):
    """Pad each of the 3 gate blocks (r, z, n) along the last axis H -> Hp."""
    if Hp == H:
        return w
    parts = [w[..., k * H:(k + 1) * H] for k in range(3)]
    pad_width = [(0, 0)] * (w.ndim - 1) + [(0, Hp - H)]
    return jnp.concatenate([jnp.pad(p, pad_width) for p in parts], axis=-1)


def _choose_tt(T, Bp, target_rows=256):
    """Timesteps per input-projection tile (must divide T)."""
    tt = max(1, min(T, target_rows // Bp))
    while T % tt:
        tt -= 1
    return tt


def _choose_tu(T, Bp, Hp, max_bytes=1 << 20, max_tu=16):
    """Timesteps per recurrence grid step (must divide T, bounded gx block)."""
    cap = max(1, min(T, max_tu, max_bytes // (Bp * 3 * Hp * 4)))
    tu = cap
    while T % tu:
        tu -= 1
    return tu


def _limit(nbytes):
    return int(max(16 * 2**20, min(64 * 2**20, 2 * nbytes)))


# ---------------------------------------------------------------------------
# Stage 1: batched input projection for both directions
#   gx_cat = reshape(x, (TT*B, D)) @ [W_ih_f | W_ih_b] + [b_f | b_b]
# ---------------------------------------------------------------------------
def _input_proj_kernel(x_ref, w_ref, b_ref, gxf_ref, gxb_ref):
    TT, B, D = x_ref.shape
    G = gxf_ref.shape[-1]                      # 3 * Hp (lane-aligned)
    x2 = x_ref[...].reshape(TT * B, D)
    gx = jnp.dot(x2, w_ref[...], preferred_element_type=jnp.float32) + b_ref[...]
    gxf_ref[...] = gx[:, :G].reshape(TT, B, G)
    gxb_ref[...] = gx[:, G:].reshape(TT, B, G)


# ---------------------------------------------------------------------------
# Stage 2: fused forward/backward recurrence, TU timesteps per grid step
# ---------------------------------------------------------------------------
def _bigru_recurrent_kernel(gxf_ref, gxb_ref,
                            whh_f_ref, whh_b_ref,
                            bhh_nf_ref, bhh_nb_ref,
                            out_f_ref, out_b_ref,
                            hf_ref, hb_ref):
    t = pl.program_id(0)
    TU = gxf_ref.shape[0]                      # unrolled timesteps per grid step
    H = hf_ref.shape[1]                        # padded hidden width (lane aligned)

    @pl.when(t == 0)
    def _():                                   # PyTorch default h0 = 0
        hf_ref[...] = jnp.zeros_like(hf_ref)
        hb_ref[...] = jnp.zeros_like(hb_ref)

    def step(gx, h, whh_ref, bhh_n_ref):
        # gx already contains  W_ih x + b_ih  (+ b_hr / b_hz folded in).
        gh = jnp.dot(h, whh_ref[...], preferred_element_type=jnp.float32)
        r = jax.nn.sigmoid(gx[:, 0:H] + gh[:, 0:H])
        z = jax.nn.sigmoid(gx[:, H:2 * H] + gh[:, H:2 * H])
        n = jnp.tanh(gx[:, 2 * H:3 * H] + r * (gh[:, 2 * H:3 * H] + bhh_n_ref[...]))
        return (1.0 - z) * n + z * h

    hf = hf_ref[...]
    hb = hb_ref[...]
    # Statically unrolled chunk: fwd walks the chunk forward, bwd walks its
    # (time-reversed) chunk backward.  Two independent chains per step.
    for u in range(TU):
        hf = step(gxf_ref[u], hf, whh_f_ref, bhh_nf_ref)
        hb = step(gxb_ref[TU - 1 - u], hb, whh_b_ref, bhh_nb_ref)
        out_f_ref[u] = hf.astype(out_f_ref.dtype)
        out_b_ref[TU - 1 - u] = hb.astype(out_b_ref.dtype)

    hf_ref[...] = hf
    hb_ref[...] = hb


# ---------------------------------------------------------------------------
# Wrapper: padding, bias folding, the two pallas_calls, un-padding
# ---------------------------------------------------------------------------
def bidirectional_gru(x, params):
    """x: (B, T, n_in) float32.  Returns (B, T, 2*n_hidden) float32."""
    B, T, D = x.shape
    H = params["whh_f"].shape[0]

    Bp = _round_up(B, 8)       # f32 sublane
    Dp = _round_up(D, 128)     # lane
    Hp = _round_up(H, 128)     # lane (each gate lane-aligned)

    # ---- pad / fold parameters -------------------------------------------
    def pad_wih(w):            # (D, 3H) -> (Dp, 3Hp)
        return jnp.pad(_pad_gate_cols(w, H, Hp), ((0, Dp - D), (0, 0)))

    def pad_whh(w):            # (H, 3H) -> (Hp, 3Hp)
        return jnp.pad(_pad_gate_cols(w, H, Hp), ((0, Hp - H), (0, 0)))

    def fold_bias(bih, bhh):   # -> gx bias (1, 3Hp), n-gate hidden bias (1, Hp)
        bih_p = _pad_gate_cols(bih, H, Hp)
        bhh_p = _pad_gate_cols(bhh, H, Hp)
        # r/z hidden biases can be folded into the precomputed gx;
        # b_hn must stay inside r * (W_hn h + b_hn).
        b_gx = bih_p.at[:, :2 * Hp].add(bhh_p[:, :2 * Hp])
        return b_gx, bhh_p[:, 2 * Hp:]

    wih_cat = jnp.concatenate([pad_wih(params["wih_f"]),
                               pad_wih(params["wih_b"])], axis=1)     # (Dp, 6Hp)
    b_gx_f, bhh_n_f = fold_bias(params["bih_f"], params["bhh_f"])
    b_gx_b, bhh_n_b = fold_bias(params["bih_b"], params["bhh_b"])
    b_cat = jnp.concatenate([b_gx_f, b_gx_b], axis=1)                 # (1, 6Hp)
    whh_f_p = pad_whh(params["whh_f"])                                # (Hp, 3Hp)
    whh_b_p = pad_whh(params["whh_b"])

    # ---- time-major, padded input ------------------------------------------
    x_tbd = jnp.transpose(x, (1, 0, 2))                               # (T, B, D)
    x_p = jnp.pad(x_tbd, ((0, 0), (0, Bp - B), (0, Dp - D)))          # (T, Bp, Dp)

    # ---- Stage 1: input projection (big streamed matmul) -------------------
    TT = _choose_tt(T, Bp)
    proj_bytes = 4 * (2 * TT * Bp * Dp               # x blocks (double buffered)
                      + 2 * 2 * TT * Bp * 3 * Hp     # two gx outputs
                      + Dp * 6 * Hp + 6 * Hp)        # resident weights / bias
    gx_f, gx_b = pl.pallas_call(
        _input_proj_kernel,
        grid=(T // TT,),
        out_shape=(
            jax.ShapeDtypeStruct((T, Bp, 3 * Hp), jnp.float32),
            jax.ShapeDtypeStruct((T, Bp, 3 * Hp), jnp.float32),
        ),
        in_specs=[
            pl.BlockSpec((TT, Bp, Dp), lambda i: (i, 0, 0)),
            pl.BlockSpec((Dp, 6 * Hp), lambda i: (0, 0)),
            pl.BlockSpec((1, 6 * Hp), lambda i: (0, 0)),
        ],
        out_specs=(
            pl.BlockSpec((TT, Bp, 3 * Hp), lambda i: (i, 0, 0)),
            pl.BlockSpec((TT, Bp, 3 * Hp), lambda i: (i, 0, 0)),
        ),
        compiler_params=pltpu.CompilerParams(
            dimension_semantics=("parallel",),
            vmem_limit_bytes=_limit(proj_bytes)),
    )(x_p, wih_cat, b_cat)

    # ---- Stage 2: fused bidirectional recurrence, TU steps per grid point ---
    TU = _choose_tu(T, Bp, Hp)
    Tc = T // TU                                   # grid length (chunks)
    rec_bytes = 4 * (2 * 2 * TU * Bp * 3 * Hp   # two streamed gx inputs, 2 buffers
                     + 2 * 2 * TU * Bp * Hp     # two streamed outputs, 2 buffers
                     + 2 * Hp * 3 * Hp          # resident recurrent weights
                     + 2 * Hp                   # n-gate hidden biases
                     + 2 * Bp * Hp)             # hidden-state scratch
    out_f, out_b = pl.pallas_call(
        _bigru_recurrent_kernel,
        grid=(Tc,),
        out_shape=(
            jax.ShapeDtypeStruct((T, Bp, Hp), jnp.float32),
            jax.ShapeDtypeStruct((T, Bp, Hp), jnp.float32),
        ),
        in_specs=[
            pl.BlockSpec((TU, Bp, 3 * Hp), lambda t: (t, 0, 0)),            # gx fwd chunk t
            pl.BlockSpec((TU, Bp, 3 * Hp), lambda t: (Tc - 1 - t, 0, 0)),   # gx bwd chunk Tc-1-t
            pl.BlockSpec((Hp, 3 * Hp), lambda t: (0, 0)),                   # whh_f (resident)
            pl.BlockSpec((Hp, 3 * Hp), lambda t: (0, 0)),                   # whh_b (resident)
            pl.BlockSpec((1, Hp), lambda t: (0, 0)),                        # b_hn fwd
            pl.BlockSpec((1, Hp), lambda t: (0, 0)),                        # b_hn bwd
        ],
        out_specs=(
            pl.BlockSpec((TU, Bp, Hp), lambda t: (t, 0, 0)),
            pl.BlockSpec((TU, Bp, Hp), lambda t: (Tc - 1 - t, 0, 0)),
        ),
        scratch_shapes=[
            pltpu.VMEM((Bp, Hp), jnp.float32),   # forward hidden state
            pltpu.VMEM((Bp, Hp), jnp.float32),   # backward hidden state
        ],
        compiler_params=pltpu.CompilerParams(
            dimension_semantics=("arbitrary",),   # serial recurrence over T
            vmem_limit_bytes=_limit(rec_bytes)),
    )(gx_f, gx_b, whh_f_p, whh_b_p, bhh_n_f, bhh_n_b)

    # un-pad, concat [fwd, bwd] on features, back to batch_first
    out = jnp.concatenate([out_f[:, :B, :H], out_b[:, :B, :H]], axis=-1)  # (T, B, 2H)
    return jnp.transpose(out, (1, 0, 2))                                   # (B, T, 2H)


# ---------------------------------------------------------------------------
# Deterministic parameter init (PyTorch GRU: uniform(-1/sqrt(H), 1/sqrt(H)))
# ---------------------------------------------------------------------------
def init_params(key, n_in, n_hidden):
    H = n_hidden
    bound = 1.0 / jnp.sqrt(jnp.float32(H))
    keys = jax.random.split(key, 8)

    def u(k, shape):
        return jax.random.uniform(k, shape, jnp.float32, -bound, bound)

    # PyTorch stores weight_ih (3H, n_in) / weight_hh (3H, H); keep them
    # pre-transposed for the kernels (gate order r, z, n along columns).
    return {
        "wih_f": u(keys[0], (3 * H, n_in)).T,   # (n_in, 3H)
        "whh_f": u(keys[1], (3 * H, H)).T,      # (H, 3H)
        "bih_f": u(keys[2], (3 * H,)).reshape(1, 3 * H),
        "bhh_f": u(keys[3], (3 * H,)).reshape(1, 3 * H),
        "wih_b": u(keys[4], (3 * H, n_in)).T,
        "whh_b": u(keys[5], (3 * H, H)).T,
        "bih_b": u(keys[6], (3 * H,)).reshape(1, 3 * H),
        "bhh_b": u(keys[7], (3 * H,)).reshape(1, 3 * H),
    }


# ---------------------------------------------------------------------------
# Pure-JAX reference (correctness check only)
# ---------------------------------------------------------------------------
def _gru_dir_ref(x_tbd, wih, whh, bih, bhh, reverse):
    H = whh.shape[0]
    B = x_tbd.shape[1]

    def step(h, xt):
        gx = xt @ wih + bih
        gh = h @ whh + bhh
        r = jax.nn.sigmoid(gx[:, :H] + gh[:, :H])
        z = jax.nn.sigmoid(gx[:, H:2 * H] + gh[:, H:2 * H])
        n = jnp.tanh(gx[:, 2 * H:] + r * gh[:, 2 * H:])
        h_new = (1.0 - z) * n + z * h
        return h_new, h_new

    h0 = jnp.zeros((B, H), jnp.float32)
    _, ys = lax.scan(step, h0, x_tbd, reverse=reverse)
    return ys  # (T, B, H), in original time order


def bidirectional_gru_ref(x, params):
    x_tbd = jnp.transpose(x, (1, 0, 2))
    yf = _gru_dir_ref(x_tbd, params["wih_f"], params["whh_f"],
                      params["bih_f"], params["bhh_f"], reverse=False)
    yb = _gru_dir_ref(x_tbd, params["wih_b"], params["whh_b"],
                      params["bih_b"], params["bhh_b"], reverse=True)
    return jnp.transpose(jnp.concatenate([yf, yb], axis=-1), (1, 0, 2))


if __name__ == "__main__":
    B, T, n_in, n_hidden = 2, 8, 16, 32

    key = jax.random.PRNGKey(0)
    k_x, k_p = jax.random.split(key)
    x = jax.random.normal(k_x, (B, T, n_in), jnp.float32)
    params = init_params(k_p, n_in, n_hidden)

    out = jax.jit(bidirectional_gru)(x, params)
    out = jax.block_until_ready(out)

    ref = jax.block_until_ready(bidirectional_gru_ref(x, params))

    assert out.shape == (B, T, 2 * n_hidden), out.shape
    assert jnp.allclose(out, ref, atol=1e-4, rtol=1e-4), \
        float(jnp.max(jnp.abs(out - ref)))

    print("KERNEL_OK")
</pallas_src>

<mosaic_0001>
module attributes {stable_mosaic.version = 11 : i64} {
  func.func @_input_proj_kernel(%arg0: i32, %arg1: memref<8x8x128xf32, #tpu.memory_space<vmem>>, %arg2: memref<128x768xf32, #tpu.memory_space<vmem>>, %arg3: memref<1x768xf32, #tpu.memory_space<vmem>>, %arg4: memref<8x8x384xf32, #tpu.memory_space<vmem>>, %arg5: memref<8x8x384xf32, #tpu.memory_space<vmem>>) attributes {dimension_semantics = [#tpu.dimension_semantics<parallel>], iteration_bounds = array<i64: 1>, scalar_prefetch = 0 : i64, scratch_operands = 0 : i64, tpu.core_type = #tpu.core_type<tc>, window_params = [{transform_indices = @transform_0, window_bounds = array<i64: 8, 8, 128>}, {pipeline_mode = #tpu.pipeline_mode<synchronous>, transform_indices = @transform_1, window_bounds = array<i64: 128, 768>}, {pipeline_mode = #tpu.pipeline_mode<synchronous>, transform_indices = @transform_2, window_bounds = array<i64: 1, 768>}, {transform_indices = @transform_3, window_bounds = array<i64: 8, 8, 384>}, {transform_indices = @transform_4, window_bounds = array<i64: 8, 8, 384>}]} {
    %c0 = arith.constant 0 : index
    %c0_0 = arith.constant 0 : index
    %c0_1 = arith.constant 0 : index
    %0 = vector.load %arg1[%c0, %c0_0, %c0_1] : memref<8x8x128xf32, #tpu.memory_space<vmem>>, vector<8x8x128xf32>
    %1 = vector.shape_cast %0 : vector<8x8x128xf32> to vector<64x128xf32>
    %c0_2 = arith.constant 0 : index
    %c0_3 = arith.constant 0 : index
    %2 = vector.load %arg2[%c0_2, %c0_3] : memref<128x768xf32, #tpu.memory_space<vmem>>, vector<128x768xf32>
    %cst = arith.constant dense<0.000000e+00> : vector<64x768xf32>
    %3 = tpu.matmul %1, %2, %cst {dimension_numbers = #tpu.dot_dimension_numbers<[1], [0], [0], [1], [0, 0, 1, 1], [], []>} : vector<64x128xf32>, vector<128x768xf32>, vector<64x768xf32> -> vector<64x768xf32>
    %c0_4 = arith.constant 0 : index
    %c0_5 = arith.constant 0 : index
    %4 = vector.load %arg3[%c0_4, %c0_5] : memref<1x768xf32, #tpu.memory_space<vmem>>, vector<1x768xf32>
    %5 = vector.broadcast %4 : vector<1x768xf32> to vector<64x768xf32>
    %6 = arith.addf %3, %5 : vector<64x768xf32>
    %7 = vector.extract_strided_slice %6 {offsets = [0, 0], sizes = [64, 384], strides = [1, 1]} : vector<64x768xf32> to vector<64x384xf32>
    %8 = vector.shape_cast %7 : vector<64x384xf32> to vector<8x8x384xf32>
    %c0_6 = arith.constant 0 : index
    %c0_7 = arith.constant 0 : index
    %c0_8 = arith.constant 0 : index
    %9 = vector.load %arg4[%c0_6, %c0_7, %c0_8] : memref<8x8x384xf32, #tpu.memory_space<vmem>>, vector<8x8x384xf32>
    tpu.vector_store %arg4[%c0_6, %c0_7, %c0_8], %8 {strides = array<i32>} : memref<8x8x384xf32, #tpu.memory_space<vmem>>, vector<8x8x384xf32>,
    %10 = vector.extract_strided_slice %6 {offsets = [0, 384], sizes = [64, 384], strides = [1, 1]} : vector<64x768xf32> to vector<64x384xf32>
    %11 = vector.shape_cast %10 : vector<64x384xf32> to vector<8x8x384xf32>
    %c0_9 = arith.constant 0 : index
    %c0_10 = arith.constant 0 : index
    %c0_11 = arith.constant 0 : index
    %12 = vector.load %arg5[%c0_9, %c0_10, %c0_11] : memref<8x8x384xf32, #tpu.memory_space<vmem>>, vector<8x8x384xf32>
    tpu.vector_store %arg5[%c0_9, %c0_10, %c0_11], %11 {strides = array<i32>} : memref<8x8x384xf32, #tpu.memory_space<vmem>>, vector<8x8x384xf32>,
    return
  }
  func.func @transform_0(%arg0: i32) -> (i32, i32, i32) {
    %c0_i32 = arith.constant 0 : i32
    %c0_i32_0 = arith.constant 0 : i32
    %c0_i32_1 = arith.constant 0 : i32
    return %arg0, %c0_i32, %c0_i32_0 : i32, i32, i32
  }
  func.func @transform_1(%arg0: i32) -> (i32, i32) {
    %c0_i32 = arith.constant 0 : i32
    %c0_i32_0 = arith.constant 0 : i32
    %c0_i32_1 = arith.constant 0 : i32
    return %c0_i32, %c0_i32_0 : i32, i32
  }
  func.func @transform_2(%arg0: i32) -> (i32, i32) {
    %c0_i32 = arith.constant 0 : i32
    %c0_i32_0 = arith.constant 0 : i32
    %c0_i32_1 = arith.constant 0 : i32
    return %c0_i32, %c0_i32_0 : i32, i32
  }
  func.func @transform_3(%arg0: i32) -> (i32, i32, i32) {
    %c0_i32 = arith.constant 0 : i32
    %c0_i32_0 = arith.constant 0 : i32
    %c0_i32_1 = arith.constant 0 : i32
    return %arg0, %c0_i32, %c0_i32_0 : i32, i32, i32
  }
  func.func @transform_4(%arg0: i32) -> (i32, i32, i32) {
    %c0_i32 = arith.constant 0 : i32
    %c0_i32_0 = arith.constant 0 : i32
    %c0_i32_1 = arith.constant 0 : i32
    return %arg0, %c0_i32, %c0_i32_0 : i32, i32, i32
  }
}

module attributes {stable_mosaic.version = 11 : i64} {
  func.func @_bigru_recurrent_kernel(%arg0: i32, %arg1: memref<8x8x384xf32, #tpu.memory_space<vmem>>, %arg2: memref<8x8x384xf32, #tpu.memory_space<vmem>>, %arg3: memref<128x384xf32, #tpu.memory_space<vmem>>, %arg4: memref<128x384xf32, #tpu.memory_space<vmem>>, %arg5: memref<1x128xf32, #tpu.memory_space<vmem>>, %arg6: memref<1x128xf32, #tpu.memory_space<vmem>>, %arg7: memref<8x8x128xf32, #tpu.memory_space<vmem>>, %arg8: memref<8x8x128xf32, #tpu.memory_space<vmem>>, %arg9: memref<8x128xf32, #tpu.memory_space<vmem>>, %arg10: memref<8x128xf32, #tpu.memory_space<vmem>>) attributes {dimension_semantics = [#tpu.dimension_semantics<arbitrary>], iteration_bounds = array<i64: 1>, scalar_prefetch = 0 : i64, scratch_operands = 2 : i64, tpu.core_type = #tpu.core_type<tc>, window_params = [{transform_indices = @transform_0, window_bounds = array<i64: 8, 8, 384>}, {transform_indices = @transform_1, window_bounds = array<i64: 8, 8, 384>}, {pipeline_mode = #tpu.pipeline_mode<synchronous>, transform_indices = @transform_2, window_bounds = array<i64: 128, 384>}, {pipeline_mode = #tpu.pipeline_mode<synchronous>, transform_indices = @transform_3, window_bounds = array<i64: 128, 384>}, {pipeline_mode = #tpu.pipeline_mode<synchronous>, transform_indices = @transform_4, window_bounds = array<i64: 1, 128>}, {pipeline_mode = #tpu.pipeline_mode<synchronous>, transform_indices = @transform_5, window_bounds = array<i64: 1, 128>}, {transform_indices = @transform_6, window_bounds = array<i64: 8, 8, 128>}, {transform_indices = @transform_7, window_bounds = array<i64: 8, 8, 128>}]} {
    %c0_i32 = arith.constant 0 : i32
    %0 = arith.cmpi eq, %arg0, %c0_i32 : i32
    %1 = arith.extui %0 : i1 to i32
    %c0_i32_0 = arith.constant 0 : i32
    %2 = arith.cmpi ne, %1, %c0_i32_0 : i32
    scf.if %2 {
      %cst_224 = arith.constant 0.000000e+00 : f32
      %583 = vector.broadcast %cst_224 : f32 to vector<8x128xf32>
      %c0_225 = arith.constant 0 : index
      %c0_226 = arith.constant 0 : index
      %584 = vector.load %arg9[%c0_225, %c0_226] : memref<8x128xf32, #tpu.memory_space<vmem>>, vector<8x128xf32>
      tpu.vector_store %arg9[%c0_225, %c0_226], %583 {strides = array<i32>} : memref<8x128xf32, #tpu.memory_space<vmem>>, vector<8x128xf32>,
      %cst_227 = arith.constant 0.000000e+00 : f32
      %585 = vector.broadcast %cst_227 : f32 to vector<8x128xf32>
      %c0_228 = arith.constant 0 : index
      %c0_229 = arith.constant 0 : index
      %586 = vector.load %arg10[%c0_228, %c0_229] : memref<8x128xf32, #tpu.memory_space<vmem>>, vector<8x128xf32>
      tpu.vector_store %arg10[%c0_228, %c0_229], %585 {strides = array<i32>} : memref<8x128xf32, #tpu.memory_space<vmem>>, vector<8x128xf32>,
    } else {
    }
    %c0 = arith.constant 0 : index
    %c0_1 = arith.constant 0 : index
    %3 = vector.load %arg9[%c0, %c0_1] : memref<8x128xf32, #tpu.memory_space<vmem>>, vector<8x128xf32>
    %c0_2 = arith.constant 0 : index
    %c0_3 = arith.constant 0 : index
    %4 = vector.load %arg10[%c0_2, %c0_3] : memref<8x128xf32, #tpu.memory_space<vmem>>, vector<8x128xf32>
    %c0_4 = arith.constant 0 : index
    %c0_5 = arith.constant 0 : index
    %c0_6 = arith.constant 0 : index
    %5 = vector.load %arg1[%c0_4, %c0_5, %c0_6] : memref<8x8x384xf32, #tpu.memory_space<vmem>>, vector<1x8x384xf32>
    %6 = vector.shape_cast %5 : vector<1x8x384xf32> to vector<8x384xf32>
    %c0_7 = arith.constant 0 : index
    %c0_8 = arith.constant 0 : index
    %7 = vector.load %arg3[%c0_7, %c0_8] : memref<128x384xf32, #tpu.memory_space<vmem>>, vector<128x384xf32>
    %cst = arith.constant dense<0.000000e+00> : vector<8x384xf32>
    %8 = tpu.matmul %3, %7, %cst {dimension_numbers = #tpu.dot_dimension_numbers<[1], [0], [0], [1], [0, 0, 1, 1], [], []>} : vector<8x128xf32>, vector<128x384xf32>, vector<8x384xf32> -> vector<8x384xf32>
    %9 = vector.extract_strided_slice %6 {offsets = [0, 0], sizes = [8, 128], strides = [1, 1]} : vector<8x384xf32> to vector<8x128xf32>
    %10 = vector.extract_strided_slice %8 {offsets = [0, 0], sizes = [8, 128], strides = [1, 1]} : vector<8x384xf32> to vector<8x128xf32>
    %11 = arith.addf %9, %10 : vector<8x128xf32>
    %12 = arith.negf %11 : vector<8x128xf32>
    %13 = math.exp %12 : vector<8x128xf32>
    %cst_9 = arith.constant 1.000000e+00 : f32
    %14 = vector.broadcast %cst_9 : f32 to vector<8x128xf32>
    %15 = arith.addf %14, %13 : vector<8x128xf32>
    %16 = arith.divf %14, %15 : vector<8x128xf32>
    %17 = vector.extract_strided_slice %6 {offsets = [0, 128], sizes = [8, 128], strides = [1, 1]} : vector<8x384xf32> to vector<8x128xf32>
    %18 = vector.extract_strided_slice %8 {offsets = [0, 128], sizes = [8, 128], strides = [1, 1]} : vector<8x384xf32> to vector<8x128xf32>
    %19 = arith.addf %17, %18 : vector<8x128xf32>
    %20 = arith.negf %19 : vector<8x128xf32>
    %21 = math.exp %20 : vector<8x128xf32>
    %cst_10 = arith.constant 1.000000e+00 : f32
    %22 = vector.broadcast %cst_10 : f32 to vector<8x128xf32>
    %23 = arith.addf %22, %21 : vector<8x128xf32>
    %24 = arith.divf %22, %23 : vector<8x128xf32>
    %25 = vector.extract_strided_slice %6 {offsets = [0, 256], sizes = [8, 128], strides = [1, 1]} : vector<8x384xf32> to vector<8x128xf32>
    %26 = vector.extract_strided_slice %8 {offsets = [0, 256], sizes = [8, 128], strides = [1, 1]} : vector<8x384xf32> to vector<8x128xf32>
    %c0_11 = arith.constant 0 : index
    %c0_12 = arith.constant 0 : index
    %27 = vector.load %arg5[%c0_11, %c0_12] : memref<1x128xf32, #tpu.memory_space<vmem>>, vector<1x128xf32>
    %28 = vector.broadcast %27 : vector<1x128xf32> to vector<8x128xf32>
    %29 = arith.addf %26, %28 : vector<8x128xf32>
    %30 = arith.mulf %16, %29 : vector<8x128xf32>
    %31 = arith.addf %25, %30 : vector<8x128xf32>
    %32 = math.tanh %31 : vector<8x128xf32>
    %cst_13 = arith.constant 1.000000e+00 : f32
    %33 = vector.broadcast %cst_13 : f32 to vector<8x128xf32>
    %34 = arith.subf %33, %24 : vector<8x128xf32>
    %35 = arith.mulf %34, %32 : vector<8x128xf32>
    %36 = arith.mulf %24, %3 : vector<8x128xf32>
    %37 = arith.addf %35, %36 : vector<8x128xf32>
    %c7 = arith.constant 7 : index
    %c0_14 = arith.constant 0 : index
    %c0_15 = arith.constant 0 : index
    %38 = vector.load %arg2[%c7, %c0_14, %c0_15] : memref<8x8x384xf32, #tpu.memory_space<vmem>>, vector<1x8x384xf32>
    %39 = vector.shape_cast %38 : vector<1x8x384xf32> to vector<8x384xf32>
    %c0_16 = arith.constant 0 : index
    %c0_17 = arith.constant 0 : index
    %40 = vector.load %arg4[%c0_16, %c0_17] : memref<128x384xf32, #tpu.memory_space<vmem>>, vector<128x384xf32>
    %cst_18 = arith.constant dense<0.000000e+00> : vector<8x384xf32>
    %41 = tpu.matmul %4, %40, %cst_18 {dimension_numbers = #tpu.dot_dimension_numbers<[1], [0], [0], [1], [0, 0, 1, 1], [], []>} : vector<8x128xf32>, vector<128x384xf32>, vector<8x384xf32> -> vector<8x384xf32>
    %42 = vector.extract_strided_slice %39 {offsets = [0, 0], sizes = [8, 128], strides = [1, 1]} : vector<8x384xf32> to vector<8x128xf32>
    %43 = vector.extract_strided_slice %41 {offsets = [0, 0], sizes = [8, 128], strides = [1, 1]} : vector<8x384xf32> to vector<8x128xf32>
    %44 = arith.addf %42, %43 : vector<8x128xf32>
    %45 = arith.negf %44 : vector<8x128xf32>
    %46 = math.exp %45 : vector<8x128xf32>
    %cst_19 = arith.constant 1.000000e+00 : f32
    %47 = vector.broadcast %cst_19 : f32 to vector<8x128xf32>
    %48 = arith.addf %47, %46 : vector<8x128xf32>
    %49 = arith.divf %47, %48 : vector<8x128xf32>
    %50 = vector.extract_strided_slice %39 {offsets = [0, 128], sizes = [8, 128], strides = [1, 1]} : vector<8x384xf32> to vector<8x128xf32>
    %51 = vector.extract_strided_slice %41 {offsets = [0, 128], sizes = [8, 128], strides = [1, 1]} : vector<8x384xf32> to vector<8x128xf32>
    %52 = arith.addf %50, %51 : vector<8x128xf32>
    %53 = arith.negf %52 : vector<8x128xf32>
    %54 = math.exp %53 : vector<8x128xf32>
    %cst_20 = arith.constant 1.000000e+00 : f32
    %55 = vector.broadcast %cst_20 : f32 to vector<8x128xf32>
    %56 = arith.addf %55, %54 : vector<8x128xf32>
    %57 = arith.divf %55, %56 : vector<8x128xf32>
    %58 = vector.extract_strided_slice %39 {offsets = [0, 256], sizes = [8, 128], strides = [1, 1]} : vector<8x384xf32> to vector<8x128xf32>
    %59 = vector.extract_strided_slice %41 {offsets = [0, 256], sizes = [8, 128], strides = [1, 1]} : vector<8x384xf32> to vector<8x128xf32>
    %c0_21 = arith.constant 0 : index
    %c0_22 = arith.constant 0 : index
    %60 = vector.load %arg6[%c0_21, %c0_22] : memref<1x128xf32, #tpu.memory_space<vmem>>, vector<1x128xf32>
    %61 = vector.broadcast %60 : vector<1x128xf32> to vector<8x128xf32>
    %62 = arith.addf %59, %61 : vector<8x128xf32>
    %63 = arith.mulf %49, %62 : vector<8x128xf32>
    %64 = arith.addf %58, %63 : vector<8x128xf32>
    %65 = math.tanh %64 : vector<8x128xf32>
    %cst_23 = arith.constant 1.000000e+00 : f32
    %66 = vector.broadcast %cst_23 : f32 to vector<8x128xf32>
    %67 = arith.subf %66, %57 : vector<8x128xf32>
    %68 = arith.mulf %67, %65 : vector<8x128xf32>
    %69 = arith.mulf %57, %4 : vector<8x128xf32>
    %70 = arith.addf %68, %69 : vector<8x128xf32>
    %c0_24 = arith.constant 0 : index
    %c0_25 = arith.constant 0 : index
    %c0_26 = arith.constant 0 : index
    %71 = vector.load %arg7[%c0_24, %c0_25, %c0_26] : memref<8x8x128xf32, #tpu.memory_space<vmem>>, vector<1x8x128xf32>
    %72 = vector.shape_cast %71 : vector<1x8x128xf32> to vector<8x128xf32>
    %73 = vector.shape_cast %37 : vector<8x128xf32> to vector<1x8x128xf32>
    tpu.vector_store %arg7[%c0_24, %c0_25, %c0_26], %73 {strides = array<i32>} : memref<8x8x128xf32, #tpu.memory_space<vmem>>, vector<1x8x128xf32>,
    %c7_27 = arith.constant 7 : index
    %c0_28 = arith.constant 0 : index
    %c0_29 = arith.constant 0 : index
    %74 = vector.load %arg8[%c7_27, %c0_28, %c0_29] : memref<8x8x128xf32, #tpu.memory_space<vmem>>, vector<1x8x128xf32>
    %75 = vector.shape_cast %74 : vector<1x8x128xf32> to vector<8x128xf32>
    %76 = vector.shape_cast %70 : vector<8x128xf32> to vector<1x8x128xf32>
    tpu.vector_store %arg8[%c7_27, %c0_28, %c0_29], %76 {strides = array<i32>} : memref<8x8x128xf32, #tpu.memory_space<vmem>>, vector<1x8x128xf32>,
    %c1 = arith.constant 1 : index
    %c0_30 = arith.constant 0 : index
    %c0_31 = arith.constant 0 : index
    %77 = vector.load %arg1[%c1, %c0_30, %c0_31] : memref<8x8x384xf32, #tpu.memory_space<vmem>>, vector<1x8x384xf32>
    %78 = vector.shape_cast %77 : vector<1x8x384xf32> to vector<8x384xf32>
    %c0_32 = arith.constant 0 : index
    %c0_33 = arith.constant 0 : index
    %79 = vector.load %arg3[%c0_32, %c0_33] : memref<128x384xf32, #tpu.memory_space<vmem>>, vector<128x384xf32>
    %cst_34 = arith.constant dense<0.000000e+00> : vector<8x384xf32>
    %80 = tpu.matmul %37, %79, %cst_34 {dimension_numbers = #tpu.dot_dimension_numbers<[1], [0], [0], [1], [0, 0, 1, 1], [], []>} : vector<8x128xf32>, vector<128x384xf32>, vector<8x384xf32> -> vector<8x384xf32>
    %81 = vector.extract_strided_slice %78 {offsets = [0, 0], sizes = [8, 128], strides = [1, 1]} : vector<8x384xf32> to vector<8x128xf32>
    %82 = vector.extract_strided_slice %80 {offsets = [0, 0], sizes = [8, 128], strides = [1, 1]} : vector<8x384xf32> to vector<8x128xf32>
    %83 = arith.addf %81, %82 : vector<8x128xf32>
    %84 = arith.negf %83 : vector<8x128xf32>
    %85 = math.exp %84 : vector<8x128xf32>
    %cst_35 = arith.constant 1.000000e+00 : f32
    %86 = vector.broadcast %cst_35 : f32 to vector<8x128xf32>
    %87 = arith.addf %86, %85 : vector<8x128xf32>
    %88 = arith.divf %86, %87 : vector<8x128xf32>
    %89 = vector.extract_strided_slice %78 {offsets = [0, 128], sizes = [8, 128], strides = [1, 1]} : vector<8x384xf32> to vector<8x128xf32>
    %90 = vector.extract_strided_slice %80 {offsets = [0, 128], sizes = [8, 128], strides = [1, 1]} : vector<8x384xf32> to vector<8x128xf32>
    %91 = arith.addf %89, %90 : vector<8x128xf32>
    %92 = arith.negf %91 : vector<8x128xf32>
    %93 = math.exp %92 : vector<8x128xf32>
    %cst_36 = arith.constant 1.000000e+00 : f32
    %94 = vector.broadcast %cst_36 : f32 to vector<8x128xf32>
    %95 = arith.addf %94, %93 : vector<8x128xf32>
    %96 = arith.divf %94, %95 : vector<8x128xf32>
    %97 = vector.extract_strided_slice %78 {offsets = [0, 256], sizes = [8, 128], strides = [1, 1]} : vector<8x384xf32> to vector<8x128xf32>
    %98 = vector.extract_strided_slice %80 {offsets = [0, 256], sizes = [8, 128], strides = [1, 1]} : vector<8x384xf32> to vector<8x128xf32>
    %c0_37 = arith.constant 0 : index
    %c0_38 = arith.constant 0 : index
    %99 = vector.load %arg5[%c0_37, %c0_38] : memref<1x128xf32, #tpu.memory_space<vmem>>, vector<1x128xf32>
    %100 = vector.broadcast %99 : vector<1x128xf32> to vector<8x128xf32>
    %101 = arith.addf %98, %100 : vector<8x128xf32>
    %102 = arith.mulf %88, %101 : vector<8x128xf32>
    %103 = arith.addf %97, %102 : vector<8x128xf32>
    %104 = math.tanh %103 : vector<8x128xf32>
    %cst_39 = arith.constant 1.000000e+00 : f32
    %105 = vector.broadcast %cst_39 : f32 to vector<8x128xf32>
    %106 = arith.subf %105, %96 : vector<8x128xf32>
    %107 = arith.mulf %106, %104 : vector<8x128xf32>
    %108 = arith.mulf %96, %37 : vector<8x128xf32>
    %109 = arith.addf %107, %108 : vector<8x128xf32>
    %c6 = arith.constant 6 : index
    %c0_40 = arith.constant 0 : index
    %c0_41 = arith.constant 0 : index
    %110 = vector.load %arg2[%c6, %c0_40, %c0_41] : memref<8x8x384xf32, #tpu.memory_space<vmem>>, vector<1x8x384xf32>
    %111 = vector.shape_cast %110 : vector<1x8x384xf32> to vector<8x384xf32>
    %c0_42 = arith.constant 0 : index
    %c0_43 = arith.constant 0 : index
    %112 = vector.load %arg4[%c0_42, %c0_43] : memref<128x384xf32, #tpu.memory_space<vmem>>, vector<128x384xf32>
    %cst_44 = arith.constant dense<0.000000e+00> : vector<8x384xf32>
    %113 = tpu.matmul %70, %112, %cst_44 {dimension_numbers = #tpu.dot_dimension_numbers<[1], [0], [0], [1], [0, 0, 1, 1], [], []>} : vector<8x128xf32>, vector<128x384xf32>, vector<8x384xf32> -> vector<8x384xf32>
    %114 = vector.extract_strided_slice %111 {offsets = [0, 0], sizes = [8, 128], strides = [1, 1]} : vector<8x384xf32> to vector<8x128xf32>
    %115 = vector.extract_strided_slice %113 {offsets = [0, 0], sizes = [8, 128], strides = [1, 1]} : vector<8x384xf32> to vector<8x128xf32>
    %116 = arith.addf %114, %115 : vector<8x128xf32>
    %117 = arith.negf %116 : vector<8x128xf32>
    %118 = math.exp %117 : vector<8x128xf32>
    %cst_45 = arith.constant 1.000000e+00 : f32
    %119 = vector.broadcast %cst_45 : f32 to vector<8x128xf32>
    %120 = arith.addf %119, %118 : vector<8x128xf32>
    %121 = arith.divf %119, %120 : vector<8x128xf32>
    %122 = vector.extract_strided_slice %111 {offsets = [0, 128], sizes = [8, 128], strides = [1, 1]} : vector<8x384xf32> to vector<8x128xf32>
    %123 = vector.extract_strided_slice %113 {offsets = [0, 128], sizes = [8, 128], strides = [1, 1]} : vector<8x384xf32> to vector<8x128xf32>
    %124 = arith.addf %122, %123 : vector<8x128xf32>
    %125 = arith.negf %124 : vector<8x128xf32>
    %126 = math.exp %125 : vector<8x128xf32>
    %cst_46 = arith.constant 1.000000e+00 : f32
    %127 = vector.broadcast %cst_46 : f32 to vector<8x128xf32>
    %128 = arith.addf %127, %126 : vector<8x128xf32>
    %129 = arith.divf %127, %128 : vector<8x128xf32>
    %130 = vector.extract_strided_slice %111 {offsets = [0, 256], sizes = [8, 128], strides = [1, 1]} : vector<8x384xf32> to vector<8x128xf32>
    %131 = vector.extract_strided_slice %113 {offsets = [0, 256], sizes = [8, 128], strides = [1, 1]} : vector<8x384xf32> to vector<8x128xf32>
    %c0_47 = arith.constant 0 : index
    %c0_48 = arith.constant 0 : index
    %132 = vector.load %arg6[%c0_47, %c0_48] : memref<1x128xf32, #tpu.memory_space<vmem>>, vector<1x128xf32>
    %133 = vector.broadcast %132 : vector<1x128xf32> to vector<8x128xf32>
    %134 = arith.addf %131, %133 : vector<8x128xf32>
    %135 = arith.mulf %121, %134 : vector<8x128xf32>
    %136 = arith.addf %130, %135 : vector<8x128xf32>
    %137 = math.tanh %136 : vector<8x128xf32>
    %cst_49 = arith.constant 1.000000e+00 : f32
    %138 = vector.broadcast %cst_49 : f32 to vector<8x128xf32>
    %139 = arith.subf %138, %129 : vector<8x128xf32>
    %140 = arith.mulf %139, %137 : vector<8x128xf32>
    %141 = arith.mulf %129, %70 : vector<8x128xf32>
    %142 = arith.addf %140, %141 : vector<8x128xf32>
    %c1_50 = arith.constant 1 : index
    %c0_51 = arith.constant 0 : index
    %c0_52 = arith.constant 0 : index
    %143 = vector.load %arg7[%c1_50, %c0_51, %c0_52] : memref<8x8x128xf32, #tpu.memory_space<vmem>>, vector<1x8x128xf32>
    %144 = vector.shape_cast %143 : vector<1x8x128xf32> to vector<8x128xf32>
    %145 = vector.shape_cast %109 : vector<8x128xf32> to vector<1x8x128xf32>
    tpu.vector_store %arg7[%c1_50, %c0_51, %c0_52], %145 {strides = array<i32>} : memref<8x8x128xf32, #tpu.memory_space<vmem>>, vector<1x8x128xf32>,
    %c6_53 = arith.constant 6 : index
    %c0_54 = arith.constant 0 : index
    %c0_55 = arith.constant 0 : index
    %146 = vector.load %arg8[%c6_53, %c0_54, %c0_55] : memref<8x8x128xf32, #tpu.memory_space<vmem>>, vector<1x8x128xf32>
    %147 = vector.shape_cast %146 : vector<1x8x128xf32> to vector<8x128xf32>
    %148 = vector.shape_cast %142 : vector<8x128xf32> to vector<1x8x128xf32>
    tpu.vector_store %arg8[%c6_53, %c0_54, %c0_55], %148 {strides = array<i32>} : memref<8x8x128xf32, #tpu.memory_space<vmem>>, vector<1x8x128xf32>,
    %c2 = arith.constant 2 : index
    %c0_56 = arith.constant 0 : index
    %c0_57 = arith.constant 0 : index
    %149 = vector.load %arg1[%c2, %c0_56, %c0_57] : memref<8x8x384xf32, #tpu.memory_space<vmem>>, vector<1x8x384xf32>
    %150 = vector.shape_cast %149 : vector<1x8x384xf32> to vector<8x384xf32>
    %c0_58 = arith.constant 0 : index
    %c0_59 = arith.constant 0 : index
    %151 = vector.load %arg3[%c0_58, %c0_59] : memref<128x384xf32, #tpu.memory_space<vmem>>, vector<128x384xf32>
    %cst_60 = arith.constant dense<0.000000e+00> : vector<8x384xf32>
    %152 = tpu.matmul %109, %151, %cst_60 {dimension_numbers = #tpu.dot_dimension_numbers<[1], [0], [0], [1], [0, 0, 1, 1], [], []>} : vector<8x128xf32>, vector<128x384xf32>, vector<8x384xf32> -> vector<8x384xf32>
    %153 = vector.extract_strided_slice %150 {offsets = [0, 0], sizes = [8, 128], strides = [1, 1]} : vector<8x384xf32> to vector<8x128xf32>
    %154 = vector.extract_strided_slice %152 {offsets = [0, 0], sizes = [8, 128], strides = [1, 1]} : vector<8x384xf32> to vector<8x128xf32>
    %155 = arith.addf %153, %154 : vector<8x128xf32>
    %156 = arith.negf %155 : vector<8x128xf32>
    %157 = math.exp %156 : vector<8x128xf32>
    %cst_61 = arith.constant 1.000000e+00 : f32
    %158 = vector.broadcast %cst_61 : f32 to vector<8x128xf32>
    %159 = arith.addf %158, %157 : vector<8x128xf32>
    %160 = arith.divf %158, %159 : vector<8x128xf32>
    %161 = vector.extract_strided_slice %150 {offsets = [0, 128], sizes = [8, 128], strides = [1, 1]} : vector<8x384xf32> to vector<8x128xf32>
    %162 = vector.extract_strided_slice %152 {offsets = [0, 128], sizes = [8, 128], strides = [1, 1]} : vector<8x384xf32> to vector<8x128xf32>
    %163 = arith.addf %161, %162 : vector<8x128xf32>
    %164 = arith.negf %163 : vector<8x128xf32>
    %165 = math.exp %164 : vector<8x128xf32>
    %cst_62 = arith.constant 1.000000e+00 : f32
    %166 = vector.broadcast %cst_62 : f32 to vector<8x128xf32>
    %167 = arith.addf %166, %165 : vector<8x128xf32>
    %168 = arith.divf %166, %167 : vector<8x128xf32>
    %169 = vector.extract_strided_slice %150 {offsets = [0, 256], sizes = [8, 128], strides = [1, 1]} : vector<8x384xf32> to vector<8x128xf32>
    %170 = vector.extract_strided_slice %152 {offsets = [0, 256], sizes = [8, 128], strides = [1, 1]} : vector<8x384xf32> to vector<8x128xf32>
    %c0_63 = arith.constant 0 : index
    %c0_64 = arith.constant 0 : index
    %171 = vector.load %arg5[%c0_63, %c0_64] : memref<1x128xf32, #tpu.memory_space<vmem>>, vector<1x128xf32>
    %172 = vector.broadcast %171 : vector<1x128xf32> to vector<8x128xf32>
    %173 = arith.addf %170, %172 : vector<8x128xf32>
    %174 = arith.mulf %160, %173 : vector<8x128xf32>
    %175 = arith.addf %169, %174 : vector<8x128xf32>
    %176 = math.tanh %175 : vector<8x128xf32>
    %cst_65 = arith.constant 1.000000e+00 : f32
    %177 = vector.broadcast %cst_65 : f32 to vector<8x128xf32>
    %178 = arith.subf %177, %168 : vector<8x128xf32>
    %179 = arith.mulf %178, %176 : vector<8x128xf32>
    %180 = arith.mulf %168, %109 : vector<8x128xf32>
    %181 = arith.addf %179, %180 : vector<8x128xf32>
    %c5 = arith.constant 5 : index
    %c0_66 = arith.constant 0 : index
    %c0_67 = arith.constant 0 : index
    %182 = vector.load %arg2[%c5, %c0_66, %c0_67] : memref<8x8x384xf32, #tpu.memory_space<vmem>>, vector<1x8x384xf32>
    %183 = vector.shape_cast %182 : vector<1x8x384xf32> to vector<8x384xf32>
    %c0_68 = arith.constant 0 : index
    %c0_69 = arith.constant 0 : index
    %184 = vector.load %arg4[%c0_68, %c0_69] : memref<128x384xf32, #tpu.memory_space<vmem>>, vector<128x384xf32>
    %cst_70 = arith.constant dense<0.000000e+00> : vector<8x384xf32>
    %185 = tpu.matmul %142, %184, %cst_70 {dimension_numbers = #tpu.dot_dimension_numbers<[1], [0], [0], [1], [0, 0, 1, 1], [], []>} : vector<8x128xf32>, vector<128x384xf32>, vector<8x384xf32> -> vector<8x384xf32>
    %186 = vector.extract_strided_slice %183 {offsets = [0, 0], sizes = [8, 128], strides = [1, 1]} : vector<8x384xf32> to vector<8x128xf32>
    %187 = vector.extract_strided_slice %185 {offsets = [0, 0], sizes = [8, 128], strides = [1, 1]} : vector<8x384xf32> to vector<8x128xf32>
    %188 = arith.addf %186, %187 : vector<8x128xf32>
    %189 = arith.negf %188 : vector<8x128xf32>
    %190 = math.exp %189 : vector<8x128xf32>
    %cst_71 = arith.constant 1.000000e+00 : f32
    %191 = vector.broadcast %cst_71 : f32 to vector<8x128xf32>
    %192 = arith.addf %191, %190 : vector<8x128xf32>
    %193 = arith.divf %191, %192 : vector<8x128xf32>
    %194 = vector.extract_strided_slice %183 {offsets = [0, 128], sizes = [8, 128], strides = [1, 1]} : vector<8x384xf32> to vector<8x128xf32>
    %195 = vector.extract_strided_slice %185 {offsets = [0, 128], sizes = [8, 128], strides = [1, 1]} : vector<8x384xf32> to vector<8x128xf32>
    %196 = arith.addf %194, %195 : vector<8x128xf32>
    %197 = arith.negf %196 : vector<8x128xf32>
    %198 = math.exp %197 : vector<8x128xf32>
    %cst_72 = arith.constant 1.000000e+00 : f32
    %199 = vector.broadcast %cst_72 : f32 to vector<8x128xf32>
    %200 = arith.addf %199, %198 : vector<8x128xf32>
    %201 = arith.divf %199, %200 : vector<8x128xf32>
    %202 = vector.extract_strided_slice %183 {offsets = [0, 256], sizes = [8, 128], strides = [1, 1]} : vector<8x384xf32> to vector<8x128xf32>
    %203 = vector.extract_strided_slice %185 {offsets = [0, 256], sizes = [8, 128], strides = [1, 1]} : vector<8x384xf32> to vector<8x128xf32>
    %c0_73 = arith.constant 0 : index
    %c0_74 = arith.constant 0 : index
    %204 = vector.load %arg6[%c0_73, %c0_74] : memref<1x128xf32, #tpu.memory_space<vmem>>, vector<1x128xf32>
    %205 = vector.broadcast %204 : vector<1x128xf32> to vector<8x128xf32>
    %206 = arith.addf %203, %205 : vector<8x128xf32>
    %207 = arith.mulf %193, %206 : vector<8x128xf32>
    %208 = arith.addf %202, %207 : vector<8x128xf32>
    %209 = math.tanh %208 : vector<8x128xf32>
    %cst_75 = arith.constant 1.000000e+00 : f32
    %210 = vector.broadcast %cst_75 : f32 to vector<8x128xf32>
    %211 = arith.subf %210, %201 : vector<8x128xf32>
    %212 = arith.mulf %211, %209 : vector<8x128xf32>
    %213 = arith.mulf %201, %142 : vector<8x128xf32>
    %214 = arith.addf %212, %213 : vector<8x128xf32>
    %c2_76 = arith.constant 2 : index
    %c0_77 = arith.constant 0 : index
    %c0_78 = arith.constant 0 : index
    %215 = vector.load %arg7[%c2_76, %c0_77, %c0_78] : memref<8x8x128xf32, #tpu.memory_space<vmem>>, vector<1x8x128xf32>
    %216 = vector.shape_cast %215 : vector<1x8x128xf32> to vector<8x128xf32>
    %217 = vector.shape_cast %181 : vector<8x128xf32> to vector<1x8x128xf32>
    tpu.vector_store %arg7[%c2_76, %c0_77, %c0_78], %217 {strides = array<i32>} : memref<8x8x128xf32, #tpu.memory_space<vmem>>, vector<1x8x128xf32>,
    %c5_79 = arith.constant 5 : index
    %c0_80 = arith.constant 0 : index
    %c0_81 = arith.constant 0 : index
    %218 = vector.load %arg8[%c5_79, %c0_80, %c0_81] : memref<8x8x128xf32, #tpu.memory_space<vmem>>, vector<1x8x128xf32>
    %219 = vector.shape_cast %218 : vector<1x8x128xf32> to vector<8x128xf32>
    %220 = vector.shape_cast %214 : vector<8x128xf32> to vector<1x8x128xf32>
    tpu.vector_store %arg8[%c5_79, %c0_80, %c0_81], %220 {strides = array<i32>} : memref<8x8x128xf32, #tpu.memory_space<vmem>>, vector<1x8x128xf32>,
    %c3 = arith.constant 3 : index
    %c0_82 = arith.constant 0 : index
    %c0_83 = arith.constant 0 : index
    %221 = vector.load %arg1[%c3, %c0_82, %c0_83] : memref<8x8x384xf32, #tpu.memory_space<vmem>>, vector<1x8x384xf32>
    %222 = vector.shape_cast %221 : vector<1x8x384xf32> to vector<8x384xf32>
    %c0_84 = arith.constant 0 : index
    %c0_85 = arith.constant 0 : index
    %223 = vector.load %arg3[%c0_84, %c0_85] : memref<128x384xf32, #tpu.memory_space<vmem>>, vector<128x384xf32>
    %cst_86 = arith.constant dense<0.000000e+00> : vector<8x384xf32>
    %224 = tpu.matmul %181, %223, %cst_86 {dimension_numbers = #tpu.dot_dimension_numbers<[1], [0], [0], [1], [0, 0, 1, 1], [], []>} : vector<8x128xf32>, vector<128x384xf32>, vector<8x384xf32> -> vector<8x384xf32>
    %225 = vector.extract_strided_slice %222 {offsets = [0, 0], sizes = [8, 128], strides = [1, 1]} : vector<8x384xf32> to vector<8x128xf32>
    %226 = vector.extract_strided_slice %224 {offsets = [0, 0], sizes = [8, 128], strides = [1, 1]} : vector<8x384xf32> to vector<8x128xf32>
    %227 = arith.addf %225, %226 : vector<8x128xf32>
    %228 = arith.negf %227 : vector<8x128xf32>
    %229 = math.exp %228 : vector<8x128xf32>
    %cst_87 = arith.constant 1.000000e+00 : f32
    %230 = vector.broadcast %cst_87 : f32 to vector<8x128xf32>
    %231 = arith.addf %230, %229 : vector<8x128xf32>
    %232 = arith.divf %230, %231 : vector<8x128xf32>
    %233 = vector.extract_strided_slice %222 {offsets = [0, 128], sizes = [8, 128], strides = [1, 1]} : vector<8x384xf32> to vector<8x128xf32>
    %234 = vector.extract_strided_slice %224 {offsets = [0, 128], sizes = [8, 128], strides = [1, 1]} : vector<8x384xf32> to vector<8x128xf32>
    %235 = arith.addf %233, %234 : vector<8x128xf32>
    %236 = arith.negf %235 : vector<8x128xf32>
    %237 = math.exp %236 : vector<8x128xf32>
    %cst_88 = arith.constant 1.000000e+00 : f32
    %238 = vector.broadcast %cst_88 : f32 to vector<8x128xf32>
    %239 = arith.addf %238, %237 : vector<8x128xf32>
    %240 = arith.divf %238, %239 : vector<8x128xf32>
    %241 = vector.extract_strided_slice %222 {offsets = [0, 256], sizes = [8, 128], strides = [1, 1]} : vector<8x384xf32> to vector<8x128xf32>
    %242 = vector.extract_strided_slice %224 {offsets = [0, 256], sizes = [8, 128], strides = [1, 1]} : vector<8x384xf32> to vector<8x128xf32>
    %c0_89 = arith.constant 0 : index
    %c0_90 = arith.constant 0 : index
    %243 = vector.load %arg5[%c0_89, %c0_90] : memref<1x128xf32, #tpu.memory_space<vmem>>, vector<1x128xf32>
    %244 = vector.broadcast %243 : vector<1x128xf32> to vector<8x128xf32>
    %245 = arith.addf %242, %244 : vector<8x128xf32>
    %246 = arith.mulf %232, %245 : vector<8x128xf32>
    %247 = arith.addf %241, %246 : vector<8x128xf32>
    %248 = math.tanh %247 : vector<8x128xf32>
    %cst_91 = arith.constant 1.000000e+00 : f32
    %249 = vector.broadcast %cst_91 : f32 to vector<8x128xf32>
    %250 = arith.subf %249, %240 : vector<8x128xf32>
    %251 = arith.mulf %250, %248 : vector<8x128xf32>
    %252 = arith.mulf %240, %181 : vector<8x128xf32>
    %253 = arith.addf %251, %252 : vector<8x128xf32>
    %c4 = arith.constant 4 : index
    %c0_92 = arith.constant 0 : index
    %c0_93 = arith.constant 0 : index
    %254 = vector.load %arg2[%c4, %c0_92, %c0_93] : memref<8x8x384xf32, #tpu.memory_space<vmem>>, vector<1x8x384xf32>
    %255 = vector.shape_cast %254 : vector<1x8x384xf32> to vector<8x384xf32>
    %c0_94 = arith.constant 0 : index
    %c0_95 = arith.constant 0 : index
    %256 = vector.load %arg4[%c0_94, %c0_95] : memref<128x384xf32, #tpu.memory_space<vmem>>, vector<128x384xf32>
    %cst_96 = arith.constant dense<0.000000e+00> : vector<8x384xf32>
    %257 = tpu.matmul %214, %256, %cst_96 {dimension_numbers = #tpu.dot_dimension_numbers<[1], [0], [0], [1], [0, 0, 1, 1], [], []>} : vector<8x128xf32>, vector<128x384xf32>, vector<8x384xf32> -> vector<8x384xf32>
    %258 = vector.extract_strided_slice %255 {offsets = [0, 0], sizes = [8, 128], strides = [1, 1]} : vector<8x384xf32> to vector<8x128xf32>
    %259 = vector.extract_strided_slice %257 {offsets = [0, 0], sizes = [8, 128], strides = [1, 1]} : vector<8x384xf32> to vector<8x128xf32>
    %260 = arith.addf %258, %259 : vector<8x128xf32>
    %261 = arith.negf %260 : vector<8x128xf32>
    %262 = math.exp %261 : vector<8x128xf32>
    %cst_97 = arith.constant 1.000000e+00 : f32
    %263 = vector.broadcast %cst_97 : f32 to vector<8x128xf32>
    %264 = arith.addf %263, %262 : vector<8x128xf32>
    %265 = arith.divf %263, %264 : vector<8x128xf32>
    %266 = vector.extract_strided_slice %255 {offsets = [0, 128], sizes = [8, 128], strides = [1, 1]} : vector<8x384xf32> to vector<8x128xf32>
    %267 = vector.extract_strided_slice %257 {offsets = [0, 128], sizes = [8, 128], strides = [1, 1]} : vector<8x384xf32> to vector<8x128xf32>
    %268 = arith.addf %266, %267 : vector<8x128xf32>
    %269 = arith.negf %268 : vector<8x128xf32>
    %270 = math.exp %269 : vector<8x128xf32>
    %cst_98 = arith.constant 1.000000e+00 : f32
    %271 = vector.broadcast %cst_98 : f32 to vector<8x128xf32>
    %272 = arith.addf %271, %270 : vector<8x128xf32>
    %273 = arith.divf %271, %272 : vector<8x128xf32>
    %274 = vector.extract_strided_slice %255 {offsets = [0, 256], sizes = [8, 128], strides = [1, 1]} : vector<8x384xf32> to vector<8x128xf32>
    %275 = vector.extract_strided_slice %257 {offsets = [0, 256], sizes = [8, 128], strides = [1, 1]} : vector<8x384xf32> to vector<8x128xf32>
    %c0_99 = arith.constant 0 : index
    %c0_100 = arith.constant 0 : index
    %276 = vector.load %arg6[%c0_99, %c0_100] : memref<1x128xf32, #tpu.memory_space<vmem>>, vector<1x128xf32>
    %277 = vector.broadcast %276 : vector<1x128xf32> to vector<8x128xf32>
    %278 = arith.addf %275, %277 : vector<8x128xf32>
    %279 = arith.mulf %265, %278 : vector<8x128xf32>
    %280 = arith.addf %274, %279 : vector<8x128xf32>
    %281 = math.tanh %280 : vector<8x128xf32>
    %cst_101 = arith.constant 1.000000e+00 : f32
    %282 = vector.broadcast %cst_101 : f32 to vector<8x128xf32>
    %283 = arith.subf %282, %273 : vector<8x128xf32>
    %284 = arith.mulf %283, %281 : vector<8x128xf32>
    %285 = arith.mulf %273, %214 : vector<8x128xf32>
    %286 = arith.addf %284, %285 : vector<8x128xf32>
    %c3_102 = arith.constant 3 : index
    %c0_103 = arith.constant 0 : index
    %c0_104 = arith.constant 0 : index
    %287 = vector.load %arg7[%c3_102, %c0_103, %c0_104] : memref<8x8x128xf32, #tpu.memory_space<vmem>>, vector<1x8x128xf32>
    %288 = vector.shape_cast %287 : vector<1x8x128xf32> to vector<8x128xf32>
    %289 = vector.shape_cast %253 : vector<8x128xf32> to vector<1x8x128xf32>
    tpu.vector_store %arg7[%c3_102, %c0_103, %c0_104], %289 {strides = array<i32>} : memref<8x8x128xf32, #tpu.memory_space<vmem>>, vector<1x8x128xf32>,
    %c4_105 = arith.constant 4 : index
    %c0_106 = arith.constant 0 : index
    %c0_107 = arith.constant 0 : index
    %290 = vector.load %arg8[%c4_105, %c0_106, %c0_107] : memref<8x8x128xf32, #tpu.memory_space<vmem>>, vector<1x8x128xf32>
    %291 = vector.shape_cast %290 : vector<1x8x128xf32> to vector<8x128xf32>
    %292 = vector.shape_cast %286 : vector<8x128xf32> to vector<1x8x128xf32>
    tpu.vector_store %arg8[%c4_105, %c0_106, %c0_107], %292 {strides = array<i32>} : memref<8x8x128xf32, #tpu.memory_space<vmem>>, vector<1x8x128xf32>,
    %c4_108 = arith.constant 4 : index
    %c0_109 = arith.constant 0 : index
    %c0_110 = arith.constant 0 : index
    %293 = vector.load %arg1[%c4_108, %c0_109, %c0_110] : memref<8x8x384xf32, #tpu.memory_space<vmem>>, vector<1x8x384xf32>
    %294 = vector.shape_cast %293 : vector<1x8x384xf32> to vector<8x384xf32>
    %c0_111 = arith.constant 0 : index
    %c0_112 = arith.constant 0 : index
    %295 = vector.load %arg3[%c0_111, %c0_112] : memref<128x384xf32, #tpu.memory_space<vmem>>, vector<128x384xf32>
    %cst_113 = arith.constant dense<0.000000e+00> : vector<8x384xf32>
    %296 = tpu.matmul %253, %295, %cst_113 {dimension_numbers = #tpu.dot_dimension_numbers<[1], [0], [0], [1], [0, 0, 1, 1], [], []>} : vector<8x128xf32>, vector<128x384xf32>, vector<8x384xf32> -> vector<8x384xf32>
    %297 = vector.extract_strided_slice %294 {offsets = [0, 0], sizes = [8, 128], strides = [1, 1]} : vector<8x384xf32> to vector<8x128xf32>
    %298 = vector.extract_strided_slice %296 {offsets = [0, 0], sizes = [8, 128], strides = [1, 1]} : vector<8x384xf32> to vector<8x128xf32>
    %299 = arith.addf %297, %298 : vector<8x128xf32>
    %300 = arith.negf %299 : vector<8x128xf32>
    %301 = math.exp %300 : vector<8x128xf32>
    %cst_114 = arith.constant 1.000000e+00 : f32
    %302 = vector.broadcast %cst_114 : f32 to vector<8x128xf32>
    %303 = arith.addf %302, %301 : vector<8x128xf32>
    %304 = arith.divf %302, %303 : vector<8x128xf32>
    %305 = vector.extract_strided_slice %294 {offsets = [0, 128], sizes = [8, 128], strides = [1, 1]} : vector<8x384xf32> to vector<8x128xf32>
    %306 = vector.extract_strided_slice %296 {offsets = [0, 128], sizes = [8, 128], strides = [1, 1]} : vector<8x384xf32> to vector<8x128xf32>
    %307 = arith.addf %305, %306 : vector<8x128xf32>
    %308 = arith.negf %307 : vector<8x128xf32>
    %309 = math.exp %308 : vector<8x128xf32>
    %cst_115 = arith.constant 1.000000e+00 : f32
    %310 = vector.broadcast %cst_115 : f32 to vector<8x128xf32>
    %311 = arith.addf %310, %309 : vector<8x128xf32>
    %312 = arith.divf %310, %311 : vector<8x128xf32>
    %313 = vector.extract_strided_slice %294 {offsets = [0, 256], sizes = [8, 128], strides = [1, 1]} : vector<8x384xf32> to vector<8x128xf32>
    %314 = vector.extract_strided_slice %296 {offsets = [0, 256], sizes = [8, 128], strides = [1, 1]} : vector<8x384xf32> to vector<8x128xf32>
    %c0_116 = arith.constant 0 : index
    %c0_117 = arith.constant 0 : index
    %315 = vector.load %arg5[%c0_116, %c0_117] : memref<1x128xf32, #tpu.memory_space<vmem>>, vector<1x128xf32>
    %316 = vector.broadcast %315 : vector<1x128xf32> to vector<8x128xf32>
    %317 = arith.addf %314, %316 : vector<8x128xf32>
    %318 = arith.mulf %304, %317 : vector<8x128xf32>
    %319 = arith.addf %313, %318 : vector<8x128xf32>
    %320 = math.tanh %319 : vector<8x128xf32>
    %cst_118 = arith.constant 1.000000e+00 : f32
    %321 = vector.broadcast %cst_118 : f32 to vector<8x128xf32>
    %322 = arith.subf %321, %312 : vector<8x128xf32>
    %323 = arith.mulf %322, %320 : vector<8x128xf32>
    %324 = arith.mulf %312, %253 : vector<8x128xf32>
    %325 = arith.addf %323, %324 : vector<8x128xf32>
    %c3_119 = arith.constant 3 : index
    %c0_120 = arith.constant 0 : index
    %c0_121 = arith.constant 0 : index
    %326 = vector.load %arg2[%c3_119, %c0_120, %c0_121] : memref<8x8x384xf32, #tpu.memory_space<vmem>>, vector<1x8x384xf32>
    %327 = vector.shape_cast %326 : vector<1x8x384xf32> to vector<8x384xf32>
    %c0_122 = arith.constant 0 : index
    %c0_123 = arith.constant 0 : index
    %328 = vector.load %arg4[%c0_122, %c0_123] : memref<128x384xf32, #tpu.memory_space<vmem>>, vector<128x384xf32>
    %cst_124 = arith.constant dense<0.000000e+00> : vector<8x384xf32>
    %329 = tpu.matmul %286, %328, %cst_124 {dimension_numbers = #tpu.dot_dimension_numbers<[1], [0], [0], [1], [0, 0, 1, 1], [], []>} : vector<8x128xf32>, vector<128x384xf32>, vector<8x384xf32> -> vector<8x384xf32>
    %330 = vector.extract_strided_slice %327 {offsets = [0, 0], sizes = [8, 128], strides = [1, 1]} : vector<8x384xf32> to vector<8x128xf32>
    %331 = vector.extract_strided_slice %329 {offsets = [0, 0], sizes = [8, 128], strides = [1, 1]} : vector<8x384xf32> to vector<8x128xf32>
    %332 = arith.addf %330, %331 : vector<8x128xf32>
    %333 = arith.negf %332 : vector<8x128xf32>
    %334 = math.exp %333 : vector<8x128xf32>
    %cst_125 = arith.constant 1.000000e+00 : f32
    %335 = vector.broadcast %cst_125 : f32 to vector<8x128xf32>
    %336 = arith.addf %335, %334 : vector<8x128xf32>
    %337 = arith.divf %335, %336 : vector<8x128xf32>
    %338 = vector.extract_strided_slice %327 {offsets = [0, 128], sizes = [8, 128], strides = [1, 1]} : vector<8x384xf32> to vector<8x128xf32>
    %339 = vector.extract_strided_slice %329 {offsets = [0, 128], sizes = [8, 128], strides = [1, 1]} : vector<8x384xf32> to vector<8x128xf32>
    %340 = arith.addf %338, %339 : vector<8x128xf32>
    %341 = arith.negf %340 : vector<8x128xf32>
    %342 = math.exp %341 : vector<8x128xf32>
    %cst_126 = arith.constant 1.000000e+00 : f32
    %343 = vector.broadcast %cst_126 : f32 to vector<8x128xf32>
    %344 = arith.addf %343, %342 : vector<8x128xf32>
    %345 = arith.divf %343, %344 : vector<8x128xf32>
    %346 = vector.extract_strided_slice %327 {offsets = [0, 256], sizes = [8, 128], strides = [1, 1]} : vector<8x384xf32> to vector<8x128xf32>
    %347 = vector.extract_strided_slice %329 {offsets = [0, 256], sizes = [8, 128], strides = [1, 1]} : vector<8x384xf32> to vector<8x128xf32>
    %c0_127 = arith.constant 0 : index
    %c0_128 = arith.constant 0 : index
    %348 = vector.load %arg6[%c0_127, %c0_128] : memref<1x128xf32, #tpu.memory_space<vmem>>, vector<1x128xf32>
    %349 = vector.broadcast %348 : vector<1x128xf32> to vector<8x128xf32>
    %350 = arith.addf %347, %349 : vector<8x128xf32>
    %351 = arith.mulf %337, %350 : vector<8x128xf32>
    %352 = arith.addf %346, %351 : vector<8x128xf32>
    %353 = math.tanh %352 : vector<8x128xf32>
    %cst_129 = arith.constant 1.000000e+00 : f32
    %354 = vector.broadcast %cst_129 : f32 to vector<8x128xf32>
    %355 = arith.subf %354, %345 : vector<8x128xf32>
    %356 = arith.mulf %355, %353 : vector<8x128xf32>
    %357 = arith.mulf %345, %286 : vector<8x128xf32>
    %358 = arith.addf %356, %357 : vector<8x128xf32>
    %c4_130 = arith.constant 4 : index
    %c0_131 = arith.constant 0 : index
    %c0_132 = arith.constant 0 : index
    %359 = vector.load %arg7[%c4_130, %c0_131, %c0_132] : memref<8x8x128xf32, #tpu.memory_space<vmem>>, vector<1x8x128xf32>
    %360 = vector.shape_cast %359 : vector<1x8x128xf32> to vector<8x128xf32>
    %361 = vector.shape_cast %325 : vector<8x128xf32> to vector<1x8x128xf32>
    tpu.vector_store %arg7[%c4_130, %c0_131, %c0_132], %361 {strides = array<i32>} : memref<8x8x128xf32, #tpu.memory_space<vmem>>, vector<1x8x128xf32>,
    %c3_133 = arith.constant 3 : index
    %c0_134 = arith.constant 0 : index
    %c0_135 = arith.constant 0 : index
    %362 = vector.load %arg8[%c3_133, %c0_134, %c0_135] : memref<8x8x128xf32, #tpu.memory_space<vmem>>, vector<1x8x128xf32>
    %363 = vector.shape_cast %362 : vector<1x8x128xf32> to vector<8x128xf32>
    %364 = vector.shape_cast %358 : vector<8x128xf32> to vector<1x8x128xf32>
    tpu.vector_store %arg8[%c3_133, %c0_134, %c0_135], %364 {strides = array<i32>} : memref<8x8x128xf32, #tpu.memory_space<vmem>>, vector<1x8x128xf32>,
    %c5_136 = arith.constant 5 : index
    %c0_137 = arith.constant 0 : index
    %c0_138 = arith.constant 0 : index
    %365 = vector.load %arg1[%c5_136, %c0_137, %c0_138] : memref<8x8x384xf32, #tpu.memory_space<vmem>>, vector<1x8x384xf32>
    %366 = vector.shape_cast %365 : vector<1x8x384xf32> to vector<8x384xf32>
    %c0_139 = arith.constant 0 : index
    %c0_140 = arith.constant 0 : index
    %367 = vector.load %arg3[%c0_139, %c0_140] : memref<128x384xf32, #tpu.memory_space<vmem>>, vector<128x384xf32>
    %cst_141 = arith.constant dense<0.000000e+00> : vector<8x384xf32>
    %368 = tpu.matmul %325, %367, %cst_141 {dimension_numbers = #tpu.dot_dimension_numbers<[1], [0], [0], [1], [0, 0, 1, 1], [], []>} : vector<8x128xf32>, vector<128x384xf32>, vector<8x384xf32> -> vector<8x384xf32>
    %369 = vector.extract_strided_slice %366 {offsets = [0, 0], sizes = [8, 128], strides = [1, 1]} : vector<8x384xf32> to vector<8x128xf32>
    %370 = vector.extract_strided_slice %368 {offsets = [0, 0], sizes = [8, 128], strides = [1, 1]} : vector<8x384xf32> to vector<8x128xf32>
    %371 = arith.addf %369, %370 : vector<8x128xf32>
    %372 = arith.negf %371 : vector<8x128xf32>
    %373 = math.exp %372 : vector<8x128xf32>
    %cst_142 = arith.constant 1.000000e+00 : f32
    %374 = vector.broadcast %cst_142 : f32 to vector<8x128xf32>
    %375 = arith.addf %374, %373 : vector<8x128xf32>
    %376 = arith.divf %374, %375 : vector<8x128xf32>
    %377 = vector.extract_strided_slice %366 {offsets = [0, 128], sizes = [8, 128], strides = [1, 1]} : vector<8x384xf32> to vector<8x128xf32>
    %378 = vector.extract_strided_slice %368 {offsets = [0, 128], sizes = [8, 128], strides = [1, 1]} : vector<8x384xf32> to vector<8x128xf32>
    %379 = arith.addf %377, %378 : vector<8x128xf32>
    %380 = arith.negf %379 : vector<8x128xf32>
    %381 = math.exp %380 : vector<8x128xf32>
    %cst_143 = arith.constant 1.000000e+00 : f32
    %382 = vector.broadcast %cst_143 : f32 to vector<8x128xf32>
    %383 = arith.addf %382, %381 : vector<8x128xf32>
    %384 = arith.divf %382, %383 : vector<8x128xf32>
    %385 = vector.extract_strided_slice %366 {offsets = [0, 256], sizes = [8, 128], strides = [1, 1]} : vector<8x384xf32> to vector<8x128xf32>
    %386 = vector.extract_strided_slice %368 {offsets = [0, 256], sizes = [8, 128], strides = [1, 1]} : vector<8x384xf32> to vector<8x128xf32>
    %c0_144 = arith.constant 0 : index
    %c0_145 = arith.constant 0 : index
    %387 = vector.load %arg5[%c0_144, %c0_145] : memref<1x128xf32, #tpu.memory_space<vmem>>, vector<1x128xf32>
    %388 = vector.broadcast %387 : vector<1x128xf32> to vector<8x128xf32>
    %389 = arith.addf %386, %388 : vector<8x128xf32>
    %390 = arith.mulf %376, %389 : vector<8x128xf32>
    %391 = arith.addf %385, %390 : vector<8x128xf32>
    %392 = math.tanh %391 : vector<8x128xf32>
    %cst_146 = arith.constant 1.000000e+00 : f32
    %393 = vector.broadcast %cst_146 : f32 to vector<8x128xf32>
    %394 = arith.subf %393, %384 : vector<8x128xf32>
    %395 = arith.mulf %394, %392 : vector<8x128xf32>
    %396 = arith.mulf %384, %325 : vector<8x128xf32>
    %397 = arith.addf %395, %396 : vector<8x128xf32>
    %c2_147 = arith.constant 2 : index
    %c0_148 = arith.constant 0 : index
    %c0_149 = arith.constant 0 : index
    %398 = vector.load %arg2[%c2_147, %c0_148, %c0_149] : memref<8x8x384xf32, #tpu.memory_space<vmem>>, vector<1x8x384xf32>
    %399 = vector.shape_cast %398 : vector<1x8x384xf32> to vector<8x384xf32>
    %c0_150 = arith.constant 0 : index
    %c0_151 = arith.constant 0 : index
    %400 = vector.load %arg4[%c0_150, %c0_151] : memref<128x384xf32, #tpu.memory_space<vmem>>, vector<128x384xf32>
    %cst_152 = arith.constant dense<0.000000e+00> : vector<8x384xf32>
    %401 = tpu.matmul %358, %400, %cst_152 {dimension_numbers = #tpu.dot_dimension_numbers<[1], [0], [0], [1], [0, 0, 1, 1], [], []>} : vector<8x128xf32>, vector<128x384xf32>, vector<8x384xf32> -> vector<8x384xf32>
    %402 = vector.extract_strided_slice %399 {offsets = [0, 0], sizes = [8, 128], strides = [1, 1]} : vector<8x384xf32> to vector<8x128xf32>
    %403 = vector.extract_strided_slice %401 {offsets = [0, 0], sizes = [8, 128], strides = [1, 1]} : vector<8x384xf32> to vector<8x128xf32>
    %404 = arith.addf %402, %403 : vector<8x128xf32>
    %405 = arith.negf %404 : vector<8x128xf32>
    %406 = math.exp %405 : vector<8x128xf32>
    %cst_153 = arith.constant 1.000000e+00 : f32
    %407 = vector.broadcast %cst_153 : f32 to vector<8x128xf32>
    %408 = arith.addf %407, %406 : vector<8x128xf32>
    %409 = arith.divf %407, %408 : vector<8x128xf32>
    %410 = vector.extract_strided_slice %399 {offsets = [0, 128], sizes = [8, 128], strides = [1, 1]} : vector<8x384xf32> to vector<8x128xf32>
    %411 = vector.extract_strided_slice %401 {offsets = [0, 128], sizes = [8, 128], strides = [1, 1]} : vector<8x384xf32> to vector<8x128xf32>
    %412 = arith.addf %410, %411 : vector<8x128xf32>
    %413 = arith.negf %412 : vector<8x128xf32>
    %414 = math.exp %413 : vector<8x128xf32>
    %cst_154 = arith.constant 1.000000e+00 : f32
    %415 = vector.broadcast %cst_154 : f32 to vector<8x128xf32>
    %416 = arith.addf %415, %414 : vector<8x128xf32>
    %417 = arith.divf %415, %416 : vector<8x128xf32>
    %418 = vector.extract_strided_slice %399 {offsets = [0, 256], sizes = [8, 128], strides = [1, 1]} : vector<8x384xf32> to vector<8x128xf32>
    %419 = vector.extract_strided_slice %401 {offsets = [0, 256], sizes = [8, 128], strides = [1, 1]} : vector<8x384xf32> to vector<8x128xf32>
    %c0_155 = arith.constant 0 : index
    %c0_156 = arith.constant 0 : index
    %420 = vector.load %arg6[%c0_155, %c0_156] : memref<1x128xf32, #tpu.memory_space<vmem>>, vector<1x128xf32>
    %421 = vector.broadcast %420 : vector<1x128xf32> to vector<8x128xf32>
    %422 = arith.addf %419, %421 : vector<8x128xf32>
    %423 = arith.mulf %409, %422 : vector<8x128xf32>
    %424 = arith.addf %418, %423 : vector<8x128xf32>
    %425 = math.tanh %424 : vector<8x128xf32>
    %cst_157 = arith.constant 1.000000e+00 : f32
    %426 = vector.broadcast %cst_157 : f32 to vector<8x128xf32>
    %427 = arith.subf %426, %417 : vector<8x128xf32>
    %428 = arith.mulf %427, %425 : vector<8x128xf32>
    %429 = arith.mulf %417, %358 : vector<8x128xf32>
    %430 = arith.addf %428, %429 : vector<8x128xf32>
    %c5_158 = arith.constant 5 : index
    %c0_159 = arith.constant 0 : index
    %c0_160 = arith.constant 0 : index
    %431 = vector.load %arg7[%c5_158, %c0_159, %c0_160] : memref<8x8x128xf32, #tpu.memory_space<vmem>>, vector<1x8x128xf32>
    %432 = vector.shape_cast %431 : vector<1x8x128xf32> to vector<8x128xf32>
    %433 = vector.shape_cast %397 : vector<8x128xf32> to vector<1x8x128xf32>
    tpu.vector_store %arg7[%c5_158, %c0_159, %c0_160], %433 {strides = array<i32>} : memref<8x8x128xf32, #tpu.memory_space<vmem>>, vector<1x8x128xf32>,
    %c2_161 = arith.constant 2 : index
    %c0_162 = arith.constant 0 : index
    %c0_163 = arith.constant 0 : index
    %434 = vector.load %arg8[%c2_161, %c0_162, %c0_163] : memref<8x8x128xf32, #tpu.memory_space<vmem>>, vector<1x8x128xf32>
    %435 = vector.shape_cast %434 : vector<1x8x128xf32> to vector<8x128xf32>
    %436 = vector.shape_cast %430 : vector<8x128xf32> to vector<1x8x128xf32>
    tpu.vector_store %arg8[%c2_161, %c0_162, %c0_163], %436 {strides = array<i32>} : memref<8x8x128xf32, #tpu.memory_space<vmem>>, vector<1x8x128xf32>,
    %c6_164 = arith.constant 6 : index
    %c0_165 = arith.constant 0 : index
    %c0_166 = arith.constant 0 : index
    %437 = vector.load %arg1[%c6_164, %c0_165, %c0_166] : memref<8x8x384xf32, #tpu.memory_space<vmem>>, vector<1x8x384xf32>
    %438 = vector.shape_cast %437 : vector<1x8x384xf32> to vector<8x384xf32>
    %c0_167 = arith.constant 0 : index
    %c0_168 = arith.constant 0 : index
    %439 = vector.load %arg3[%c0_167, %c0_168] : memref<128x384xf32, #tpu.memory_space<vmem>>, vector<128x384xf32>
    %cst_169 = arith.constant dense<0.000000e+00> : vector<8x384xf32>
    %440 = tpu.matmul %397, %439, %cst_169 {dimension_numbers = #tpu.dot_dimension_numbers<[1], [0], [0], [1], [0, 0, 1, 1], [], []>} : vector<8x128xf32>, vector<128x384xf32>, vector<8x384xf32> -> vector<8x384xf32>
    %441 = vector.extract_strided_slice %438 {offsets = [0, 0], sizes = [8, 128], strides = [1, 1]} : vector<8x384xf32> to vector<8x128xf32>
    %442 = vector.extract_strided_slice %440 {offsets = [0, 0], sizes = [8, 128], strides = [1, 1]} : vector<8x384xf32> to vector<8x128xf32>
    %443 = arith.addf %441, %442 : vector<8x128xf32>
    %444 = arith.negf %443 : vector<8x128xf32>
    %445 = math.exp %444 : vector<8x128xf32>
    %cst_170 = arith.constant 1.000000e+00 : f32
    %446 = vector.broadcast %cst_170 : f32 to vector<8x128xf32>
    %447 = arith.addf %446, %445 : vector<8x128xf32>
    %448 = arith.divf %446, %447 : vector<8x128xf32>
    %449 = vector.extract_strided_slice %438 {offsets = [0, 128], sizes = [8, 128], strides = [1, 1]} : vector<8x384xf32> to vector<8x128xf32>
    %450 = vector.extract_strided_slice %440 {offsets = [0, 128], sizes = [8, 128], strides = [1, 1]} : vector<8x384xf32> to vector<8x128xf32>
    %451 = arith.addf %449, %450 : vector<8x128xf32>
    %452 = arith.negf %451 : vector<8x128xf32>
    %453 = math.exp %452 : vector<8x128xf32>
    %cst_171 = arith.constant 1.000000e+00 : f32
    %454 = vector.broadcast %cst_171 : f32 to vector<8x128xf32>
    %455 = arith.addf %454, %453 : vector<8x128xf32>
    %456 = arith.divf %454, %455 : vector<8x128xf32>
    %457 = vector.extract_strided_slice %438 {offsets = [0, 256], sizes = [8, 128], strides = [1, 1]} : vector<8x384xf32> to vector<8x128xf32>
    %458 = vector.extract_strided_slice %440 {offsets = [0, 256], sizes = [8, 128], strides = [1, 1]} : vector<8x384xf32> to vector<8x128xf32>
    %c0_172 = arith.constant 0 : index
    %c0_173 = arith.constant 0 : index
    %459 = vector.load %arg5[%c0_172, %c0_173] : memref<1x128xf32, #tpu.memory_space<vmem>>, vector<1x128xf32>
    %460 = vector.broadcast %459 : vector<1x128xf32> to vector<8x128xf32>
    %461 = arith.addf %458, %460 : vector<8x128xf32>
    %462 = arith.mulf %448, %461 : vector<8x128xf32>
    %463 = arith.addf %457, %462 : vector<8x128xf32>
    %464 = math.tanh %463 : vector<8x128xf32>
    %cst_174 = arith.constant 1.000000e+00 : f32
    %465 = vector.broadcast %cst_174 : f32 to vector<8x128xf32>
    %466 = arith.subf %465, %456 : vector<8x128xf32>
    %467 = arith.mulf %466, %464 : vector<8x128xf32>
    %468 = arith.mulf %456, %397 : vector<8x128xf32>
    %469 = arith.addf %467, %468 : vector<8x128xf32>
    %c1_175 = arith.constant 1 : index
    %c0_176 = arith.constant 0 : index
    %c0_177 = arith.constant 0 : index
    %470 = vector.load %arg2[%c1_175, %c0_176, %c0_177] : memref<8x8x384xf32, #tpu.memory_space<vmem>>, vector<1x8x384xf32>
    %471 = vector.shape_cast %470 : vector<1x8x384xf32> to vector<8x384xf32>
    %c0_178 = arith.constant 0 : index
    %c0_179 = arith.constant 0 : index
    %472 = vector.load %arg4[%c0_178, %c0_179] : memref<128x384xf32, #tpu.memory_space<vmem>>, vector<128x384xf32>
    %cst_180 = arith.constant dense<0.000000e+00> : vector<8x384xf32>
    %473 = tpu.matmul %430, %472, %cst_180 {dimension_numbers = #tpu.dot_dimension_numbers<[1], [0], [0], [1], [0, 0, 1, 1], [], []>} : vector<8x128xf32>, vector<128x384xf32>, vector<8x384xf32> -> vector<8x384xf32>
    %474 = vector.extract_strided_slice %471 {offsets = [0, 0], sizes = [8, 128], strides = [1, 1]} : vector<8x384xf32> to vector<8x128xf32>
    %475 = vector.extract_strided_slice %473 {offsets = [0, 0], sizes = [8, 128], strides = [1, 1]} : vector<8x384xf32> to vector<8x128xf32>
    %476 = arith.addf %474, %475 : vector<8x128xf32>
    %477 = arith.negf %476 : vector<8x128xf32>
    %478 = math.exp %477 : vector<8x128xf32>
    %cst_181 = arith.constant 1.000000e+00 : f32
    %479 = vector.broadcast %cst_181 : f32 to vector<8x128xf32>
    %480 = arith.addf %479, %478 : vector<8x128xf32>
    %481 = arith.divf %479, %480 : vector<8x128xf32>
    %482 = vector.extract_strided_slice %471 {offsets = [0, 128], sizes = [8, 128], strides = [1, 1]} : vector<8x384xf32> to vector<8x128xf32>
    %483 = vector.extract_strided_slice %473 {offsets = [0, 128], sizes = [8, 128], strides = [1, 1]} : vector<8x384xf32> to vector<8x128xf32>
    %484 = arith.addf %482, %483 : vector<8x128xf32>
    %485 = arith.negf %484 : vector<8x128xf32>
    %486 = math.exp %485 : vector<8x128xf32>
    %cst_182 = arith.constant 1.000000e+00 : f32
    %487 = vector.broadcast %cst_182 : f32 to vector<8x128xf32>
    %488 = arith.addf %487, %486 : vector<8x128xf32>
    %489 = arith.divf %487, %488 : vector<8x128xf32>
    %490 = vector.extract_strided_slice %471 {offsets = [0, 256], sizes = [8, 128], strides = [1, 1]} : vector<8x384xf32> to vector<8x128xf32>
    %491 = vector.extract_strided_slice %473 {offsets = [0, 256], sizes = [8, 128], strides = [1, 1]} : vector<8x384xf32> to vector<8x128xf32>
    %c0_183 = arith.constant 0 : index
    %c0_184 = arith.constant 0 : index
    %492 = vector.load %arg6[%c0_183, %c0_184] : memref<1x128xf32, #tpu.memory_space<vmem>>, vector<1x128xf32>
    %493 = vector.broadcast %492 : vector<1x128xf32> to vector<8x128xf32>
    %494 = arith.addf %491, %493 : vector<8x128xf32>
    %495 = arith.mulf %481, %494 : vector<8x128xf32>
    %496 = arith.addf %490, %495 : vector<8x128xf32>
    %497 = math.tanh %496 : vector<8x128xf32>
    %cst_185 = arith.constant 1.000000e+00 : f32
    %498 = vector.broadcast %cst_185 : f32 to vector<8x128xf32>
    %499 = arith.subf %498, %489 : vector<8x128xf32>
    %500 = arith.mulf %499, %497 : vector<8x128xf32>
    %501 = arith.mulf %489, %430 : vector<8x128xf32>
    %502 = arith.addf %500, %501 : vector<8x128xf32>
    %c6_186 = arith.constant 6 : index
    %c0_187 = arith.constant 0 : index
    %c0_188 = arith.constant 0 : index
    %503 = vector.load %arg7[%c6_186, %c0_187, %c0_188] : memref<8x8x128xf32, #tpu.memory_space<vmem>>, vector<1x8x128xf32>
    %504 = vector.shape_cast %503 : vector<1x8x128xf32> to vector<8x128xf32>
    %505 = vector.shape_cast %469 : vector<8x128xf32> to vector<1x8x128xf32>
    tpu.vector_store %arg7[%c6_186, %c0_187, %c0_188], %505 {strides = array<i32>} : memref<8x8x128xf32, #tpu.memory_space<vmem>>, vector<1x8x128xf32>,
    %c1_189 = arith.constant 1 : index
    %c0_190 = arith.constant 0 : index
    %c0_191 = arith.constant 0 : index
    %506 = vector.load %arg8[%c1_189, %c0_190, %c0_191] : memref<8x8x128xf32, #tpu.memory_space<vmem>>, vector<1x8x128xf32>
    %507 = vector.shape_cast %506 : vector<1x8x128xf32> to vector<8x128xf32>
    %508 = vector.shape_cast %502 : vector<8x128xf32> to vector<1x8x128xf32>
    tpu.vector_store %arg8[%c1_189, %c0_190, %c0_191], %508 {strides = array<i32>} : memref<8x8x128xf32, #tpu.memory_space<vmem>>, vector<1x8x128xf32>,
    %c7_192 = arith.constant 7 : index
    %c0_193 = arith.constant 0 : index
    %c0_194 = arith.constant 0 : index
    %509 = vector.load %arg1[%c7_192, %c0_193, %c0_194] : memref<8x8x384xf32, #tpu.memory_space<vmem>>, vector<1x8x384xf32>
    %510 = vector.shape_cast %509 : vector<1x8x384xf32> to vector<8x384xf32>
    %c0_195 = arith.constant 0 : index
    %c0_196 = arith.constant 0 : index
    %511 = vector.load %arg3[%c0_195, %c0_196] : memref<128x384xf32, #tpu.memory_space<vmem>>, vector<128x384xf32>
    %cst_197 = arith.constant dense<0.000000e+00> : vector<8x384xf32>
    %512 = tpu.matmul %469, %511, %cst_197 {dimension_numbers = #tpu.dot_dimension_numbers<[1], [0], [0], [1], [0, 0, 1, 1], [], []>} : vector<8x128xf32>, vector<128x384xf32>, vector<8x384xf32> -> vector<8x384xf32>
    %513 = vector.extract_strided_slice %510 {offsets = [0, 0], sizes = [8, 128], strides = [1, 1]} : vector<8x384xf32> to vector<8x128xf32>
    %514 = vector.extract_strided_slice %512 {offsets = [0, 0], sizes = [8, 128], strides = [1, 1]} : vector<8x384xf32> to vector<8x128xf32>
    %515 = arith.addf %513, %514 : vector<8x128xf32>
    %516 = arith.negf %515 : vector<8x128xf32>
    %517 = math.exp %516 : vector<8x128xf32>
    %cst_198 = arith.constant 1.000000e+00 : f32
    %518 = vector.broadcast %cst_198 : f32 to vector<8x128xf32>
    %519 = arith.addf %518, %517 : vector<8x128xf32>
    %520 = arith.divf %518, %519 : vector<8x128xf32>
    %521 = vector.extract_strided_slice %510 {offsets = [0, 128], sizes = [8, 128], strides = [1, 1]} : vector<8x384xf32> to vector<8x128xf32>
    %522 = vector.extract_strided_slice %512 {offsets = [0, 128], sizes = [8, 128], strides = [1, 1]} : vector<8x384xf32> to vector<8x128xf32>
    %523 = arith.addf %521, %522 : vector<8x128xf32>
    %524 = arith.negf %523 : vector<8x128xf32>
    %525 = math.exp %524 : vector<8x128xf32>
    %cst_199 = arith.constant 1.000000e+00 : f32
    %526 = vector.broadcast %cst_199 : f32 to vector<8x128xf32>
    %527 = arith.addf %526, %525 : vector<8x128xf32>
    %528 = arith.divf %526, %527 : vector<8x128xf32>
    %529 = vector.extract_strided_slice %510 {offsets = [0, 256], sizes = [8, 128], strides = [1, 1]} : vector<8x384xf32> to vector<8x128xf32>
    %530 = vector.extract_strided_slice %512 {offsets = [0, 256], sizes = [8, 128], strides = [1, 1]} : vector<8x384xf32> to vector<8x128xf32>
    %c0_200 = arith.constant 0 : index
    %c0_201 = arith.constant 0 : index
    %531 = vector.load %arg5[%c0_200, %c0_201] : memref<1x128xf32, #tpu.memory_space<vmem>>, vector<1x128xf32>
    %532 = vector.broadcast %531 : vector<1x128xf32> to vector<8x128xf32>
    %533 = arith.addf %530, %532 : vector<8x128xf32>
    %534 = arith.mulf %520, %533 : vector<8x128xf32>
    %535 = arith.addf %529, %534 : vector<8x128xf32>
    %536 = math.tanh %535 : vector<8x128xf32>
    %cst_202 = arith.constant 1.000000e+00 : f32
    %537 = vector.broadcast %cst_202 : f32 to vector<8x128xf32>
    %538 = arith.subf %537, %528 : vector<8x128xf32>
    %539 = arith.mulf %538, %536 : vector<8x128xf32>
    %540 = arith.mulf %528, %469 : vector<8x128xf32>
    %541 = arith.addf %539, %540 : vector<8x128xf32>
    %c0_203 = arith.constant 0 : index
    %c0_204 = arith.constant 0 : index
    %c0_205 = arith.constant 0 : index
    %542 = vector.load %arg2[%c0_203, %c0_204, %c0_205] : memref<8x8x384xf32, #tpu.memory_space<vmem>>, vector<1x8x384xf32>
    %543 = vector.shape_cast %542 : vector<1x8x384xf32> to vector<8x384xf32>
    %c0_206 = arith.constant 0 : index
    %c0_207 = arith.constant 0 : index
    %544 = vector.load %arg4[%c0_206, %c0_207] : memref<128x384xf32, #tpu.memory_space<vmem>>, vector<128x384xf32>
    %cst_208 = arith.constant dense<0.000000e+00> : vector<8x384xf32>
    %545 = tpu.matmul %502, %544, %cst_208 {dimension_numbers = #tpu.dot_dimension_numbers<[1], [0], [0], [1], [0, 0, 1, 1], [], []>} : vector<8x128xf32>, vector<128x384xf32>, vector<8x384xf32> -> vector<8x384xf32>
    %546 = vector.extract_strided_slice %543 {offsets = [0, 0], sizes = [8, 128], strides = [1, 1]} : vector<8x384xf32> to vector<8x128xf32>
    %547 = vector.extract_strided_slice %545 {offsets = [0, 0], sizes = [8, 128], strides = [1, 1]} : vector<8x384xf32> to vector<8x128xf32>
    %548 = arith.addf %546, %547 : vector<8x128xf32>
    %549 = arith.negf %548 : vector<8x128xf32>
    %550 = math.exp %549 : vector<8x128xf32>
    %cst_209 = arith.constant 1.000000e+00 : f32
    %551 = vector.broadcast %cst_209 : f32 to vector<8x128xf32>
    %552 = arith.addf %551, %550 : vector<8x128xf32>
    %553 = arith.divf %551, %552 : vector<8x128xf32>
    %554 = vector.extract_strided_slice %543 {offsets = [0, 128], sizes = [8, 128], strides = [1, 1]} : vector<8x384xf32> to vector<8x128xf32>
    %555 = vector.extract_strided_slice %545 {offsets = [0, 128], sizes = [8, 128], strides = [1, 1]} : vector<8x384xf32> to vector<8x128xf32>
    %556 = arith.addf %554, %555 : vector<8x128xf32>
    %557 = arith.negf %556 : vector<8x128xf32>
    %558 = math.exp %557 : vector<8x128xf32>
    %cst_210 = arith.constant 1.000000e+00 : f32
    %559 = vector.broadcast %cst_210 : f32 to vector<8x128xf32>
    %560 = arith.addf %559, %558 : vector<8x128xf32>
    %561 = arith.divf %559, %560 : vector<8x128xf32>
    %562 = vector.extract_strided_slice %543 {offsets = [0, 256], sizes = [8, 128], strides = [1, 1]} : vector<8x384xf32> to vector<8x128xf32>
    %563 = vector.extract_strided_slice %545 {offsets = [0, 256], sizes = [8, 128], strides = [1, 1]} : vector<8x384xf32> to vector<8x128xf32>
    %c0_211 = arith.constant 0 : index
    %c0_212 = arith.constant 0 : index
    %564 = vector.load %arg6[%c0_211, %c0_212] : memref<1x128xf32, #tpu.memory_space<vmem>>, vector<1x128xf32>
    %565 = vector.broadcast %564 : vector<1x128xf32> to vector<8x128xf32>
    %566 = arith.addf %563, %565 : vector<8x128xf32>
    %567 = arith.mulf %553, %566 : vector<8x128xf32>
    %568 = arith.addf %562, %567 : vector<8x128xf32>
    %569 = math.tanh %568 : vector<8x128xf32>
    %cst_213 = arith.constant 1.000000e+00 : f32
    %570 = vector.broadcast %cst_213 : f32 to vector<8x128xf32>
    %571 = arith.subf %570, %561 : vector<8x128xf32>
    %572 = arith.mulf %571, %569 : vector<8x128xf32>
    %573 = arith.mulf %561, %502 : vector<8x128xf32>
    %574 = arith.addf %572, %573 : vector<8x128xf32>
    %c7_214 = arith.constant 7 : index
    %c0_215 = arith.constant 0 : index
    %c0_216 = arith.constant 0 : index
    %575 = vector.load %arg7[%c7_214, %c0_215, %c0_216] : memref<8x8x128xf32, #tpu.memory_space<vmem>>, vector<1x8x128xf32>
    %576 = vector.shape_cast %575 : vector<1x8x128xf32> to vector<8x128xf32>
    %577 = vector.shape_cast %541 : vector<8x128xf32> to vector<1x8x128xf32>
    tpu.vector_store %arg7[%c7_214, %c0_215, %c0_216], %577 {strides = array<i32>} : memref<8x8x128xf32, #tpu.memory_space<vmem>>, vector<1x8x128xf32>,
    %c0_217 = arith.constant 0 : index
    %c0_218 = arith.constant 0 : index
    %c0_219 = arith.constant 0 : index
    %578 = vector.load %arg8[%c0_217, %c0_218, %c0_219] : memref<8x8x128xf32, #tpu.memory_space<vmem>>, vector<1x8x128xf32>
    %579 = vector.shape_cast %578 : vector<1x8x128xf32> to vector<8x128xf32>
    %580 = vector.shape_cast %574 : vector<8x128xf32> to vector<1x8x128xf32>
    tpu.vector_store %arg8[%c0_217, %c0_218, %c0_219], %580 {strides = array<i32>} : memref<8x8x128xf32, #tpu.memory_space<vmem>>, vector<1x8x128xf32>,
    %c0_220 = arith.constant 0 : index
    %c0_221 = arith.constant 0 : index
    %581 = vector.load %arg9[%c0_220, %c0_221] : memref<8x128xf32, #tpu.memory_space<vmem>>, vector<8x128xf32>
    tpu.vector_store %arg9[%c0_220, %c0_221], %541 {strides = array<i32>} : memref<8x128xf32, #tpu.memory_space<vmem>>, vector<8x128xf32>,
    %c0_222 = arith.constant 0 : index
    %c0_223 = arith.constant 0 : index
    %582 = vector.load %arg10[%c0_222, %c0_223] : memref<8x128xf32, #tpu.memory_space<vmem>>, vector<8x128xf32>
    tpu.vector_store %arg10[%c0_222, %c0_223], %574 {strides = array<i32>} : memref<8x128xf32, #tpu.memory_space<vmem>>, vector<8x128xf32>,
    return
  }
  func.func @transform_0(%arg0: i32) -> (i32, i32, i32) {
    %c0_i32 = arith.constant 0 : i32
    %c0_i32_0 = arith.constant 0 : i32
    %c0_i32_1 = arith.constant 0 : i32
    return %arg0, %c0_i32, %c0_i32_0 : i32, i32, i32
  }
  func.func @transform_1(%arg0: i32) -> (i32, i32, i32) {
    %c0_i32 = arith.constant 0 : i32
    %0 = arith.subi %c0_i32, %arg0 : i32
    %c0_i32_0 = arith.constant 0 : i32
    %c0_i32_1 = arith.constant 0 : i32
    %c0_i32_2 = arith.constant 0 : i32
    return %0, %c0_i32_0, %c0_i32_1 : i32, i32, i32
  }
  func.func @transform_2(%arg0: i32) -> (i32, i32) {
    %c0_i32 = arith.constant 0 : i32
    %c0_i32_0 = arith.constant 0 : i32
    %c0_i32_1 = arith.constant 0 : i32
    return %c0_i32, %c0_i32_0 : i32, i32
  }
  func.func @transform_3(%arg0: i32) -> (i32, i32) {
    %c0_i32 = arith.constant 0 : i32
    %c0_i32_0 = arith.constant 0 : i32
    %c0_i32_1 = arith.constant 0 : i32
    return %c0_i32, %c0_i32_0 : i32, i32
  }
  func.func @transform_4(%arg0: i32) -> (i32, i32) {
    %c0_i32 = arith.constant 0 : i32
    %c0_i32_0 = arith.constant 0 : i32
    %c0_i32_1 = arith.constant 0 : i32
    return %c0_i32, %c0_i32_0 : i32, i32
  }
  func.func @transform_5(%arg0: i32) -> (i32, i32) {
    %c0_i32 = arith.constant 0 : i32
    %c0_i32_0 = arith.constant 0 : i32
    %c0_i32_1 = arith.constant 0 : i32
    return %c0_i32, %c0_i32_0 : i32, i32
  }
  func.func @transform_6(%arg0: i32) -> (i32, i32, i32) {
    %c0_i32 = arith.constant 0 : i32
    %c0_i32_0 = arith.constant 0 : i32
    %c0_i32_1 = arith.constant 0 : i32
    return %arg0, %c0_i32, %c0_i32_0 : i32, i32, i32
  }
  func.func @transform_7(%arg0: i32) -> (i32, i32, i32) {
    %c0_i32 = arith.constant 0 : i32
    %0 = arith.subi %c0_i32, %arg0 : i32
    %c0_i32_0 = arith.constant 0 : i32
    %c0_i32_1 = arith.constant 0 : i32
    %c0_i32_2 = arith.constant 0 : i32
    return %0, %c0_i32_0, %c0_i32_1 : i32, i32, i32
  }
}

</mosaic_0001>

<bundles_post_ra>
// kernel: bidirectional_gru.2
= control target key start
LH: loop header
LB: loop body
LE: loop exit
PB: predicated region body
PF: predicated region fallthrough
CT: control target
= control target key end

     0   :  { %v580_v3 = vmov 0.0   ;;  %s1170_s1 = inlined_call_operand.vmem [shape: f32[128,768], index: 1, kind: input, shape index: {}]   ;;  %s1171_s0 = inlined_call_operand.vmem [shape: f32[8,8,128], index: 0, kind: input, shape index: {}]   ;;  %s1172_s2 = inlined_call_operand.vmem [shape: f32[1,768], index: 2, kind: input, shape index: {}]   ;;  %s1173_s3 = inlined_call_operand.vmem [shape: f32[8,8,384], index: 3, kind: output, shape index: {0}]   ;;  %s1174_s4 = inlined_call_operand.vmem [shape: f32[8,8,384], index: 4, kind: output, shape index: {1}]  }
   0x1   :  { %v115_v0 = vld [vmem:[%s1170_s1 + $0x2d8] sm:$0xff]  ;;  %v117_v1 = vld [vmem:[%s1170_s1 + $0x2e8] sm:$0xff]  ;;  %v114_v2 = vld [vmem:[%s1170_s1 + $0x2d0] sm:$0xff]  ;;  %216 = vmatprep.mubr.f32.mxu0 %v580_v3  ;;  %329 = vmatprep.mubr.f32.mxu1 %v580_v3 }
   0x2   :  { %152 = vmatprep.subr.mxu0 %v115_v0  ;;  %265 = vmatprep.subr.mxu1 %v117_v1  ;;  %v116_v4 = vld [vmem:[%s1170_s1 + $0x2e0] sm:$0xff]  ;;  %v109_v5 = vld [vmem:[%s1170_s1 + $0x2a8] sm:$0xff]  ;;  %v111_v6 = vld [vmem:[%s1170_s1 + $0x2b8] sm:$0xff] }
   0x3   :  { %153 = vmatpush1.msra.mxu0 %v114_v2  ;;  %266 = vmatpush1.msra.mxu1 %v116_v4  ;;  %v108_v7 = vld [vmem:[%s1170_s1 + $0x2a0] sm:$0xff]  ;;  %v110_v8 = vld [vmem:[%s1170_s1 + $0x2b0] sm:$0xff]  ;;  %v103_v9 = vld [vmem:[%s1170_s1 + $0x278] sm:$0xff] }
   0x4   :  { %154 = vmatprep.subr.mxu0 %v109_v5  ;;  %267 = vmatprep.subr.mxu1 %v111_v6  ;;  %v105_v10 = vld [vmem:[%s1170_s1 + $0x288] sm:$0xff]  ;;  %v102_v11 = vld [vmem:[%s1170_s1 + $0x270] sm:$0xff]  ;;  %v104_v12 = vld [vmem:[%s1170_s1 + $0x280] sm:$0xff] }
   0x5   :  { %155 = vmatpush1.msra.mxu0 %v108_v7  ;;  %268 = vmatpush1.msra.mxu1 %v110_v8  ;;  %v97_v13 = vld [vmem:[%s1170_s1 + $0x248] sm:$0xff]  ;;  %v99_v14 = vld [vmem:[%s1170_s1 + $0x258] sm:$0xff]  ;;  %v96_v15 = vld [vmem:[%s1170_s1 + $0x240] sm:$0xff] }
   0x6   :  { %156 = vmatprep.subr.mxu0 %v103_v9  ;;  %269 = vmatprep.subr.mxu1 %v105_v10  ;;  %v98_v16 = vld [vmem:[%s1170_s1 + $0x250] sm:$0xff]  ;;  %v91_v17 = vld [vmem:[%s1170_s1 + $0x218] sm:$0xff]  ;;  %v93_v18 = vld [vmem:[%s1170_s1 + $0x228] sm:$0xff] }
   0x7   :  { %157 = vmatpush1.msra.mxu0 %v102_v11  ;;  %270 = vmatpush1.msra.mxu1 %v104_v12  ;;  %v90_v19 = vld [vmem:[%s1170_s1 + $0x210] sm:$0xff]  ;;  %v92_v20 = vld [vmem:[%s1170_s1 + $0x220] sm:$0xff]  ;;  %v85_v21 = vld [vmem:[%s1170_s1 + $0x1e8] sm:$0xff] }
   0x8   :  { %158 = vmatprep.subr.mxu0 %v97_v13  ;;  %271 = vmatprep.subr.mxu1 %v99_v14  ;;  %v87_v22 = vld [vmem:[%s1170_s1 + $0x1f8] sm:$0xff]  ;;  %v84_v23 = vld [vmem:[%s1170_s1 + $0x1e0] sm:$0xff]  ;;  %v86_v24 = vld [vmem:[%s1170_s1 + $0x1f0] sm:$0xff] }
   0x9   :  { %159 = vmatpush1.msra.mxu0 %v96_v15  ;;  %272 = vmatpush1.msra.mxu1 %v98_v16  ;;  %v79_v25 = vld [vmem:[%s1170_s1 + $0x1b8] sm:$0xff]  ;;  %v81_v26 = vld [vmem:[%s1170_s1 + $0x1c8] sm:$0xff]  ;;  %v78_v27 = vld [vmem:[%s1170_s1 + $0x1b0] sm:$0xff] }
   0xa   :  { %160 = vmatprep.subr.mxu0 %v91_v17  ;;  %273 = vmatprep.subr.mxu1 %v93_v18  ;;  %v80_v28 = vld [vmem:[%s1170_s1 + $0x1c0] sm:$0xff]  ;;  %v73_v29 = vld [vmem:[%s1170_s1 + $0x188] sm:$0xff]  ;;  %v75_v30 = vld [vmem:[%s1170_s1 + $0x198] sm:$0xff] }
   0xb   :  { %161 = vmatpush1.msra.mxu0 %v90_v19  ;;  %274 = vmatpush1.msra.mxu1 %v92_v20  ;;  %v72_v31 = vld [vmem:[%s1170_s1 + $0x180] sm:$0xff]  ;;  %v74_v32 = vld [vmem:[%s1170_s1 + $0x190] sm:$0xff]  ;;  %v67_v33 = vld [vmem:[%s1170_s1 + $0x158] sm:$0xff] }
   0xc   :  { %162 = vmatprep.subr.mxu0 %v85_v21  ;;  %275 = vmatprep.subr.mxu1 %v87_v22  ;;  %v69_v34 = vld [vmem:[%s1170_s1 + $0x168] sm:$0xff]  ;;  %v66_v35 = vld [vmem:[%s1170_s1 + $0x150] sm:$0xff]  ;;  %v68_v36 = vld [vmem:[%s1170_s1 + $0x160] sm:$0xff] }
   0xd   :  { %163 = vmatpush1.msra.mxu0 %v84_v23  ;;  %276 = vmatpush1.msra.mxu1 %v86_v24  ;;  %v61_v37 = vld [vmem:[%s1170_s1 + $0x128] sm:$0xff]  ;;  %v63_v38 = vld [vmem:[%s1170_s1 + $0x138] sm:$0xff]  ;;  %v60_v39 = vld [vmem:[%s1170_s1 + $0x120] sm:$0xff] }
   0xe   :  { %164 = vmatprep.subr.mxu0 %v79_v25  ;;  %277 = vmatprep.subr.mxu1 %v81_v26  ;;  %v62_v40 = vld [vmem:[%s1170_s1 + $0x130] sm:$0xff]  ;;  %v55_v41 = vld [vmem:[%s1170_s1 + $0xf8] sm:$0xff]  ;;  %v57_v42 = vld [vmem:[%s1170_s1 + $0x108] sm:$0xff] }
   0xf   :  { %165 = vmatpush1.msra.mxu0 %v78_v27  ;;  %278 = vmatpush1.msra.mxu1 %v80_v28  ;;  %v54_v43 = vld [vmem:[%s1170_s1 + $0xf0] sm:$0xff]  ;;  %v56_v44 = vld [vmem:[%s1170_s1 + $0x100] sm:$0xff]  ;;  %v49_v45 = vld [vmem:[%s1170_s1 + $0xc8] sm:$0xff] }
  0x10   :  { %166 = vmatprep.subr.mxu0 %v73_v29  ;;  %279 = vmatprep.subr.mxu1 %v75_v30  ;;  %v51_v46 = vld [vmem:[%s1170_s1 + $0xd8] sm:$0xff]  ;;  %v48_v47 = vld [vmem:[%s1170_s1 + $0xc0] sm:$0xff]  ;;  %v50_v48 = vld [vmem:[%s1170_s1 + $0xd0] sm:$0xff] }
  0x11   :  { %167 = vmatpush1.msra.mxu0 %v72_v31  ;;  %280 = vmatpush1.msra.mxu1 %v74_v32  ;;  %v43_v49 = vld [vmem:[%s1170_s1 + $0x98] sm:$0xff]  ;;  %v45_v50 = vld [vmem:[%s1170_s1 + $0xa8] sm:$0xff]  ;;  %v42_v51 = vld [vmem:[%s1170_s1 + $0x90] sm:$0xff] }
  0x12   :  { %168 = vmatprep.subr.mxu0 %v67_v33  ;;  %281 = vmatprep.subr.mxu1 %v69_v34  ;;  %v44_v52 = vld [vmem:[%s1170_s1 + $0xa0] sm:$0xff]  ;;  %v37_v53 = vld [vmem:[%s1170_s1 + $0x68] sm:$0xff]  ;;  %v39_v54 = vld [vmem:[%s1170_s1 + $0x78] sm:$0xff] }
  0x13   :  { %169 = vmatpush1.msra.mxu0 %v66_v35  ;;  %282 = vmatpush1.msra.mxu1 %v68_v36  ;;  %v36_v55 = vld [vmem:[%s1170_s1 + $0x60] sm:$0xff]  ;;  %v38_v56 = vld [vmem:[%s1170_s1 + $0x70] sm:$0xff]  ;;  %v31_v57 = vld [vmem:[%s1170_s1 + $0x38] sm:$0xff] }
  0x14   :  { %170 = vmatprep.subr.mxu0 %v61_v37  ;;  %283 = vmatprep.subr.mxu1 %v63_v38  ;;  %v33_v58 = vld [vmem:[%s1170_s1 + $0x48] sm:$0xff]  ;;  %v30_v59 = vld [vmem:[%s1170_s1 + $0x30] sm:$0xff]  ;;  %v32_v60 = vld [vmem:[%s1170_s1 + $0x40] sm:$0xff] }
  0x15   :  { %171 = vmatpush1.msra.mxu0 %v60_v39  ;;  %284 = vmatpush1.msra.mxu1 %v62_v40  ;;  %v25_v61 = vld [vmem:[%s1170_s1 + $0x8] sm:$0xff]  ;;  %v27_v62 = vld [vmem:[%s1170_s1 + $0x18] sm:$0xff]  ;;  %v24_v63 = vld [vmem:[%s1170_s1] sm:$0xff] }
  0x16   :  { %172 = vmatprep.subr.mxu0 %v55_v41  ;;  %285 = vmatprep.subr.mxu1 %v57_v42  ;;  %v26_v0 = vld [vmem:[%s1170_s1 + $0x10] sm:$0xff]  ;;  %v803_v1 = vld [vmem:[%s1171_s0] sm:$0xff]  ;;  %v119_v2 = vld [vmem:[%s1170_s1 + $0x2f8] sm:$0xff]  ;;  %v122_v42 = vlaneseq }
  0x17   :  { %173 = vmatpush1.msra.mxu0 %v54_v43  ;;  %286 = vmatpush1.msra.mxu1 %v56_v44  ;;  %v118_v4 = vld [vmem:[%s1170_s1 + $0x2f0] sm:$0xff]  ;;  %v113_v5 = vld [vmem:[%s1170_s1 + $0x2c8] sm:$0xff]  ;;  %v112_v6 = vld [vmem:[%s1170_s1 + $0x2c0] sm:$0xff] }
  0x18   :  { %174 = vmatprep.subr.mxu0 %v49_v45  ;;  %287 = vmatprep.subr.mxu1 %v51_v46  ;;  %v822_v7 = vld [vmem:[%s1171_s0 + $0x8] sm:$0xff]  ;;  %v107_v8 = vld [vmem:[%s1170_s1 + $0x298] sm:$0xff]  ;;  %v106_v9 = vld [vmem:[%s1170_s1 + $0x290] sm:$0xff]  ;;  %v967_v43 = vshrl.u32 %v122_v42, 7 }
  0x19   :  { %175 = vmatpush1.msra.mxu0 %v48_v47  ;;  %288 = vmatpush1.msra.mxu1 %v50_v48  ;;  %v101_v10 = vld [vmem:[%s1170_s1 + $0x268] sm:$0xff]  ;;  %v100_v11 = vld [vmem:[%s1170_s1 + $0x260] sm:$0xff]  ;;  %v843_v12 = vld [vmem:[%s1171_s0 + $0x10] sm:$0xff] }
  0x1a   :  { %176 = vmatprep.subr.mxu0 %v43_v49  ;;  %289 = vmatprep.subr.mxu1 %v45_v50  ;;  %v95_v13 = vld [vmem:[%s1170_s1 + $0x238] sm:$0xff]  ;;  %v94_v14 = vld [vmem:[%s1170_s1 + $0x230] sm:$0xff]  ;;  %v89_v15 = vld [vmem:[%s1170_s1 + $0x208] sm:$0xff]  ;;  %v124_v44 = vsub.s32 0, %v967_v43  ;;  %v132_v45 = vsub.s32 2, %v967_v43  ;;  %v128_v47 = vsub.s32 1, %v967_v43 }
  0x1b   :  { %177 = vmatpush1.msra.mxu0 %v42_v51  ;;  %290 = vmatpush1.msra.mxu1 %v44_v52  ;;  %v88_v16 = vld [vmem:[%s1170_s1 + $0x200] sm:$0xff]  ;;  %v864_v17 = vld [vmem:[%s1171_s0 + $0x18] sm:$0xff]  ;;  %v82_v19 = vld [vmem:[%s1170_s1 + $0x1d0] sm:$0xff]  ;;  %v136_v48 = vsub.s32 3, %v967_v43 }
  0x1c   :  { %178 = vmatprep.subr.mxu0 %v37_v53  ;;  %291 = vmatprep.subr.mxu1 %v39_v54  ;;  %v83_v18 = vld [vmem:[%s1170_s1 + $0x1d8] sm:$0xff]  ;;  %v77_v20 = vld [vmem:[%s1170_s1 + $0x1a8] sm:$0xff]  ;;  %v76_v21 = vld [vmem:[%s1170_s1 + $0x1a0] sm:$0xff] }
  0x1d   :  { %179 = vmatpush1.msra.mxu0 %v36_v55  ;;  %292 = vmatpush1.msra.mxu1 %v38_v56  ;;  %v885_v22 = vld [vmem:[%s1171_s0 + $0x20] sm:$0xff]  ;;  %v71_v23 = vld [vmem:[%s1170_s1 + $0x178] sm:$0xff]  ;;  %v70_v24 = vld [vmem:[%s1170_s1 + $0x170] sm:$0xff] }
  0x1e   :  { %180 = vmatprep.subr.mxu0 %v31_v57  ;;  %293 = vmatprep.subr.mxu1 %v33_v58  ;;  %v65_v25 = vld [vmem:[%s1170_s1 + $0x148] sm:$0xff]  ;;  %v64_v26 = vld [vmem:[%s1170_s1 + $0x140] sm:$0xff]  ;;  %v59_v28 = vld [vmem:[%s1170_s1 + $0x118] sm:$0xff] }
  0x1f   :  { %181 = vmatpush1.msra.mxu0 %v30_v59  ;;  %294 = vmatpush1.msra.mxu1 %v32_v60  ;;  %v21_v27 = vld [vmem:[%s1171_s0 + $0x28] sm:$0xff]  ;;  %v58_v29 = vld [vmem:[%s1170_s1 + $0x110] sm:$0xff]  ;;  %v52_v31 = vld [vmem:[%s1170_s1 + $0xe0] sm:$0xff] }
  0x20   :  { %182 = vmatprep.subr.mxu0 %v25_v61  ;;  %295 = vmatprep.subr.mxu1 %v27_v62  ;;  %v53_v30 = vld [vmem:[%s1170_s1 + $0xe8] sm:$0xff]  ;;  %v22_v32 = vld [vmem:[%s1171_s0 + $0x30] sm:$0xff]  ;;  %v47_v33 = vld [vmem:[%s1170_s1 + $0xb8] sm:$0xff] }
  0x21   :  { %183 = vmatpush1.msra.mxu0 %v24_v63  ;;  %296 = vmatpush1.msra.mxu1 %v26_v0  ;;  %v46_v34 = vld [vmem:[%s1170_s1 + $0xb0] sm:$0xff]  ;;  %v41_v35 = vld [vmem:[%s1170_s1 + $0x88] sm:$0xff]  ;;  %v40_v36 = vld [vmem:[%s1170_s1 + $0x80] sm:$0xff] }
  0x22   :  { %217 = vmatmul.mubr.f32.vlgmr.msra.gmra.mxu0 %v803_v1  ;;  %330 = vmatmul.mubr.f32.vlgmr.msra.gmra.mxu1 %v803_v1  ;;  %v23_v37 = vld [vmem:[%s1171_s0 + $0x38] sm:$0xff]  ;;  %v34_v39 = vld [vmem:[%s1170_s1 + $0x50] sm:$0xff]  ;;  %v29_v40 = vld [vmem:[%s1170_s1 + $0x28] sm:$0xff] }
  0x23   :  { %378 = vmatprep.subr.mxu0 %v119_v2  ;;  %547 = vmatprep.subr.mxu1 %v119_v2  ;;  %v35_v38 = vld [vmem:[%s1170_s1 + $0x58] sm:$0xff]  ;;  %v28_v41 = vld [vmem:[%s1170_s1 + $0x20] sm:$0xff] }
  0x24   :  { %379 = vmatpush1.msra.mxu0 %v118_v4  ;;  %563 = vmatpush1.msra.mxu1 %v118_v4  ;;  %v974_v46 = vld [vmem:[%s1172_s2] sm:$0x3f] }
  0x25   :  { %380 = vmatprep.subr.mxu0 %v113_v5  ;;  %548 = vmatprep.subr.mxu1 %v113_v5  ;;  %v982_v49 = vrot.slane %v974_v46, %v132_v45  ;;  %v985_v50 = vrot.slane %v974_v46, %v128_v47  ;;  %v988_v51 = vrot.slane %v974_v46, %v136_v48  ;;  %v140_v47 = vsub.s32 4, %v967_v43 }
  0x26   :  { %222 = vmatprep.mubr.f32.mxu0 %v580_v3  ;;  %335 = vmatprep.mubr.f32.mxu1 %v580_v3 }
  0x27   :  { %381 = vmatpush1.msra.mxu0 %v112_v6  ;;  %564 = vmatpush1.msra.mxu1 %v112_v6 }
  0x28   :  { %223 = vmatmul.mubr.f32.gmra.mxu0 %v822_v7  ;;  %336 = vmatmul.mubr.f32.gmra.mxu1 %v822_v7 }
  0x29   :  { %382 = vmatprep.subr.mxu0 %v107_v8  ;;  %549 = vmatprep.subr.mxu1 %v107_v8 }
  0x2a   :  { %383 = vmatpush1.msra.mxu0 %v106_v9  ;;  %565 = vmatpush1.msra.mxu1 %v106_v9 }
  0x2b   :  { %384 = vmatprep.subr.mxu0 %v101_v10  ;;  %550 = vmatprep.subr.mxu1 %v101_v10 }
  0x2c   :  { %228 = vmatprep.mubr.f32.mxu0 %v580_v3  ;;  %341 = vmatprep.mubr.f32.mxu1 %v580_v3 }
  0x2d   :  { %385 = vmatpush1.msra.mxu0 %v100_v11  ;;  %566 = vmatpush1.msra.mxu1 %v100_v11 }
  0x2e   :  { %229 = vmatmul.mubr.f32.gmra.mxu0 %v843_v12  ;;  %342 = vmatmul.mubr.f32.gmra.mxu1 %v843_v12 }
  0x2f   :  { %386 = vmatprep.subr.mxu0 %v95_v13  ;;  %551 = vmatprep.subr.mxu1 %v95_v13 }
  0x30   :  { %387 = vmatpush1.msra.mxu0 %v94_v14  ;;  %567 = vmatpush1.msra.mxu1 %v94_v14 }
  0x31   :  { %388 = vmatprep.subr.mxu0 %v89_v15  ;;  %552 = vmatprep.subr.mxu1 %v89_v15 }
  0x32   :  { %234 = vmatprep.mubr.f32.mxu0 %v580_v3  ;;  %347 = vmatprep.mubr.f32.mxu1 %v580_v3 }
  0x33   :  { %389 = vmatpush1.msra.mxu0 %v88_v16  ;;  %568 = vmatpush1.msra.mxu1 %v88_v16 }
  0x34   :  { %235 = vmatmul.mubr.f32.gmra.mxu0 %v864_v17  ;;  %348 = vmatmul.mubr.f32.gmra.mxu1 %v864_v17 }
  0x35   :  { %390 = vmatprep.subr.mxu0 %v83_v18  ;;  %553 = vmatprep.subr.mxu1 %v83_v18 }
  0x36   :  { %391 = vmatpush1.msra.mxu0 %v82_v19  ;;  %569 = vmatpush1.msra.mxu1 %v82_v19 }
  0x37   :  { %392 = vmatprep.subr.mxu0 %v77_v20  ;;  %554 = vmatprep.subr.mxu1 %v77_v20 }
  0x38   :  { %240 = vmatprep.mubr.f32.mxu0 %v580_v3  ;;  %353 = vmatprep.mubr.f32.mxu1 %v580_v3 }
  0x39   :  { %393 = vmatpush1.msra.mxu0 %v76_v21  ;;  %570 = vmatpush1.msra.mxu1 %v76_v21 }
  0x3a   :  { %241 = vmatmul.mubr.f32.gmra.mxu0 %v885_v22  ;;  %354 = vmatmul.mubr.f32.gmra.mxu1 %v885_v22 }
  0x3b   :  { %394 = vmatprep.subr.mxu0 %v71_v23  ;;  %555 = vmatprep.subr.mxu1 %v71_v23 }
  0x3c   :  { %395 = vmatpush1.msra.mxu0 %v70_v24  ;;  %571 = vmatpush1.msra.mxu1 %v70_v24 }
  0x3d   :  { %396 = vmatprep.subr.mxu0 %v65_v25  ;;  %556 = vmatprep.subr.mxu1 %v65_v25 }
  0x3e   :  { %246 = vmatprep.mubr.f32.mxu0 %v580_v3  ;;  %359 = vmatprep.mubr.f32.mxu1 %v580_v3 }
  0x3f   :  { %397 = vmatpush1.msra.mxu0 %v64_v26  ;;  %572 = vmatpush1.msra.mxu1 %v64_v26 }
  0x40   :  { %247 = vmatmul.mubr.f32.gmra.mxu0 %v21_v27  ;;  %360 = vmatmul.mubr.f32.gmra.mxu1 %v21_v27 }
  0x41   :  { %398 = vmatprep.subr.mxu0 %v59_v28  ;;  %557 = vmatprep.subr.mxu1 %v59_v28 }
  0x42   :  { %399 = vmatpush1.msra.mxu0 %v58_v29  ;;  %573 = vmatpush1.msra.mxu1 %v58_v29 }
  0x43   :  { %400 = vmatprep.subr.mxu0 %v53_v30  ;;  %558 = vmatprep.subr.mxu1 %v53_v30 }
  0x44   :  { %252 = vmatprep.mubr.f32.mxu0 %v580_v3  ;;  %365 = vmatprep.mubr.f32.mxu1 %v580_v3 }
  0x45   :  { %401 = vmatpush1.msra.mxu0 %v52_v31  ;;  %574 = vmatpush1.msra.mxu1 %v52_v31 }
  0x46   :  { %253 = vmatmul.mubr.f32.gmra.mxu0 %v22_v32  ;;  %366 = vmatmul.mubr.f32.gmra.mxu1 %v22_v32 }
  0x47   :  { %402 = vmatprep.subr.mxu0 %v47_v33  ;;  %559 = vmatprep.subr.mxu1 %v47_v33 }
  0x48   :  { %403 = vmatpush1.msra.mxu0 %v46_v34  ;;  %575 = vmatpush1.msra.mxu1 %v46_v34 }
  0x49   :  { %404 = vmatprep.subr.mxu0 %v41_v35  ;;  %560 = vmatprep.subr.mxu1 %v41_v35 }
  0x4a   :  { %258 = vmatprep.mubr.f32.mxu0 %v580_v3  ;;  %371 = vmatprep.mubr.f32.mxu1 %v580_v3 }
  0x4b   :  { %405 = vmatpush1.msra.mxu0 %v40_v36  ;;  %576 = vmatpush1.msra.mxu1 %v40_v36 }
  0x4c   :  { %259 = vmatmul.mubr.f32.gmra.mxu0 %v23_v37  ;;  %372 = vmatmul.mubr.f32.gmra.mxu1 %v23_v37 }
  0x4d   :  { %406 = vmatprep.subr.mxu0 %v35_v38  ;;  %561 = vmatprep.subr.mxu1 %v35_v38 }
  0x4e   :  { %407 = vmatpush1.msra.mxu0 %v34_v39  ;;  %577 = vmatpush1.msra.mxu1 %v34_v39 }
  0x4f   :  { %408 = vmatprep.subr.mxu0 %v29_v40  ;;  %562 = vmatprep.subr.mxu1 %v29_v40 }
  0x50   :  { %409 = vmatpush1.msra.mxu0 %v28_v41  ;;  %578 = vmatpush1.msra.mxu1 %v28_v41 }
  0x51   :  { %442 = vmatprep.mubr.f32.mxu0 %v580_v3  ;;  %466 = vmatprep.mubr.f32.mxu1 %v580_v3 }
  0x52   :  { %443 = vmatmul.mubr.f32.vlgmr.msra.gmra.mxu0 %v803_v1  ;;  %467 = vmatmul.mubr.f32.vlgmr.msra.gmra.mxu1 %v885_v22 }
  0x53   :  { %448 = vmatprep.mubr.f32.mxu0 %v580_v3  ;;  %472 = vmatprep.mubr.f32.mxu1 %v580_v3 }
  0x56   :  { %449 = vmatmul.mubr.f32.gmra.mxu0 %v822_v7  ;;  %473 = vmatmul.mubr.f32.gmra.mxu1 %v21_v27 }
  0x57   :  { %454 = vmatprep.mubr.f32.mxu0 %v580_v3  ;;  %478 = vmatprep.mubr.f32.mxu1 %v580_v3 }
  0x5a   :  { %455 = vmatmul.mubr.f32.gmra.mxu0 %v843_v12  ;;  %479 = vmatmul.mubr.f32.gmra.mxu1 %v22_v32 }
  0x5b   :  { %460 = vmatprep.mubr.f32.mxu0 %v580_v3  ;;  %484 = vmatprep.mubr.f32.mxu1 %v580_v3  ;;  %v979_v3 = vrot.slane %v974_v46, %v124_v44 }
  0x5e   :  { %461 = vmatmul.mubr.f32.gmra.mxu0 %v864_v17  ;;  %485 = vmatmul.mubr.f32.gmra.mxu1 %v23_v37 }
  0xe2   :  { %v218_v52 = vpop.f32.mrf.mxu0  ;;  %v331_v53 = vpop.f32.mrf.mxu1 }
  0xe3   :  { %v219_v54 = vadd.f32 %v218_v52, %v979_v3  ;;  %v332_v55 = vadd.f32 %v331_v53, %v982_v49 }
  0xe4   :  { %v220_v56 = vpop.f32.mrf.mxu0  ;;  %v333_v57 = vpop.f32.mrf.mxu1 }
  0xe5   :  { %491 = vst [vmem:[%s1173_s3] sm:$0xff] %v219_v54  ;;  %493 = vst [vmem:[%s1173_s3 + $0x10] sm:$0xff] %v332_v55  ;;  %v221_v58 = vadd.f32 %v220_v56, %v985_v50  ;;  %v334_v59 = vadd.f32 %v333_v57, %v988_v51  ;;  %v144_v55 = vsub.s32 5, %v967_v43 }
  0xe7   :  { %492 = vst [vmem:[%s1173_s3 + $0x8] sm:$0xff] %v221_v58  ;;  %515 = vst [vmem:[%s1174_s4] sm:$0xff] %v334_v59  ;;  %v145_v43 = vrot.slane %v974_v46, %v144_v55 }
  0xe8   :  { %v224_v60 = vpop.f32.mrf.mxu0  ;;  %v337_v61 = vpop.f32.mrf.mxu1 }
  0xe9   :  { %v225_v62 = vadd.f32 %v224_v60, %v979_v3  ;;  %v338_v63 = vadd.f32 %v337_v61, %v982_v49 }
  0xea   :  { %v226_v0 = vpop.f32.mrf.mxu0  ;;  %v339_v1 = vpop.f32.mrf.mxu1 }
  0xeb   :  { %494 = vst [vmem:[%s1173_s3 + $0x18] sm:$0xff] %v225_v62  ;;  %496 = vst [vmem:[%s1173_s3 + $0x28] sm:$0xff] %v338_v63  ;;  %v227_v2 = vadd.f32 %v226_v0, %v985_v50  ;;  %v340_v4 = vadd.f32 %v339_v1, %v988_v51 }
  0xed   :  { %495 = vst [vmem:[%s1173_s3 + $0x20] sm:$0xff] %v227_v2  ;;  %518 = vst [vmem:[%s1174_s4 + $0x18] sm:$0xff] %v340_v4 }
  0xee   :  { %v230_v5 = vpop.f32.mrf.mxu0  ;;  %v343_v6 = vpop.f32.mrf.mxu1 }
  0xef   :  { %v231_v7 = vadd.f32 %v230_v5, %v979_v3  ;;  %v344_v8 = vadd.f32 %v343_v6, %v982_v49 }
  0xf0   :  { %v232_v9 = vpop.f32.mrf.mxu0  ;;  %v345_v10 = vpop.f32.mrf.mxu1 }
  0xf1   :  { %497 = vst [vmem:[%s1173_s3 + $0x30] sm:$0xff] %v231_v7  ;;  %499 = vst [vmem:[%s1173_s3 + $0x40] sm:$0xff] %v344_v8  ;;  %v233_v11 = vadd.f32 %v232_v9, %v985_v50  ;;  %v346_v12 = vadd.f32 %v345_v10, %v988_v51 }
  0xf3   :  { %498 = vst [vmem:[%s1173_s3 + $0x38] sm:$0xff] %v233_v11  ;;  %521 = vst [vmem:[%s1174_s4 + $0x30] sm:$0xff] %v346_v12 }
  0xf4   :  { %v236_v13 = vpop.f32.mrf.mxu0  ;;  %v349_v14 = vpop.f32.mrf.mxu1 }
  0xf5   :  { %v237_v15 = vadd.f32 %v236_v13, %v979_v3  ;;  %v350_v16 = vadd.f32 %v349_v14, %v982_v49 }
  0xf6   :  { %v238_v17 = vpop.f32.mrf.mxu0  ;;  %v351_v18 = vpop.f32.mrf.mxu1 }
  0xf7   :  { %500 = vst [vmem:[%s1173_s3 + $0x48] sm:$0xff] %v237_v15  ;;  %502 = vst [vmem:[%s1173_s3 + $0x58] sm:$0xff] %v350_v16  ;;  %v239_v19 = vadd.f32 %v238_v17, %v985_v50  ;;  %v352_v20 = vadd.f32 %v351_v18, %v988_v51 }
  0xf9   :  { %501 = vst [vmem:[%s1173_s3 + $0x50] sm:$0xff] %v239_v19  ;;  %524 = vst [vmem:[%s1174_s4 + $0x48] sm:$0xff] %v352_v20 }
  0xfa   :  { %v242_v21 = vpop.f32.mrf.mxu0  ;;  %v355_v22 = vpop.f32.mrf.mxu1 }
  0xfb   :  { %v243_v23 = vadd.f32 %v242_v21, %v979_v3  ;;  %v356_v24 = vadd.f32 %v355_v22, %v982_v49 }
  0xfc   :  { %v244_v25 = vpop.f32.mrf.mxu0  ;;  %v357_v26 = vpop.f32.mrf.mxu1 }
  0xfd   :  { %503 = vst [vmem:[%s1173_s3 + $0x60] sm:$0xff] %v243_v23  ;;  %505 = vst [vmem:[%s1173_s3 + $0x70] sm:$0xff] %v356_v24  ;;  %v245_v27 = vadd.f32 %v244_v25, %v985_v50  ;;  %v358_v28 = vadd.f32 %v357_v26, %v988_v51 }
  0xff   :  { %504 = vst [vmem:[%s1173_s3 + $0x68] sm:$0xff] %v245_v27  ;;  %527 = vst [vmem:[%s1174_s4 + $0x60] sm:$0xff] %v358_v28 }
 0x100   :  { %v248_v29 = vpop.f32.mrf.mxu0  ;;  %v361_v30 = vpop.f32.mrf.mxu1 }
 0x101   :  { %v249_v31 = vadd.f32 %v248_v29, %v979_v3  ;;  %v362_v32 = vadd.f32 %v361_v30, %v982_v49 }
 0x102   :  { %v250_v33 = vpop.f32.mrf.mxu0  ;;  %v363_v34 = vpop.f32.mrf.mxu1 }
 0x103   :  { %506 = vst [vmem:[%s1173_s3 + $0x78] sm:$0xff] %v249_v31  ;;  %508 = vst [vmem:[%s1173_s3 + $0x88] sm:$0xff] %v362_v32  ;;  %v251_v35 = vadd.f32 %v250_v33, %v985_v50  ;;  %v364_v36 = vadd.f32 %v363_v34, %v988_v51 }
 0x105   :  { %507 = vst [vmem:[%s1173_s3 + $0x80] sm:$0xff] %v251_v35  ;;  %530 = vst [vmem:[%s1174_s4 + $0x78] sm:$0xff] %v364_v36 }
 0x106   :  { %v254_v37 = vpop.f32.mrf.mxu0  ;;  %v367_v38 = vpop.f32.mrf.mxu1 }
 0x107   :  { %v255_v39 = vadd.f32 %v254_v37, %v979_v3  ;;  %v368_v40 = vadd.f32 %v367_v38, %v982_v49 }
 0x108   :  { %v256_v41 = vpop.f32.mrf.mxu0  ;;  %v369_v42 = vpop.f32.mrf.mxu1 }
 0x109   :  { %509 = vst [vmem:[%s1173_s3 + $0x90] sm:$0xff] %v255_v39  ;;  %511 = vst [vmem:[%s1173_s3 + $0xa0] sm:$0xff] %v368_v40  ;;  %v257_v44 = vadd.f32 %v256_v41, %v985_v50  ;;  %v370_v45 = vadd.f32 %v369_v42, %v988_v51 }
 0x10b   :  { %510 = vst [vmem:[%s1173_s3 + $0x98] sm:$0xff] %v257_v44  ;;  %533 = vst [vmem:[%s1174_s4 + $0x90] sm:$0xff] %v370_v45 }
 0x10c   :  { %v260_v48 = vpop.f32.mrf.mxu0  ;;  %v373_v52 = vpop.f32.mrf.mxu1 }
 0x10d   :  { %v261_v53 = vadd.f32 %v260_v48, %v979_v3  ;;  %v374_v54 = vadd.f32 %v373_v52, %v982_v49  ;;  %v141_v3 = vrot.slane %v974_v46, %v140_v47 }
 0x10e   :  { %v262_v56 = vpop.f32.mrf.mxu0  ;;  %v375_v57 = vpop.f32.mrf.mxu1 }
 0x10f   :  { %512 = vst [vmem:[%s1173_s3 + $0xa8] sm:$0xff] %v261_v53  ;;  %514 = vst [vmem:[%s1173_s3 + $0xb8] sm:$0xff] %v374_v54  ;;  %v263_v58 = vadd.f32 %v262_v56, %v985_v50  ;;  %v376_v59 = vadd.f32 %v375_v57, %v988_v51 }
 0x111   :  { %513 = vst [vmem:[%s1173_s3 + $0xb0] sm:$0xff] %v263_v58  ;;  %536 = vst [vmem:[%s1174_s4 + $0xa8] sm:$0xff] %v376_v59 }
 0x112   :  { %v444_v49 = vpop.f32.mrf.mxu0  ;;  %v468_v60 = vpop.f32.mrf.mxu1 }
 0x113   :  { %v445_v61 = vadd.f32 %v444_v49, %v141_v3  ;;  %v469_v62 = vadd.f32 %v468_v60, %v141_v3 }
 0x114   :  { %v446_v63 = vpop.f32.mrf.mxu0  ;;  %v470_v50 = vpop.f32.mrf.mxu1 }
 0x115   :  { %516 = vst [vmem:[%s1174_s4 + $0x8] sm:$0xff] %v445_v61  ;;  %528 = vst [vmem:[%s1174_s4 + $0x68] sm:$0xff] %v469_v62  ;;  %v447_v51 = vadd.f32 %v446_v63, %v145_v43  ;;  %v471_v0 = vadd.f32 %v470_v50, %v145_v43 }
 0x116   :  { %v450_v1 = vpop.f32.mrf.mxu0  ;;  %v474_v2 = vpop.f32.mrf.mxu1 }
 0x117   :  { %517 = vst [vmem:[%s1174_s4 + $0x10] sm:$0xff] %v447_v51  ;;  %529 = vst [vmem:[%s1174_s4 + $0x70] sm:$0xff] %v471_v0  ;;  %v451_v46 = vadd.f32 %v450_v1, %v141_v3  ;;  %v475_v4 = vadd.f32 %v474_v2, %v141_v3 }
 0x118   :  { %v452_v5 = vpop.f32.mrf.mxu0  ;;  %v476_v6 = vpop.f32.mrf.mxu1 }
 0x119   :  { %519 = vst [vmem:[%s1174_s4 + $0x20] sm:$0xff] %v451_v46  ;;  %531 = vst [vmem:[%s1174_s4 + $0x80] sm:$0xff] %v475_v4  ;;  %v453_v7 = vadd.f32 %v452_v5, %v145_v43  ;;  %v477_v8 = vadd.f32 %v476_v6, %v145_v43 }
 0x11a   :  { %v456_v9 = vpop.f32.mrf.mxu0  ;;  %v480_v10 = vpop.f32.mrf.mxu1 }
 0x11b   :  { %520 = vst [vmem:[%s1174_s4 + $0x28] sm:$0xff] %v453_v7  ;;  %532 = vst [vmem:[%s1174_s4 + $0x88] sm:$0xff] %v477_v8  ;;  %v457_v11 = vadd.f32 %v456_v9, %v141_v3  ;;  %v481_v12 = vadd.f32 %v480_v10, %v141_v3 }
 0x11c   :  { %v458_v13 = vpop.f32.mrf.mxu0  ;;  %v482_v14 = vpop.f32.mrf.mxu1 }
 0x11d   :  { %522 = vst [vmem:[%s1174_s4 + $0x38] sm:$0xff] %v457_v11  ;;  %534 = vst [vmem:[%s1174_s4 + $0x98] sm:$0xff] %v481_v12  ;;  %v459_v15 = vadd.f32 %v458_v13, %v145_v43  ;;  %v483_v16 = vadd.f32 %v482_v14, %v145_v43 }
 0x11e   :  { %v462_v17 = vpop.f32.mrf.mxu0  ;;  %v486_v18 = vpop.f32.mrf.mxu1 }
 0x11f   :  { %523 = vst [vmem:[%s1174_s4 + $0x40] sm:$0xff] %v459_v15  ;;  %535 = vst [vmem:[%s1174_s4 + $0xa0] sm:$0xff] %v483_v16  ;;  %v463_v19 = vadd.f32 %v462_v17, %v141_v3  ;;  %v487_v20 = vadd.f32 %v486_v18, %v141_v3 }
 0x120   :  { %v464_v21 = vpop.f32.mrf.mxu0  ;;  %v488_v22 = vpop.f32.mrf.mxu1 }
 0x121   :  { %525 = vst [vmem:[%s1174_s4 + $0x50] sm:$0xff] %v463_v19  ;;  %537 = vst [vmem:[%s1174_s4 + $0xb0] sm:$0xff] %v487_v20  ;;  %v465_v23 = vadd.f32 %v464_v21, %v145_v43  ;;  %v489_v24 = vadd.f32 %v488_v22, %v145_v43 }
 0x123   :  { %526 = vst [vmem:[%s1174_s4 + $0x58] sm:$0xff] %v465_v23  ;;  %538 = vst [vmem:[%s1174_s4 + $0xb8] sm:$0xff] %v489_v24 }

// kernel: bidirectional_gru.3
= control target key start
LH: loop header
LB: loop body
LE: loop exit
PB: predicated region body
PF: predicated region fallthrough
CT: control target
= control target key end

     0   :  { %v8122_v3 = vmov 0.0   ;;  %vm4789_vm0 = vmmov 0   ;;  %s8110_s2 = inlined_call_operand.vmem [shape: f32[128,384], index: 2, kind: input, shape index: {}]   ;;  %s8111_s3 = inlined_call_operand.vmem [shape: f32[128,384], index: 3, kind: input, shape index: {}]   ;;  %s8112_s0 = inlined_call_operand.vmem [shape: f32[8,8,384], index: 0, kind: input, shape index: {}]   ;;  %s8113_s4 = inlined_call_operand.vmem [shape: f32[1,128], index: 4, kind: input, shape index: {}]   ;;  %s8114_s1 = inlined_call_operand.vmem [shape: f32[8,8,384], index: 1, kind: input, shape index: {}]   ;;  %s8115_s6 = inlined_call_operand.vmem [shape: f32[8,8,128], index: 6, kind: output, shape index: {0}]   ;;  %s8116_s5 = inlined_call_operand.vmem [shape: f32[1,128], index: 5, kind: input, shape index: {}]   ;;  %s8117_s7 = inlined_call_operand.vmem [shape: f32[8,8,128], index: 7, kind: output, shape index: {1}]  }
   0x1   :  { %v4833_v0 = vld [vmem:[%s8110_s2 + $0x170] sm:$0xff]  ;;  %v4838_v1 = vld [vmem:[%s8110_s2 + $0x168] sm:$0xff]  ;;  %v4843_v2 = vld [vmem:[%s8110_s2 + $0x158] sm:$0xff]  ;;  %4066 = vmatprep.subr.mxu1 %v8122_v3  ;;  %187 = vmatprep.mubr.f32.mxu0 %v8122_v3 }
   0x2   :  { %123 = vmatprep.subr.mxu0 %v4833_v0  ;;  %v4851_v4 = vld [vmem:[%s8110_s2 + $0x150] sm:$0xff]  ;;  %4098 = vmatprep.mubr.msk.f32.mxu1 %vm4789_vm0, %v8122_v3  ;;  %v4859_v5 = vld [vmem:[%s8110_s2 + $0x140] sm:$0xff]  ;;  %v4865_v6 = vld [vmem:[%s8110_s2 + $0x138] sm:$0xff] }
   0x3   :  { %124 = vmatpush1.msra.mxu0 %v4838_v1  ;;  %v4871_v7 = vld [vmem:[%s8110_s2 + $0x128] sm:$0xff]  ;;  %v4877_v8 = vld [vmem:[%s8110_s2 + $0x120] sm:$0xff]  ;;  %v4883_v9 = vld [vmem:[%s8110_s2 + $0x110] sm:$0xff] }
   0x4   :  { %125 = vmatprep.subr.mxu0 %v4843_v2  ;;  %v4889_v10 = vld [vmem:[%s8110_s2 + $0x108] sm:$0xff]  ;;  %v4895_v11 = vld [vmem:[%s8110_s2 + $0xf8] sm:$0xff]  ;;  %v4901_v12 = vld [vmem:[%s8110_s2 + $0xf0] sm:$0xff] }
   0x5   :  { %126 = vmatpush1.msra.mxu0 %v4851_v4  ;;  %v4907_v13 = vld [vmem:[%s8110_s2 + $0xe0] sm:$0xff]  ;;  %v4912_v14 = vld [vmem:[%s8110_s2 + $0x178] sm:$0xff]  ;;  %v4930_v17 = vld [vmem:[%s8110_s2 + $0xc8] sm:$0xff] }
   0x6   :  { %127 = vmatprep.subr.mxu0 %v4859_v5  ;;  %v4918_v15 = vld [vmem:[%s8110_s2 + $0xd8] sm:$0xff]  ;;  %4067 = vmatpush3.msra.mxu1 %v4912_v14  ;;  %v4924_v16 = vld [vmem:[%s8110_s2 + $0x160] sm:$0xff]  ;;  %v4936_v18 = vld [vmem:[%s8110_s2 + $0x148] sm:$0xff] }
   0x7   :  { %128 = vmatpush1.msra.mxu0 %v4865_v6  ;;  %4068 = vmatprep.subr.mxu1 %v8122_v3  ;;  %v4942_v19 = vld [vmem:[%s8110_s2 + $0xc0] sm:$0xff]  ;;  %v4949_v20 = vld [vmem:[%s8110_s2 + $0xb0] sm:$0xff]  ;;  %v4961_v22 = vld [vmem:[%s8110_s2 + $0xa8] sm:$0xff] }
   0x8   :  { %129 = vmatprep.subr.mxu0 %v4871_v7  ;;  %4069 = vmatpush3.msra.mxu1 %v4924_v16  ;;  %v4955_v21 = vld [vmem:[%s8110_s2 + $0x130] sm:$0xff]  ;;  %v4968_v23 = vld [vmem:[%s8110_s2 + $0x98] sm:$0xff]  ;;  %v4987_v26 = vld [vmem:[%s8110_s2 + $0x80] sm:$0xff] }
   0x9   :  { %130 = vmatpush1.msra.mxu0 %v4877_v8  ;;  %4070 = vmatprep.subr.mxu1 %v8122_v3  ;;  %v4974_v24 = vld [vmem:[%s8110_s2 + $0x118] sm:$0xff]  ;;  %v4980_v25 = vld [vmem:[%s8110_s2 + $0x90] sm:$0xff]  ;;  %v4993_v27 = vld [vmem:[%s8110_s2 + $0x100] sm:$0xff] }
   0xa   :  { %131 = vmatprep.subr.mxu0 %v4883_v9  ;;  %4071 = vmatpush3.msra.mxu1 %v4936_v18  ;;  %v4999_v28 = vld [vmem:[%s8110_s2 + $0x78] sm:$0xff]  ;;  %v5006_v29 = vld [vmem:[%s8110_s2 + $0x68] sm:$0xff]  ;;  %v5018_v31 = vld [vmem:[%s8110_s2 + $0x60] sm:$0xff] }
   0xb   :  { %132 = vmatpush1.msra.mxu0 %v4889_v10  ;;  %4072 = vmatprep.subr.mxu1 %v8122_v3  ;;  %v5012_v30 = vld [vmem:[%s8110_s2 + $0xe8] sm:$0xff]  ;;  %v5025_v32 = vld [vmem:[%s8110_s2 + $0x50] sm:$0xff]  ;;  %v5044_v35 = vld [vmem:[%s8110_s2 + $0x38] sm:$0xff] }
   0xc   :  { %133 = vmatprep.subr.mxu0 %v4895_v11  ;;  %4073 = vmatpush3.msra.mxu1 %v4955_v21  ;;  %v5031_v33 = vld [vmem:[%s8110_s2 + $0xd0] sm:$0xff]  ;;  %v5037_v34 = vld [vmem:[%s8110_s2 + $0x48] sm:$0xff]  ;;  %v5050_v36 = vld [vmem:[%s8110_s2 + $0xb8] sm:$0xff] }
   0xd   :  { %134 = vmatpush1.msra.mxu0 %v4901_v12  ;;  %4074 = vmatprep.subr.mxu1 %v8122_v3  ;;  %v5056_v37 = vld [vmem:[%s8110_s2 + $0x30] sm:$0xff]  ;;  %v5063_v38 = vld [vmem:[%s8110_s2 + $0x20] sm:$0xff]  ;;  %v5075_v40 = vld [vmem:[%s8110_s2 + $0x18] sm:$0xff] }
   0xe   :  { %135 = vmatprep.subr.mxu0 %v4907_v13  ;;  %4075 = vmatpush3.msra.mxu1 %v4974_v24  ;;  %v5069_v39 = vld [vmem:[%s8110_s2 + $0xa0] sm:$0xff]  ;;  %v5082_v41 = vld [vmem:[%s8110_s2 + $0x8] sm:$0xff]  ;;  %v5101_v44 = vld [vmem:[%s8111_s3 + $0x170] sm:$0xff] }
   0xf   :  { %136 = vmatpush1.msra.mxu0 %v4918_v15  ;;  %4076 = vmatprep.subr.mxu1 %v8122_v3  ;;  %v5088_v42 = vld [vmem:[%s8110_s2 + $0x88] sm:$0xff]  ;;  %v5094_v43 = vld [vmem:[%s8110_s2] sm:$0xff]  ;;  %v5114_v46 = vld [vmem:[%s8110_s2 + $0x70] sm:$0xff] }
  0x10   :  { %137 = vmatprep.subr.mxu0 %v4930_v17  ;;  %4077 = vmatpush3.msra.mxu1 %v4993_v27  ;;  %v5108_v45 = vld [vmem:[%s8111_s3 + $0x168] sm:$0xff]  ;;  %v5120_v47 = vld [vmem:[%s8111_s3 + $0x158] sm:$0xff]  ;;  %v5128_v48 = vld [vmem:[%s8111_s3 + $0x150] sm:$0xff] }
  0x11   :  { %138 = vmatpush1.msra.mxu0 %v4942_v19  ;;  %4078 = vmatprep.subr.mxu1 %v8122_v3  ;;  %v5133_v49 = vld [vmem:[%s8110_s2 + $0x58] sm:$0xff]  ;;  %v5139_v50 = vld [vmem:[%s8111_s3 + $0x140] sm:$0xff]  ;;  %v5158_v53 = vld [vmem:[%s8111_s3 + $0x128] sm:$0xff] }
  0x12   :  { %139 = vmatprep.subr.mxu0 %v4949_v20  ;;  %4079 = vmatpush3.msra.mxu1 %v5012_v30  ;;  %v5146_v51 = vld [vmem:[%s8111_s3 + $0x138] sm:$0xff]  ;;  %v5152_v52 = vld [vmem:[%s8110_s2 + $0x40] sm:$0xff]  ;;  %8226 = vst [vmem:[#allocation4_spill] sm:$0xff] %v5158_v53  ;;  %v5171_v55 = vld [vmem:[%s8110_s2 + $0x28] sm:$0xff] }
  0x13   :  { %140 = vmatpush1.msra.mxu0 %v4961_v22  ;;  %4080 = vmatprep.subr.mxu1 %v8122_v3  ;;  %v5165_v54 = vld [vmem:[%s8111_s3 + $0x120] sm:$0xff]  ;;  %v5177_v56 = vld [vmem:[%s8111_s3 + $0x110] sm:$0xff]  ;;  %v5184_v57 = vld [vmem:[%s8111_s3 + $0x108] sm:$0xff] }
  0x14   :  { %141 = vmatprep.subr.mxu0 %v4968_v23  ;;  %4081 = vmatpush3.msra.mxu1 %v5031_v33  ;;  %8227 = vst [vmem:[#allocation5_spill] sm:$0xff] %v5165_v54  ;;  %8228 = vst [vmem:[#allocation6_spill] sm:$0xff] %v5177_v56  ;;  %v5190_v58 = vld [vmem:[%s8110_s2 + $0x10] sm:$0xff]  ;;  %v5196_v59 = vld [vmem:[%s8111_s3 + $0xf8] sm:$0xff] }
  0x15   :  { %142 = vmatpush1.msra.mxu0 %v4980_v25  ;;  %4082 = vmatprep.subr.mxu1 %v8122_v3  ;;  %8229 = vst [vmem:[#allocation7_spill] sm:$0xff] %v5184_v57  ;;  %8230 = vst [vmem:[#allocation8_spill] sm:$0xff] %v5196_v59  ;;  %v5203_v60 = vld [vmem:[%s8111_s3 + $0xf0] sm:$0xff]  ;;  %v5210_v61 = vld [vmem:[%s8111_s3 + $0xe0] sm:$0xff] }
  0x16   :  { %143 = vmatprep.subr.mxu0 %v4987_v26  ;;  %4083 = vmatpush3.msra.mxu1 %v5050_v36  ;;  %8231 = vst [vmem:[#allocation9_spill] sm:$0xff] %v5203_v60  ;;  %8232 = vst [vmem:[#allocation10_spill] sm:$0xff] %v5210_v61  ;;  %v5217_v62 = vld [vmem:[%s8111_s3 + $0xd8] sm:$0xff] }
  0x17   :  { %144 = vmatpush1.msra.mxu0 %v4999_v28  ;;  %4084 = vmatprep.subr.mxu1 %v8122_v3  ;;  %8233 = vst [vmem:[#allocation11_spill] sm:$0xff] %v5217_v62  ;;  %v5223_v63 = vld [vmem:[%s8111_s3 + $0x178] sm:$0xff] }
  0x18   :  { %145 = vmatprep.subr.mxu0 %v5006_v29  ;;  %4085 = vmatpush3.msra.mxu1 %v5069_v39 }
  0x19   :  { %146 = vmatpush1.msra.mxu0 %v5018_v31  ;;  %4086 = vmatprep.subr.mxu1 %v8122_v3 }
  0x1a   :  { %147 = vmatprep.subr.mxu0 %v5025_v32  ;;  %4087 = vmatpush3.msra.mxu1 %v5088_v42 }
  0x1b   :  { %148 = vmatpush1.msra.mxu0 %v5037_v34  ;;  %4088 = vmatprep.subr.mxu1 %v8122_v3 }
  0x1c   :  { %149 = vmatprep.subr.mxu0 %v5044_v35  ;;  %4089 = vmatpush3.msra.mxu1 %v5114_v46 }
  0x1d   :  { %150 = vmatpush1.msra.mxu0 %v5056_v37  ;;  %4090 = vmatprep.subr.mxu1 %v8122_v3 }
  0x1e   :  { %151 = vmatprep.subr.mxu0 %v5063_v38  ;;  %4091 = vmatpush3.msra.mxu1 %v5133_v49 }
  0x1f   :  { %152 = vmatpush1.msra.mxu0 %v5075_v40  ;;  %4092 = vmatprep.subr.mxu1 %v8122_v3 }
  0x20   :  { %153 = vmatprep.subr.mxu0 %v5082_v41  ;;  %4093 = vmatpush3.msra.mxu1 %v5152_v52 }
  0x21   :  { %154 = vmatpush1.msra.mxu0 %v5094_v43  ;;  %4094 = vmatprep.subr.mxu1 %v8122_v3 }
  0x22   :  { %188 = vmatmul.mubr.f32.vlgmr.msra.gmra.mxu0 %v8122_v3  ;;  %345 = vmatprep.subr.mxu0 %v5101_v44 }
  0x23   :  { %346 = vmatpush1.msra.mxu0 %v5108_v45  ;;  %4095 = vmatpush3.msra.mxu1 %v5171_v55 }
  0x24   :  { %347 = vmatprep.subr.mxu0 %v5120_v47  ;;  %4096 = vmatprep.subr.mxu1 %v8122_v3 }
  0x25   :  { %348 = vmatpush1.msra.mxu0 %v5128_v48  ;;  %4097 = vmatpush3.msra.mxu1 %v5190_v58 }
  0x26   :  { %349 = vmatprep.subr.mxu0 %v5139_v50  ;;  %4101 = vmatprep.subr.mxu1 %v8122_v3 }
  0x27   :  { %350 = vmatpush1.msra.mxu0 %v5146_v51  ;;  %4099 = vmatmul.mubr.f32.vlgmr.msra.gmra.mxu1 %v8122_v3 }
  0x28   :  { %351 = vmatprep.subr.mxu0 %v5158_v53  ;;  %409 = vmatprep.mubr.f32.mxu0 %v8122_v3  ;;  %v5255_v3 = vld [vmem:[%s8111_s3 + $0xa8] sm:$0xff]  ;;  %v5286_v53 = vld [vmem:[%s8111_s3 + $0x80] sm:$0xff] }
  0x29   :  { %352 = vmatpush1.msra.mxu0 %v5165_v54  ;;  %4102 = vmatpush3.msra.mxu1 %v5223_v63  ;;  %8237 = vst [vmem:[#allocation15_spill] sm:$0xff] %v5255_v3  ;;  %v5267_v54 = vld [vmem:[%s8111_s3 + $0x98] sm:$0xff]  ;;  %8243 = vst [vmem:[#allocation20_spill] sm:$0xff] %v5286_v53 }
  0x2a   :  { %353 = vmatprep.subr.mxu0 %v5177_v56  ;;  %v5248_v56 = vld [vmem:[%s8111_s3 + $0xb0] sm:$0xff]  ;;  %8240 = vst [vmem:[#allocation17_spill] sm:$0xff] %v5267_v54 }
  0x2b   :  { %354 = vmatpush1.msra.mxu0 %v5184_v57  ;;  %v5229_v57 = vld [vmem:[%s8111_s3 + $0xc8] sm:$0xff]  ;;  %8236 = vst [vmem:[#allocation14_spill] sm:$0xff] %v5248_v56 }
  0x2c   :  { %355 = vmatprep.subr.mxu0 %v5196_v59  ;;  %8234 = vst [vmem:[#allocation12_spill] sm:$0xff] %v5229_v57  ;;  %v5236_v59 = vld [vmem:[%s8111_s3 + $0xc0] sm:$0xff] }
  0x2d   :  { %356 = vmatpush1.msra.mxu0 %v5203_v60  ;;  %8235 = vst [vmem:[#allocation13_spill] sm:$0xff] %v5236_v59  ;;  %v5242_v60 = vld [vmem:[%s8111_s3 + $0x160] sm:$0xff] }
  0x2e   :  { %357 = vmatprep.subr.mxu0 %v5210_v61  ;;  %v8238_v61 = vmov 0.0  }
  0x2f   :  { %358 = vmatpush1.msra.mxu0 %v5217_v62  ;;  %4103 = vmatprep.subr.mxu1 %v8238_v61  ;;  %v5261_v62 = vld [vmem:[%s8111_s3 + $0x148] sm:$0xff] }
  0x30   :  { %359 = vmatprep.subr.mxu0 %v5229_v57  ;;  %8239 = vst [vmem:[#allocation16_spill] sm:$0xff] %v5261_v62  ;;  %4104 = vmatpush3.msra.mxu1 %v5242_v60  ;;  %v5274_v57 = vld [vmem:[%s8111_s3 + $0x90] sm:$0xff] }
  0x31   :  { %360 = vmatpush1.msra.mxu0 %v5236_v59  ;;  %8241 = vst [vmem:[#allocation18_spill] sm:$0xff] %v5274_v57  ;;  %4105 = vmatprep.subr.mxu1 %v8238_v61  ;;  %v5280_v59 = vld [vmem:[%s8111_s3 + $0x130] sm:$0xff] }
  0x32   :  { %361 = vmatprep.subr.mxu0 %v5248_v56  ;;  %8242 = vst [vmem:[#allocation19_spill] sm:$0xff] %v5280_v59  ;;  %4106 = vmatpush3.msra.mxu1 %v5261_v62  ;;  %v5293_v56 = vld [vmem:[%s8111_s3 + $0x78] sm:$0xff]  ;;  %v5305_v62 = vld [vmem:[%s8111_s3 + $0x68] sm:$0xff] }
  0x33   :  { %362 = vmatpush1.msra.mxu0 %v5255_v3  ;;  %8244 = vst [vmem:[#allocation21_spill] sm:$0xff] %v5293_v56  ;;  %4107 = vmatprep.subr.mxu1 %v8238_v61  ;;  %v5299_v3 = vld [vmem:[%s8111_s3 + $0x118] sm:$0xff]  ;;  %8246 = vst [vmem:[#allocation23_spill] sm:$0xff] %v5305_v62 }
  0x34   :  { %363 = vmatprep.subr.mxu0 %v5267_v54  ;;  %8245 = vst [vmem:[#allocation22_spill] sm:$0xff] %v5299_v3  ;;  %4108 = vmatpush3.msra.mxu1 %v5280_v59  ;;  %v5312_v54 = vld [vmem:[%s8111_s3 + $0x60] sm:$0xff]  ;;  %v5324_v59 = vld [vmem:[%s8111_s3 + $0x50] sm:$0xff] }
  0x35   :  { %364 = vmatpush1.msra.mxu0 %v5274_v57  ;;  %8247 = vst [vmem:[#allocation24_spill] sm:$0xff] %v5312_v54  ;;  %4109 = vmatprep.subr.mxu1 %v8238_v61  ;;  %v5318_v57 = vld [vmem:[%s8111_s3 + $0x100] sm:$0xff]  ;;  %8249 = vst [vmem:[#allocation26_spill] sm:$0xff] %v5324_v59 }
  0x36   :  { %365 = vmatprep.subr.mxu0 %v5286_v53  ;;  %8248 = vst [vmem:[#allocation25_spill] sm:$0xff] %v5318_v57  ;;  %4110 = vmatpush3.msra.mxu1 %v5299_v3  ;;  %v5331_v53 = vld [vmem:[%s8111_s3 + $0x48] sm:$0xff]  ;;  %v5343_v3 = vld [vmem:[%s8111_s3 + $0x38] sm:$0xff] }
  0x37   :  { %366 = vmatpush1.msra.mxu0 %v5293_v56  ;;  %8250 = vst [vmem:[#allocation27_spill] sm:$0xff] %v5331_v53  ;;  %4111 = vmatprep.subr.mxu1 %v8238_v61  ;;  %v5337_v56 = vld [vmem:[%s8111_s3 + $0xe8] sm:$0xff]  ;;  %8252 = vst [vmem:[#allocation29_spill] sm:$0xff] %v5343_v3 }
  0x38   :  { %367 = vmatprep.subr.mxu0 %v5305_v62  ;;  %8251 = vst [vmem:[#allocation28_spill] sm:$0xff] %v5337_v56  ;;  %4112 = vmatpush3.msra.mxu1 %v5318_v57  ;;  %v5350_v62 = vld [vmem:[%s8111_s3 + $0x30] sm:$0xff]  ;;  %v5362_v57 = vld [vmem:[%s8111_s3 + $0x20] sm:$0xff] }
  0x39   :  { %368 = vmatpush1.msra.mxu0 %v5312_v54  ;;  %8253 = vst [vmem:[#allocation30_spill] sm:$0xff] %v5350_v62  ;;  %4113 = vmatprep.subr.mxu1 %v8238_v61  ;;  %v5356_v54 = vld [vmem:[%s8111_s3 + $0xd0] sm:$0xff]  ;;  %8254 = vst [vmem:[#allocation31_spill] sm:$0xff] %v5362_v57 }
  0x3a   :  { %369 = vmatprep.subr.mxu0 %v5324_v59  ;;  %4114 = vmatpush3.msra.mxu1 %v5337_v56  ;;  %v5369_v59 = vld [vmem:[%s8111_s3 + $0x18] sm:$0xff]  ;;  %v5381_v56 = vld [vmem:[%s8111_s3 + $0x8] sm:$0xff] }
  0x3b   :  { %370 = vmatpush1.msra.mxu0 %v5331_v53  ;;  %8255 = vst [vmem:[#allocation32_spill] sm:$0xff] %v5369_v59  ;;  %4115 = vmatprep.subr.mxu1 %v8238_v61  ;;  %v5375_v53 = vld [vmem:[%s8111_s3 + $0xb8] sm:$0xff]  ;;  %8256 = vst [vmem:[#allocation33_spill] sm:$0xff] %v5381_v56 }
  0x3c   :  { %371 = vmatprep.subr.mxu0 %v5343_v3  ;;  %4116 = vmatpush3.msra.mxu1 %v5356_v54  ;;  %v5388_v3 = vld [vmem:[%s8111_s3] sm:$0xff] }
  0x3d   :  { %372 = vmatpush1.msra.mxu0 %v5350_v62  ;;  %8257 = vst [vmem:[#allocation34_spill] sm:$0xff] %v5388_v3  ;;  %4117 = vmatprep.subr.mxu1 %v8238_v61  ;;  %v5394_v62 = vld [vmem:[%s8111_s3 + $0xa0] sm:$0xff] }
  0x3e   :  { %373 = vmatprep.subr.mxu0 %v5362_v57  ;;  %4118 = vmatpush3.msra.mxu1 %v5375_v53  ;;  %v5403_v57 = vld [vmem:[%s8111_s3 + $0x88] sm:$0xff] }
  0x3f   :  { %374 = vmatpush1.msra.mxu0 %v5369_v59  ;;  %4119 = vmatprep.subr.mxu1 %v8238_v61  ;;  %v5412_v59 = vld [vmem:[%s8111_s3 + $0x70] sm:$0xff] }
  0x40   :  { %375 = vmatprep.subr.mxu0 %v5381_v56  ;;  %4120 = vmatpush3.msra.mxu1 %v5394_v62  ;;  %v5430_v56 = vld [vmem:[%s8111_s3 + $0x40] sm:$0xff] }
  0x41   :  { %376 = vmatpush1.msra.mxu0 %v5388_v3  ;;  %4121 = vmatprep.subr.mxu1 %v8238_v61  ;;  %v5421_v3 = vld [vmem:[%s8111_s3 + $0x58] sm:$0xff] }
  0x42   :  { %410 = vmatmul.mubr.f32.vlgmr.msra.gmra.mxu0 %v8238_v61  ;;  %4122 = vmatpush3.msra.mxu1 %v5403_v57 }
  0x43   :  { %4133 = vmatprep.mubr.msk.f32.mxu1 %vm4789_vm0, %v8238_v61  ;;  %4123 = vmatprep.subr.mxu1 %v8238_v61 }
  0x44   :  { %570 = vmatprep.subr.mxu0 %v4833_v0  ;;  %4124 = vmatpush3.msra.mxu1 %v5412_v59  ;;  %v5439_v0 = vld [vmem:[%s8111_s3 + $0x28] sm:$0xff] }
  0x45   :  { %571 = vmatpush1.msra.mxu0 %v4838_v1  ;;  %4125 = vmatprep.subr.mxu1 %v8238_v61  ;;  %v5448_v1 = vld [vmem:[%s8111_s3 + $0x10] sm:$0xff] }
  0x46   :  { %572 = vmatprep.subr.mxu0 %v4843_v2  ;;  %4126 = vmatpush3.msra.mxu1 %v5421_v3  ;;  %v72_v2 = vld [vmem:[%s8112_s0] sm:$0xff] }
  0x47   :  { %573 = vmatpush1.msra.mxu0 %v4851_v4  ;;  %4127 = vmatprep.subr.mxu1 %v8238_v61 }
  0x48   :  { %574 = vmatprep.subr.mxu0 %v4859_v5  ;;  %4128 = vmatpush3.msra.mxu1 %v5430_v56 }
  0x49   :  { %575 = vmatpush1.msra.mxu0 %v4865_v6  ;;  %4129 = vmatprep.subr.mxu1 %v8238_v61 }
  0x4a   :  { %576 = vmatprep.subr.mxu0 %v4871_v7  ;;  %4130 = vmatpush3.msra.mxu1 %v5439_v0  ;;  %v73_v7 = vld [vmem:[%s8112_s0 + $0x8] sm:$0xff] }
  0x4b   :  { %577 = vmatpush1.msra.mxu0 %v4877_v8  ;;  %4131 = vmatprep.subr.mxu1 %v8238_v61 }
  0x4c   :  { %578 = vmatprep.subr.mxu0 %v4883_v9  ;;  %4132 = vmatpush3.msra.mxu1 %v5448_v1 }
  0x4d   :  { %579 = vmatpush1.msra.mxu0 %v4889_v10  ;;  %4134 = vmatmul.mubr.f32.vlgmr.msra.gmra.mxu1 %v8238_v61 }
  0x4e   :  { %4136 = vmatprep.subr.mxu1 %v8238_v61  ;;  %580 = vmatprep.subr.mxu0 %v4895_v11 }
  0x4f   :  { %4137 = vmatpush3.msra.mxu1 %v4912_v14  ;;  %581 = vmatpush1.msra.mxu0 %v4901_v12 }
  0x50   :  { %4138 = vmatprep.subr.mxu1 %v8238_v61  ;;  %582 = vmatprep.subr.mxu0 %v4907_v13 }
  0x51   :  { %4139 = vmatpush3.msra.mxu1 %v4924_v16  ;;  %583 = vmatpush1.msra.mxu0 %v4918_v15 }
  0x52   :  { %4140 = vmatprep.subr.mxu1 %v8238_v61  ;;  %584 = vmatprep.subr.mxu0 %v4930_v17 }
  0x53   :  { %4141 = vmatpush3.msra.mxu1 %v4936_v18  ;;  %585 = vmatpush1.msra.mxu0 %v4942_v19  ;;  %v5526_v19 = vld [vmem:[%s8113_s4] ss:$0 sm:$0xff] }
  0x54   :  { %4142 = vmatprep.subr.mxu1 %v8238_v61  ;;  %586 = vmatprep.subr.mxu0 %v4949_v20  ;;  %v3693_v20 = vld [vmem:[%s8114_s1 + $0xa8] sm:$0xff] }
  0x55   :  { %4143 = vmatpush3.msra.mxu1 %v4955_v21  ;;  %587 = vmatpush1.msra.mxu0 %v4961_v22 }
  0x56   :  { %4144 = vmatprep.subr.mxu1 %v8238_v61  ;;  %588 = vmatprep.subr.mxu0 %v4968_v23 }
  0x57   :  { %4145 = vmatpush3.msra.mxu1 %v4974_v24  ;;  %589 = vmatpush1.msra.mxu0 %v4980_v25 }
  0x58   :  { %4146 = vmatprep.subr.mxu1 %v8238_v61  ;;  %590 = vmatprep.subr.mxu0 %v4987_v26 }
  0x59   :  { %4147 = vmatpush3.msra.mxu1 %v4993_v27  ;;  %591 = vmatpush1.msra.mxu0 %v4999_v28 }
  0x5a   :  { %4148 = vmatprep.subr.mxu1 %v8238_v61  ;;  %592 = vmatprep.subr.mxu0 %v5006_v29  ;;  %v74_v29 = vld [vmem:[%s8112_s0 + $0x10] sm:$0xff] }
  0x5b   :  { %4149 = vmatpush3.msra.mxu1 %v5012_v30  ;;  %593 = vmatpush1.msra.mxu0 %v5018_v31 }
  0x5c   :  { %4150 = vmatprep.subr.mxu1 %v8238_v61  ;;  %594 = vmatprep.subr.mxu0 %v5025_v32 }
  0x5d   :  { %4151 = vmatpush3.msra.mxu1 %v5031_v33  ;;  %595 = vmatpush1.msra.mxu0 %v5037_v34  ;;  %v3694_v34 = vld [vmem:[%s8114_s1 + $0xb0] sm:$0xff] }
  0x5e   :  { %4152 = vmatprep.subr.mxu1 %v8238_v61  ;;  %596 = vmatprep.subr.mxu0 %v5044_v35 }
  0x5f   :  { %4153 = vmatpush3.msra.mxu1 %v5050_v36  ;;  %597 = vmatpush1.msra.mxu0 %v5056_v37 }
  0x60   :  { %4154 = vmatprep.subr.mxu1 %v8238_v61  ;;  %598 = vmatprep.subr.mxu0 %v5063_v38 }
  0x61   :  { %4155 = vmatpush3.msra.mxu1 %v5069_v39  ;;  %599 = vmatpush1.msra.mxu0 %v5075_v40 }
  0x62   :  { %4156 = vmatprep.subr.mxu1 %v8238_v61  ;;  %600 = vmatprep.subr.mxu0 %v5082_v41 }
  0x63   :  { %4157 = vmatpush3.msra.mxu1 %v5088_v42  ;;  %601 = vmatpush1.msra.mxu0 %v5094_v43 }
  0x64   :  { %4158 = vmatprep.subr.mxu1 %v8238_v61  ;;  %634 = vmatprep.mubr.f32.mxu0 %v8238_v61 }
  0x65   :  { %4159 = vmatpush3.msra.mxu1 %v5114_v46  ;;  %4168 = vmatprep.mubr.msk.f32.mxu1 %vm4789_vm0, %v8238_v61 }
  0x66   :  { %4160 = vmatprep.subr.mxu1 %v8238_v61  ;;  %792 = vmatprep.subr.mxu0 %v5101_v44 }
  0x67   :  { %4161 = vmatpush3.msra.mxu1 %v5133_v49 }
  0x68   :  { %4162 = vmatprep.subr.mxu1 %v8238_v61 }
  0x69   :  { %4163 = vmatpush3.msra.mxu1 %v5152_v52 }
  0x6a   :  { %4164 = vmatprep.subr.mxu1 %v8238_v61 }
  0x6b   :  { %4165 = vmatpush3.msra.mxu1 %v5171_v55 }
  0x6c   :  { %4166 = vmatprep.subr.mxu1 %v8238_v61 }
  0x6d   :  { %4167 = vmatpush3.msra.mxu1 %v5190_v58 }
  0x6e   :  { %4171 = vmatprep.subr.mxu1 %v8238_v61 }
  0xe2   :  { %v189_v4 = vpop.f32.mrf.mxu0 }
  0xe3   :  { %v264_v5 = vadd.f32 %v189_v4, %v72_v2 }
  0xe4   :  { %v191_v8 = vpop.f32.mrf.mxu0 }
  0xe5   :  { %v3690_v6 = vmul.f32 -1.442695, %v264_v5  ;;  %v271_v9 = vadd.f32 %v191_v8, %v73_v7 }
  0xe7   :  { %4628 = vpow2.f32 %v3690_v6  ;;  %v3691_v10 = vmul.f32 -1.442695, %v271_v9  ;;  %v260_v11 = vpop.f32.mrf.mxu1 }
  0xe8   :  { %v285_v23 = vadd.f32 %v5526_v19, %v260_v11  ;;  %v5555_v11 = vld [vmem:[%s8116_s5] ss:$0 sm:$0xff] }
  0xe9   :  { %v4100_v12 = vpop.f32.mrf.mxu1  ;;  %4630 = vpow2.f32 %v3691_v10 }
  0xf4   :  { %v4629_v13 = vpop.eup %4628 }
  0xf5   :  { %v268_v15 = vadd.f32 1.0, %v4629_v13  ;;  %v8259_v13 = vld [vmem:[#allocation4_spill] sm:$0xff] }
  0xf6   :  { %v4631_v17 = vpop.eup %4630 }
  0xf7   :  { %4632 = vrcp.f32 %v268_v15  ;;  %v275_v22 = vadd.f32 1.0, %v4631_v17  ;;  %v8262_v15 = vld [vmem:[#allocation6_spill] sm:$0xff]  ;;  %v8263_v17 = vld [vmem:[#allocation7_spill] sm:$0xff] }
  0xf9   :  { %4634 = vrcp.f32 %v275_v22 }
 0x102   :  { %v411_v25 = vpop.f32.mrf.mxu0 }
 0x103   :  { %v486_v26 = vadd.f32 %v3693_v20, %v411_v25  ;;  %v8264_v20 = vld [vmem:[#allocation22_spill] sm:$0xff]  ;;  %v8266_v25 = vld [vmem:[#allocation9_spill] sm:$0xff] }
 0x104   :  { %v4633_v28 = vpop.eup %4632  ;;  %v413_v35 = vpop.f32.mrf.mxu0 }
 0x105   :  { %v286_v31 = vmul.f32 %v4633_v28, %v285_v23  ;;  %v3696_v32 = vmul.f32 -1.442695, %v486_v26  ;;  %v493_v38 = vadd.f32 %v3694_v34, %v413_v35  ;;  %v8265_v23 = vld [vmem:[#allocation8_spill] sm:$0xff]  ;;  %v8267_v26 = vld [vmem:[#allocation25_spill] sm:$0xff] }
 0x106   :  { %v4635_v44 = vpop.eup %4634  ;;  %v8271_v34 = vld [vmem:[#allocation12_spill] sm:$0xff]  ;;  %v8272_v35 = vld [vmem:[#allocation13_spill] sm:$0xff] }
 0x107   :  { %v287_v37 = vadd.f32 %v286_v31, %v74_v29  ;;  %4636 = vpow2.f32 %v3696_v32  ;;  %v3697_v40 = vmul.f32 -1.442695, %v493_v38  ;;  %v289_v5 = vsub.f32 1.0, %v4635_v44  ;;  %v8268_v29 = vld [vmem:[#allocation10_spill] sm:$0xff]  ;;  %v8269_v31 = vld [vmem:[#allocation11_spill] sm:$0xff]  ;;  %v8270_v32 = vld [vmem:[#allocation28_spill] sm:$0xff] }
 0x108   :  { %v291_v8 = vmul.f32 0.0, %v4635_v44  ;;  %v8274_v38 = vld [vmem:[#allocation15_spill] sm:$0xff] }
 0x109   :  { %4638 = vtanh.f32 %v287_v37  ;;  %v8273_v37 = vld [vmem:[#allocation14_spill] sm:$0xff]  ;;  %v8279_v44 = vld [vmem:[#allocation23_spill] sm:$0xff] }
 0x10a   :  { %4640 = vpow2.f32 %v3697_v40  ;;  %v8275_v40 = vld [vmem:[#allocation17_spill] sm:$0xff] }
 0x10d   :  { %v482_v41 = vpop.f32.mrf.mxu1 }
 0x10e   :  { %v507_v12 = vadd.f32 %v5555_v11, %v482_v41  ;;  %v8276_v41 = vld [vmem:[#allocation18_spill] sm:$0xff] }
 0x10f   :  { %v4135_v43 = vpop.f32.mrf.mxu1 }
 0x110   :  { %v8277_v43 = vld [vmem:[#allocation20_spill] sm:$0xff] }
 0x114   :  { %v4637_v2 = vpop.eup %4636 }
 0x115   :  { %v490_v4 = vadd.f32 1.0, %v4637_v2  ;;  %v8280_v2 = vld [vmem:[#allocation24_spill] sm:$0xff] }
 0x116   :  { %v4639_v6 = vpop.eup %4638 }
 0x117   :  { %4642 = vrcp.f32 %v490_v4  ;;  %v290_v7 = vmul.f32 %v4639_v6, %v289_v5  ;;  %v4641_v10 = vpop.eup %4640  ;;  %v8281_v4 = vld [vmem:[#allocation26_spill] sm:$0xff]  ;;  %v8283_v5 = vld [vmem:[#allocation29_spill] sm:$0xff] }
 0x119   :  { %v5538_v9 = vadd.f32 %v291_v8, %v290_v7  ;;  %v8284_v7 = vld [vmem:[#allocation30_spill] sm:$0xff]  ;;  %v8285_v8 = vld [vmem:[#allocation31_spill] sm:$0xff] }
 0x11b   :  { %515 = vst [vmem:[%s8115_s6] sm:$0xff] %v5538_v9  ;;  %635 = vmatmul.mubr.f32.vlgmr.msra.gmra.mxu0 %v5538_v9  ;;  %4169 = vmatmul.mubr.f32.vlgmr.msra.gmra.mxu1 %v5538_v9 }
 0x11c   :  { %793 = vmatpush1.msra.mxu0 %v5108_v45  ;;  %4172 = vmatpush3.msra.mxu1 %v5223_v63  ;;  %v8258_v45 = vld [vmem:[#allocation16_spill] sm:$0xff] }
 0x11d   :  { %794 = vmatprep.subr.mxu0 %v5120_v47  ;;  %4173 = vmatprep.subr.mxu1 %v8238_v61  ;;  %v497_v47 = vadd.f32 1.0, %v4641_v10 }
 0x11e   :  { %795 = vmatpush1.msra.mxu0 %v5128_v48  ;;  %4174 = vmatpush3.msra.mxu1 %v5242_v60  ;;  %v8260_v48 = vld [vmem:[#allocation5_spill] sm:$0xff]  ;;  %v8261_v60 = vld [vmem:[#allocation19_spill] sm:$0xff] }
 0x11f   :  { %796 = vmatprep.subr.mxu0 %v5139_v50  ;;  %4175 = vmatprep.subr.mxu1 %v8238_v61  ;;  %4644 = vrcp.f32 %v497_v47 }
 0x120   :  { %797 = vmatpush1.msra.mxu0 %v5146_v51  ;;  %4176 = vmatpush3.msra.mxu1 %v8258_v45  ;;  %v3695_v51 = vld [vmem:[%s8114_s1 + $0xb8] sm:$0xff]  ;;  %v8286_v45 = vld [vmem:[#allocation32_spill] sm:$0xff] }
 0x121   :  { %798 = vmatprep.subr.mxu0 %v8259_v13  ;;  %4177 = vmatprep.subr.mxu1 %v8238_v61  ;;  %v5781_v13 = vld [vmem:[%s8110_s2 + $0x90] sm:$0xff] }
 0x122   :  { %799 = vmatpush1.msra.mxu0 %v8260_v48  ;;  %4178 = vmatpush3.msra.mxu1 %v8261_v60  ;;  %v5787_v48 = vld [vmem:[%s8110_s2 + $0x80] sm:$0xff]  ;;  %v5793_v60 = vld [vmem:[%s8110_s2 + $0x78] sm:$0xff] }
 0x123   :  { %800 = vmatprep.subr.mxu0 %v8262_v15  ;;  %4179 = vmatprep.subr.mxu1 %v8238_v61  ;;  %v5799_v15 = vld [vmem:[%s8110_s2 + $0x68] sm:$0xff] }
 0x124   :  { %v4643_v50 = vpop.eup %4642  ;;  %801 = vmatpush1.msra.mxu0 %v8263_v17  ;;  %4180 = vmatpush3.msra.mxu1 %v8264_v20  ;;  %v5817_v17 = vld [vmem:[%s8110_s2 + $0x48] sm:$0xff]  ;;  %v5823_v20 = vld [vmem:[%s8110_s2 + $0x38] sm:$0xff] }
 0x125   :  { %v508_v22 = vmul.f32 %v4643_v50, %v507_v12  ;;  %802 = vmatprep.subr.mxu0 %v8265_v23  ;;  %4181 = vmatprep.subr.mxu1 %v8238_v61  ;;  %v8288_v12 = vld [vmem:[#allocation34_spill] sm:$0xff]  ;;  %v5805_v50 = vld [vmem:[%s8110_s2 + $0x60] sm:$0xff] }
 0x126   :  { %803 = vmatpush1.msra.mxu0 %v8266_v25  ;;  %4182 = vmatpush3.msra.mxu1 %v8267_v26  ;;  %v5835_v23 = vld [vmem:[%s8110_s2 + $0x20] sm:$0xff]  ;;  %v5841_v25 = vld [vmem:[%s8110_s2 + $0x18] sm:$0xff]  ;;  %v5847_v26 = vld [vmem:[%s8110_s2 + $0x8] sm:$0xff] }
 0x127   :  { %v509_v28 = vadd.f32 %v3695_v51, %v508_v22  ;;  %804 = vmatprep.subr.mxu0 %v8268_v29  ;;  %4183 = vmatprep.subr.mxu1 %v8238_v61  ;;  %v5811_v51 = vld [vmem:[%s8110_s2 + $0x50] sm:$0xff] }
 0x128   :  { %805 = vmatpush1.msra.mxu0 %v8269_v31  ;;  %4184 = vmatpush3.msra.mxu1 %v8270_v32  ;;  %v5829_v22 = vld [vmem:[%s8110_s2 + $0x30] sm:$0xff]  ;;  %v3700_v31 = vld [vmem:[%s8112_s0 + $0x18] sm:$0xff] }
 0x129   :  { %4646 = vtanh.f32 %v509_v28  ;;  %806 = vmatprep.subr.mxu0 %v8271_v34  ;;  %4185 = vmatprep.subr.mxu1 %v8238_v61  ;;  %v5853_v28 = vld [vmem:[%s8110_s2] sm:$0xff]  ;;  %v5859_v29 = vld [vmem:[%s8111_s3 + $0x170] sm:$0xff] }
 0x12a   :  { %807 = vmatpush1.msra.mxu0 %v8272_v35  ;;  %4186 = vmatpush3.msra.mxu1 %v5356_v54  ;;  %v8278_v54 = vld [vmem:[#allocation21_spill] sm:$0xff] }
 0x12b   :  { %808 = vmatprep.subr.mxu0 %v8273_v37  ;;  %4187 = vmatprep.subr.mxu1 %v8238_v61 }
 0x12c   :  { %809 = vmatpush1.msra.mxu0 %v8274_v38  ;;  %4188 = vmatpush3.msra.mxu1 %v5375_v53  ;;  %v4645_v53 = vpop.eup %4644 }
 0x12d   :  { %810 = vmatprep.subr.mxu0 %v8275_v40  ;;  %4189 = vmatprep.subr.mxu1 %v8238_v61  ;;  %v513_v10 = vmul.f32 0.0, %v4645_v53  ;;  %v3701_v40 = vld [vmem:[%s8112_s0 + $0x20] sm:$0xff] }
 0x12e   :  { %811 = vmatpush1.msra.mxu0 %v8276_v41  ;;  %4190 = vmatpush3.msra.mxu1 %v5394_v62  ;;  %v8282_v62 = vld [vmem:[#allocation27_spill] sm:$0xff] }
 0x12f   :  { %812 = vmatprep.subr.mxu0 %v8277_v43  ;;  %4191 = vmatprep.subr.mxu1 %v8238_v61 }
 0x130   :  { %813 = vmatpush1.msra.mxu0 %v8278_v54  ;;  %4192 = vmatpush3.msra.mxu1 %v5403_v57  ;;  %v511_v57 = vsub.f32 1.0, %v4645_v53 }
 0x131   :  { %814 = vmatprep.subr.mxu0 %v8279_v44  ;;  %4193 = vmatprep.subr.mxu1 %v8238_v61 }
 0x132   :  { %815 = vmatpush1.msra.mxu0 %v8280_v2  ;;  %4194 = vmatpush3.msra.mxu1 %v5412_v59 }
 0x133   :  { %816 = vmatprep.subr.mxu0 %v8281_v4  ;;  %4195 = vmatprep.subr.mxu1 %v8238_v61 }
 0x134   :  { %817 = vmatpush1.msra.mxu0 %v8282_v62  ;;  %4196 = vmatpush3.msra.mxu1 %v5421_v3  ;;  %v8287_v3 = vld [vmem:[#allocation33_spill] sm:$0xff]  ;;  %v3706_v62 = vld [vmem:[%s8114_s1 + $0x90] sm:$0xff] }
 0x135   :  { %818 = vmatprep.subr.mxu0 %v8283_v5  ;;  %4197 = vmatprep.subr.mxu1 %v8238_v61 }
 0x136   :  { %v4647_v6 = vpop.eup %4646  ;;  %819 = vmatpush1.msra.mxu0 %v8284_v7  ;;  %4198 = vmatpush3.msra.mxu1 %v5430_v56  ;;  %v5757_v56 = vld [vmem:[%s8110_s2 + $0xc0] sm:$0xff] }
 0x137   :  { %820 = vmatprep.subr.mxu0 %v8285_v8  ;;  %4199 = vmatprep.subr.mxu1 %v8238_v61  ;;  %v512_v59 = vmul.f32 %v4647_v6, %v511_v57  ;;  %v3702_v8 = vld [vmem:[%s8112_s0 + $0x28] sm:$0xff] }
 0x138   :  { %821 = vmatpush1.msra.mxu0 %v8286_v45  ;;  %4200 = vmatpush3.msra.mxu1 %v5439_v0  ;;  %v5769_v0 = vld [vmem:[%s8110_s2 + $0xa8] sm:$0xff] }
 0x139   :  { %822 = vmatprep.subr.mxu0 %v8287_v3  ;;  %4201 = vmatprep.subr.mxu1 %v8238_v61  ;;  %v5615_v47 = vadd.f32 %v513_v10, %v512_v59 }
 0x13a   :  { %823 = vmatpush1.msra.mxu0 %v8288_v12  ;;  %856 = vmatprep.mubr.f32.mxu0 %v8238_v61 }
 0x13b   :  { %4202 = vmatpush3.msra.mxu1 %v5448_v1  ;;  %4203 = vmatprep.mubr.msk.f32.mxu1 %vm4789_vm0, %v8238_v61  ;;  %3699 = vst [vmem:[%s8117_s7 + $0x38] sm:$0xff] %v5615_v47  ;;  %v5775_v1 = vld [vmem:[%s8110_s2 + $0x98] sm:$0xff] }
 0x13c   :  { %857 = vmatmul.mubr.f32.vlgmr.msra.gmra.mxu0 %v5615_v47  ;;  %4204 = vmatmul.mubr.f32.vlgmr.msra.gmra.mxu1 %v5615_v47 }
 0x13d   :  { %4206 = vmatprep.subr.mxu1 %v8238_v61  ;;  %1082 = vmatprep.mubr.f32.mxu0 %v8238_v61 }
 0x13e   :  { %4207 = vmatpush3.msra.mxu1 %v4912_v14  ;;  %4238 = vmatprep.mubr.msk.f32.mxu1 %vm4789_vm0, %v8238_v61  ;;  %v5667_v14 = vld [vmem:[%s8110_s2 + $0x170] sm:$0xff] }
 0x13f   :  { %4208 = vmatprep.subr.mxu1 %v8238_v61  ;;  %1018 = vmatprep.subr.mxu0 %v5667_v14 }
 0x140   :  { %4209 = vmatpush3.msra.mxu1 %v4924_v16  ;;  %v5673_v16 = vld [vmem:[%s8110_s2 + $0x168] sm:$0xff] }
 0x141   :  { %4210 = vmatprep.subr.mxu1 %v8238_v61  ;;  %1019 = vmatpush1.msra.mxu0 %v5673_v16 }
 0x142   :  { %4211 = vmatpush3.msra.mxu1 %v4936_v18  ;;  %v5679_v18 = vld [vmem:[%s8110_s2 + $0x158] sm:$0xff] }
 0x143   :  { %4212 = vmatprep.subr.mxu1 %v8238_v61  ;;  %1020 = vmatprep.subr.mxu0 %v5679_v18 }
 0x144   :  { %4213 = vmatpush3.msra.mxu1 %v4955_v21  ;;  %v5685_v21 = vld [vmem:[%s8110_s2 + $0x150] sm:$0xff] }
 0x145   :  { %4214 = vmatprep.subr.mxu1 %v8238_v61  ;;  %1021 = vmatpush1.msra.mxu0 %v5685_v21 }
 0x146   :  { %4215 = vmatpush3.msra.mxu1 %v4974_v24  ;;  %v5691_v24 = vld [vmem:[%s8110_s2 + $0x140] sm:$0xff] }
 0x147   :  { %4216 = vmatprep.subr.mxu1 %v8238_v61  ;;  %1022 = vmatprep.subr.mxu0 %v5691_v24 }
 0x148   :  { %4217 = vmatpush3.msra.mxu1 %v4993_v27  ;;  %v5697_v27 = vld [vmem:[%s8110_s2 + $0x138] sm:$0xff] }
 0x149   :  { %4218 = vmatprep.subr.mxu1 %v8238_v61  ;;  %1023 = vmatpush1.msra.mxu0 %v5697_v27 }
 0x14a   :  { %4219 = vmatpush3.msra.mxu1 %v5012_v30  ;;  %v5703_v30 = vld [vmem:[%s8110_s2 + $0x128] sm:$0xff] }
 0x14b   :  { %4220 = vmatprep.subr.mxu1 %v8238_v61  ;;  %1024 = vmatprep.subr.mxu0 %v5703_v30 }
 0x14c   :  { %4221 = vmatpush3.msra.mxu1 %v5031_v33  ;;  %v5709_v33 = vld [vmem:[%s8110_s2 + $0x120] sm:$0xff] }
 0x14d   :  { %4222 = vmatprep.subr.mxu1 %v8238_v61  ;;  %1025 = vmatpush1.msra.mxu0 %v5709_v33 }
 0x14e   :  { %4223 = vmatpush3.msra.mxu1 %v5050_v36  ;;  %v5715_v36 = vld [vmem:[%s8110_s2 + $0x110] sm:$0xff] }
 0x14f   :  { %4224 = vmatprep.subr.mxu1 %v8238_v61  ;;  %1026 = vmatprep.subr.mxu0 %v5715_v36 }
 0x150   :  { %4225 = vmatpush3.msra.mxu1 %v5069_v39  ;;  %v5721_v39 = vld [vmem:[%s8110_s2 + $0x108] sm:$0xff] }
 0x151   :  { %4226 = vmatprep.subr.mxu1 %v8238_v61  ;;  %1027 = vmatpush1.msra.mxu0 %v5721_v39 }
 0x152   :  { %4227 = vmatpush3.msra.mxu1 %v5088_v42  ;;  %v5727_v42 = vld [vmem:[%s8110_s2 + $0xf8] sm:$0xff] }
 0x153   :  { %4228 = vmatprep.subr.mxu1 %v8238_v61  ;;  %1028 = vmatprep.subr.mxu0 %v5727_v42 }
 0x154   :  { %4229 = vmatpush3.msra.mxu1 %v5114_v46  ;;  %v5733_v46 = vld [vmem:[%s8110_s2 + $0xf0] sm:$0xff] }
 0x155   :  { %4230 = vmatprep.subr.mxu1 %v8238_v61  ;;  %1029 = vmatpush1.msra.mxu0 %v5733_v46 }
 0x156   :  { %4231 = vmatpush3.msra.mxu1 %v5133_v49  ;;  %v5739_v49 = vld [vmem:[%s8110_s2 + $0xe0] sm:$0xff] }
 0x157   :  { %4232 = vmatprep.subr.mxu1 %v8238_v61  ;;  %1030 = vmatprep.subr.mxu0 %v5739_v49 }
 0x158   :  { %4233 = vmatpush3.msra.mxu1 %v5152_v52  ;;  %v5745_v52 = vld [vmem:[%s8110_s2 + $0xd8] sm:$0xff] }
 0x159   :  { %4234 = vmatprep.subr.mxu1 %v8238_v61  ;;  %1031 = vmatpush1.msra.mxu0 %v5745_v52 }
 0x15a   :  { %4235 = vmatpush3.msra.mxu1 %v5171_v55  ;;  %v5751_v55 = vld [vmem:[%s8110_s2 + $0xc8] sm:$0xff] }
 0x15b   :  { %4236 = vmatprep.subr.mxu1 %v8238_v61  ;;  %1032 = vmatprep.subr.mxu0 %v5751_v55 }
 0x15c   :  { %4237 = vmatpush3.msra.mxu1 %v5190_v58  ;;  %1033 = vmatpush1.msra.mxu0 %v5757_v56  ;;  %v5763_v58 = vld [vmem:[%s8110_s2 + $0xb0] sm:$0xff] }
 0x15d   :  { %4241 = vmatprep.subr.mxu1 %v8238_v61  ;;  %1034 = vmatprep.subr.mxu0 %v5763_v58 }
 0x15e   :  { %1035 = vmatpush1.msra.mxu0 %v5769_v0 }
 0x15f   :  { %1036 = vmatprep.subr.mxu0 %v5775_v1 }
 0x160   :  { %1037 = vmatpush1.msra.mxu0 %v5781_v13 }
 0x161   :  { %1038 = vmatprep.subr.mxu0 %v5787_v48 }
 0x162   :  { %1039 = vmatpush1.msra.mxu0 %v5793_v60 }
 0x163   :  { %1040 = vmatprep.subr.mxu0 %v5799_v15 }
 0x164   :  { %1041 = vmatpush1.msra.mxu0 %v5805_v50 }
 0x165   :  { %1042 = vmatprep.subr.mxu0 %v5811_v51 }
 0x166   :  { %1043 = vmatpush1.msra.mxu0 %v5817_v17 }
 0x167   :  { %1044 = vmatprep.subr.mxu0 %v5823_v20 }
 0x168   :  { %1045 = vmatpush1.msra.mxu0 %v5829_v22 }
 0x169   :  { %1046 = vmatprep.subr.mxu0 %v5835_v23 }
 0x16a   :  { %1047 = vmatpush1.msra.mxu0 %v5841_v25 }
 0x16b   :  { %1048 = vmatprep.subr.mxu0 %v5847_v26 }
 0x16c   :  { %1049 = vmatpush1.msra.mxu0 %v5853_v28 }
 0x16d   :  { %1240 = vmatprep.subr.mxu0 %v5859_v29 }
 0x1db   :  { %v636_v32 = vpop.f32.mrf.mxu0  ;;  %v707_v34 = vpop.f32.mrf.mxu1 }
 0x1dc   :  { %v711_v35 = vadd.f32 %v3700_v31, %v636_v32  ;;  %v732_v5 = vadd.f32 %v5526_v19, %v707_v34  ;;  %v3707_v31 = vld [vmem:[%s8114_s1 + $0x98] sm:$0xff] }
 0x1dd   :  { %v4170_v37 = vpop.f32.mrf.mxu1  ;;  %v638_v41 = vpop.f32.mrf.mxu0 }
 0x1de   :  { %v3703_v38 = vmul.f32 -1.442695, %v711_v35  ;;  %v718_v43 = vadd.f32 %v3701_v40, %v638_v41 }
 0x1e0   :  { %4648 = vpow2.f32 %v3703_v38  ;;  %v3704_v54 = vmul.f32 -1.442695, %v718_v43 }
 0x1e2   :  { %4650 = vpow2.f32 %v3704_v54 }
 0x1ed   :  { %v4649_v44 = vpop.eup %4648 }
 0x1ee   :  { %v715_v53 = vadd.f32 1.0, %v4649_v44 }
 0x1ef   :  { %v4651_v2 = vpop.eup %4650 }
 0x1f0   :  { %4652 = vrcp.f32 %v715_v53  ;;  %v722_v4 = vadd.f32 1.0, %v4651_v2  ;;  %v5884_v53 = vld [vmem:[%s8111_s3 + $0x168] sm:$0xff]  ;;  %v5889_v2 = vld [vmem:[%s8111_s3 + $0x158] sm:$0xff] }
 0x1f2   :  { %4654 = vrcp.f32 %v722_v4  ;;  %v5905_v4 = vld [vmem:[%s8111_s3 + $0x160] sm:$0xff] }
 0x1fc   :  { %v858_v57 = vpop.f32.mrf.mxu0  ;;  %v929_v6 = vpop.f32.mrf.mxu1 }
 0x1fd   :  { %v4653_v7 = vpop.eup %4652  ;;  %v933_v59 = vadd.f32 %v3706_v62, %v858_v57  ;;  %v5912_v62 = vld [vmem:[%s8111_s3 + $0x140] sm:$0xff]  ;;  %v5924_v57 = vld [vmem:[%s8111_s3 + $0x148] sm:$0xff] }
 0x1fe   :  { %v733_v10 = vmul.f32 %v4653_v7, %v732_v5  ;;  %v4205_v45 = vpop.f32.mrf.mxu1  ;;  %v860_v32 = vpop.f32.mrf.mxu0  ;;  %v5919_v5 = vld [vmem:[%s8111_s3 + $0x138] sm:$0xff] }
 0x1ff   :  { %v3709_v3 = vmul.f32 -1.442695, %v933_v59  ;;  %v940_v19 = vadd.f32 %v3707_v31, %v860_v32  ;;  %v4655_v35 = vpop.eup %4654  ;;  %v5943_v59 = vld [vmem:[%s8111_s3 + $0x130] sm:$0xff]  ;;  %v5957_v45 = vld [vmem:[%s8111_s3 + $0x108] sm:$0xff]  ;;  %v5969_v31 = vld [vmem:[%s8111_s3 + $0xf8] sm:$0xff] }
 0x200   :  { %v734_v12 = vadd.f32 %v3702_v8, %v733_v10  ;;  %v736_v38 = vsub.f32 1.0, %v4655_v35  ;;  %v738_v54 = vmul.f32 %v4655_v35, %v5538_v9  ;;  %v5900_v9 = vld [vmem:[%s8111_s3 + $0x150] sm:$0xff]  ;;  %v5938_v8 = vld [vmem:[%s8111_s3 + $0x120] sm:$0xff] }
 0x201   :  { %4656 = vpow2.f32 %v3709_v3  ;;  %v3710_v34 = vmul.f32 -1.442695, %v940_v19  ;;  %v5950_v10 = vld [vmem:[%s8111_s3 + $0x110] sm:$0xff]  ;;  %v5962_v3 = vld [vmem:[%s8111_s3 + $0x118] sm:$0xff]  ;;  %v5981_v19 = vld [vmem:[%s8111_s3 + $0x100] sm:$0xff] }
 0x202   :  { %4658 = vtanh.f32 %v734_v12  ;;  %v5976_v32 = vld [vmem:[%s8111_s3 + $0xf0] sm:$0xff]  ;;  %v5989_v35 = vld [vmem:[%s8111_s3 + $0xe0] sm:$0xff] }
 0x203   :  { %4660 = vpow2.f32 %v3710_v34  ;;  %v954_v34 = vadd.f32 %v5555_v11, %v929_v6  ;;  %8289 = vst [vmem:[#allocation16_spill] sm:$0xff] %v5989_v35  ;;  %v5999_v6 = vld [vmem:[%s8111_s3 + $0xd8] sm:$0xff] }
 0x204   :  { %8290 = vst [vmem:[#allocation4_spill] sm:$0xff] %v5999_v6 }
 0x20e   :  { %v4657_v37 = vpop.eup %4656 }
 0x20f   :  { %v4659_v40 = vpop.eup %4658  ;;  %v937_v41 = vadd.f32 1.0, %v4657_v37 }
 0x210   :  { %v737_v43 = vmul.f32 %v4659_v40, %v736_v38  ;;  %v4661_v7 = vpop.eup %4660  ;;  %v3708_v38 = vld [vmem:[%s8114_s1 + $0xa0] sm:$0xff]  ;;  %v6004_v40 = vld [vmem:[%s8111_s3 + $0xe8] sm:$0xff] }
 0x211   :  { %4662 = vrcp.f32 %v937_v41  ;;  %v944_v12 = vadd.f32 1.0, %v4661_v7  ;;  %8291 = vst [vmem:[#allocation5_spill] sm:$0xff] %v6004_v40  ;;  %v6023_v7 = vld [vmem:[%s8111_s3 + $0xd0] sm:$0xff] }
 0x212   :  { %v5879_v44 = vadd.f32 %v738_v54, %v737_v43  ;;  %v6011_v43 = vld [vmem:[%s8111_s3 + $0xc8] sm:$0xff]  ;;  %v6018_v54 = vld [vmem:[%s8111_s3 + $0xc0] sm:$0xff]  ;;  %8294 = vst [vmem:[#allocation7_spill] sm:$0xff] %v6023_v7 }
 0x213   :  { %4664 = vrcp.f32 %v944_v12  ;;  %8292 = vst [vmem:[#allocation19_spill] sm:$0xff] %v6011_v43  ;;  %8293 = vst [vmem:[#allocation6_spill] sm:$0xff] %v6018_v54 }
 0x214   :  { %3712 = vst [vmem:[%s8115_s6 + $0x8] sm:$0xff] %v5879_v44  ;;  %1083 = vmatmul.mubr.f32.vlgmr.msra.gmra.mxu0 %v5879_v44  ;;  %4239 = vmatmul.mubr.f32.vlgmr.msra.gmra.mxu1 %v5879_v44 }
 0x215   :  { %1241 = vmatpush1.msra.mxu0 %v5884_v53  ;;  %4242 = vmatpush3.msra.mxu1 %v5223_v63  ;;  %v5931_v63 = vld [vmem:[%s8111_s3 + $0x128] sm:$0xff] }
 0x216   :  { %1242 = vmatprep.subr.mxu0 %v5889_v2  ;;  %4243 = vmatprep.subr.mxu1 %v8238_v61 }
 0x217   :  { %1243 = vmatpush1.msra.mxu0 %v5900_v9  ;;  %4244 = vmatpush3.msra.mxu1 %v5905_v4 }
 0x218   :  { %1244 = vmatprep.subr.mxu0 %v5912_v62  ;;  %4245 = vmatprep.subr.mxu1 %v8238_v61 }
 0x219   :  { %1245 = vmatpush1.msra.mxu0 %v5919_v5  ;;  %4246 = vmatpush3.msra.mxu1 %v5924_v57 }
 0x21a   :  { %1246 = vmatprep.subr.mxu0 %v5931_v63  ;;  %4247 = vmatprep.subr.mxu1 %v8238_v61 }
 0x21b   :  { %1247 = vmatpush1.msra.mxu0 %v5938_v8  ;;  %4248 = vmatpush3.msra.mxu1 %v5943_v59 }
 0x21c   :  { %1248 = vmatprep.subr.mxu0 %v5950_v10  ;;  %4249 = vmatprep.subr.mxu1 %v8238_v61 }
 0x21d   :  { %1249 = vmatpush1.msra.mxu0 %v5957_v45  ;;  %4250 = vmatpush3.msra.mxu1 %v5962_v3 }
 0x21e   :  { %v4663_v37 = vpop.eup %4662  ;;  %1250 = vmatprep.subr.mxu0 %v5969_v31  ;;  %4251 = vmatprep.subr.mxu1 %v8238_v61 }
 0x21f   :  { %v955_v41 = vmul.f32 %v4663_v37, %v954_v34  ;;  %1251 = vmatpush1.msra.mxu0 %v5976_v32  ;;  %4252 = vmatpush3.msra.mxu1 %v5981_v19  ;;  %v6030_v34 = vld [vmem:[%s8111_s3 + $0xb0] sm:$0xff]  ;;  %v6037_v37 = vld [vmem:[%s8111_s3 + $0xa8] sm:$0xff] }
 0x220   :  { %1252 = vmatprep.subr.mxu0 %v5989_v35  ;;  %4253 = vmatprep.subr.mxu1 %v8238_v61  ;;  %8295 = vst [vmem:[#allocation22_spill] sm:$0xff] %v6030_v34  ;;  %8296 = vst [vmem:[#allocation8_spill] sm:$0xff] %v6037_v37 }
 0x221   :  { %v956_v12 = vadd.f32 %v3708_v38, %v955_v41  ;;  %1253 = vmatpush1.msra.mxu0 %v5999_v6  ;;  %4254 = vmatpush3.msra.mxu1 %v6004_v40  ;;  %v6042_v38 = vld [vmem:[%s8111_s3 + $0xb8] sm:$0xff]  ;;  %v6170_v6 = vld [vmem:[%s8111_s3] sm:$0xff] }
 0x222   :  { %1254 = vmatprep.subr.mxu0 %v6011_v43  ;;  %4255 = vmatprep.subr.mxu1 %v8238_v61  ;;  %8297 = vst [vmem:[#allocation9_spill] sm:$0xff] %v6042_v38  ;;  %v6049_v41 = vld [vmem:[%s8111_s3 + $0x98] sm:$0xff]  ;;  %v6056_v43 = vld [vmem:[%s8111_s3 + $0x90] sm:$0xff] }
 0x223   :  { %4666 = vtanh.f32 %v956_v12  ;;  %1255 = vmatpush1.msra.mxu0 %v6018_v54  ;;  %4256 = vmatpush3.msra.mxu1 %v6023_v7  ;;  %8298 = vst [vmem:[#allocation25_spill] sm:$0xff] %v6049_v41  ;;  %8299 = vst [vmem:[#allocation10_spill] sm:$0xff] %v6056_v43  ;;  %v6061_v12 = vld [vmem:[%s8111_s3 + $0xa0] sm:$0xff]  ;;  %v6075_v7 = vld [vmem:[%s8111_s3 + $0x78] sm:$0xff] }
 0x224   :  { %1256 = vmatprep.subr.mxu0 %v6030_v34  ;;  %4257 = vmatprep.subr.mxu1 %v8238_v61  ;;  %8300 = vst [vmem:[#allocation11_spill] sm:$0xff] %v6061_v12  ;;  %v6068_v34 = vld [vmem:[%s8111_s3 + $0x80] sm:$0xff]  ;;  %8302 = vst [vmem:[#allocation12_spill] sm:$0xff] %v6075_v7  ;;  %v6132_v54 = vld [vmem:[%s8111_s3 + $0x30] sm:$0xff] }
 0x225   :  { %1257 = vmatpush1.msra.mxu0 %v6037_v37  ;;  %4258 = vmatpush3.msra.mxu1 %v6042_v38  ;;  %8301 = vst [vmem:[#allocation28_spill] sm:$0xff] %v6068_v34  ;;  %v6080_v37 = vld [vmem:[%s8111_s3 + $0x88] sm:$0xff]  ;;  %v6094_v38 = vld [vmem:[%s8111_s3 + $0x60] sm:$0xff]  ;;  %8311 = vst [vmem:[#allocation24_spill] sm:$0xff] %v6132_v54 }
 0x226   :  { %1258 = vmatprep.subr.mxu0 %v6049_v41  ;;  %4259 = vmatprep.subr.mxu1 %v8238_v61  ;;  %8303 = vst [vmem:[#allocation13_spill] sm:$0xff] %v6080_v37  ;;  %v6087_v41 = vld [vmem:[%s8111_s3 + $0x68] sm:$0xff]  ;;  %8305 = vst [vmem:[#allocation15_spill] sm:$0xff] %v6094_v38 }
 0x227   :  { %1259 = vmatpush1.msra.mxu0 %v6056_v43  ;;  %4260 = vmatpush3.msra.mxu1 %v6061_v12  ;;  %8304 = vst [vmem:[#allocation14_spill] sm:$0xff] %v6087_v41  ;;  %v6099_v43 = vld [vmem:[%s8111_s3 + $0x70] sm:$0xff]  ;;  %v6113_v12 = vld [vmem:[%s8111_s3 + $0x48] sm:$0xff] }
 0x228   :  { %1260 = vmatprep.subr.mxu0 %v6068_v34  ;;  %4261 = vmatprep.subr.mxu1 %v8238_v61  ;;  %8306 = vst [vmem:[#allocation17_spill] sm:$0xff] %v6099_v43  ;;  %v6106_v34 = vld [vmem:[%s8111_s3 + $0x50] sm:$0xff]  ;;  %8308 = vst [vmem:[#allocation20_spill] sm:$0xff] %v6113_v12 }
 0x229   :  { %1261 = vmatpush1.msra.mxu0 %v6075_v7  ;;  %4262 = vmatpush3.msra.mxu1 %v6080_v37  ;;  %8307 = vst [vmem:[#allocation18_spill] sm:$0xff] %v6106_v34  ;;  %v6118_v7 = vld [vmem:[%s8111_s3 + $0x58] sm:$0xff]  ;;  %v4665_v37 = vpop.eup %4664 }
 0x22a   :  { %1262 = vmatprep.subr.mxu0 %v6087_v41  ;;  %4263 = vmatprep.subr.mxu1 %v8238_v61  ;;  %8309 = vst [vmem:[#allocation21_spill] sm:$0xff] %v6118_v7  ;;  %v6125_v41 = vld [vmem:[%s8111_s3 + $0x38] sm:$0xff]  ;;  %v960_v35 = vmul.f32 %v4665_v37, %v5615_v47 }
 0x22b   :  { %1263 = vmatpush1.msra.mxu0 %v6094_v38  ;;  %4264 = vmatpush3.msra.mxu1 %v6099_v43  ;;  %8310 = vst [vmem:[#allocation23_spill] sm:$0xff] %v6125_v41  ;;  %v6137_v38 = vld [vmem:[%s8111_s3 + $0x40] sm:$0xff]  ;;  %v6151_v43 = vld [vmem:[%s8111_s3 + $0x18] sm:$0xff] }
 0x22c   :  { %1264 = vmatprep.subr.mxu0 %v6106_v34  ;;  %4265 = vmatprep.subr.mxu1 %v8238_v61  ;;  %8312 = vst [vmem:[#allocation26_spill] sm:$0xff] %v6137_v38  ;;  %v6144_v34 = vld [vmem:[%s8111_s3 + $0x20] sm:$0xff]  ;;  %v6235_v47 = vld [vmem:[%s8110_s2 + $0x178] sm:$0xff] }
 0x22d   :  { %1265 = vmatpush1.msra.mxu0 %v6113_v12  ;;  %4266 = vmatpush3.msra.mxu1 %v6118_v7  ;;  %8313 = vst [vmem:[#allocation27_spill] sm:$0xff] %v6144_v34  ;;  %v6156_v12 = vld [vmem:[%s8111_s3 + $0x28] sm:$0xff]  ;;  %v958_v7 = vsub.f32 1.0, %v4665_v37 }
 0x22e   :  { %1266 = vmatprep.subr.mxu0 %v6125_v41  ;;  %4267 = vmatprep.subr.mxu1 %v8238_v61  ;;  %v6163_v41 = vld [vmem:[%s8111_s3 + $0x8] sm:$0xff] }
 0x22f   :  { %1267 = vmatpush1.msra.mxu0 %v6132_v54  ;;  %4268 = vmatpush3.msra.mxu1 %v6137_v38  ;;  %v6177_v38 = vld [vmem:[%s8111_s3 + $0x10] sm:$0xff] }
 0x230   :  { %v4667_v40 = vpop.eup %4666  ;;  %1268 = vmatprep.subr.mxu0 %v6144_v34  ;;  %4269 = vmatprep.subr.mxu1 %v8238_v61 }
 0x231   :  { %1269 = vmatpush1.msra.mxu0 %v6151_v43  ;;  %4270 = vmatpush3.msra.mxu1 %v6156_v12  ;;  %v959_v54 = vmul.f32 %v4667_v40, %v958_v7 }
 0x232   :  { %1270 = vmatprep.subr.mxu0 %v6163_v41  ;;  %4271 = vmatprep.subr.mxu1 %v8238_v61 }
 0x233   :  { %1271 = vmatpush1.msra.mxu0 %v6170_v6  ;;  %1304 = vmatprep.mubr.f32.mxu0 %v8238_v61  ;;  %v6184_v34 = vadd.f32 %v960_v35, %v959_v54  ;;  %v3716_v54 = vld [vmem:[%s8112_s0 + $0x40] sm:$0xff] }
 0x234   :  { %4272 = vmatpush3.msra.mxu1 %v6177_v38  ;;  %4273 = vmatprep.mubr.msk.f32.mxu1 %vm4789_vm0, %v8238_v61 }
 0x235   :  { %3713 = vst [vmem:[%s8117_s7 + $0x30] sm:$0xff] %v6184_v34  ;;  %1305 = vmatmul.mubr.f32.vlgmr.msra.gmra.mxu0 %v6184_v34  ;;  %4274 = vmatmul.mubr.f32.vlgmr.msra.gmra.mxu1 %v6184_v34 }
 0x236   :  { %1466 = vmatprep.subr.mxu0 %v5667_v14  ;;  %4276 = vmatprep.subr.mxu1 %v8238_v61  ;;  %v6242_v14 = vld [vmem:[%s8110_s2 + $0x160] sm:$0xff] }
 0x237   :  { %1467 = vmatpush1.msra.mxu0 %v5673_v16  ;;  %1530 = vmatprep.mubr.f32.mxu0 %v8238_v61  ;;  %v6249_v16 = vld [vmem:[%s8110_s2 + $0x148] sm:$0xff] }
 0x238   :  { %1468 = vmatprep.subr.mxu0 %v5679_v18  ;;  %4308 = vmatprep.mubr.msk.f32.mxu1 %vm4789_vm0, %v8238_v61  ;;  %v6256_v18 = vld [vmem:[%s8110_s2 + $0x130] sm:$0xff] }
 0x239   :  { %1469 = vmatpush1.msra.mxu0 %v5685_v21  ;;  %4277 = vmatpush3.msra.mxu1 %v6235_v47  ;;  %v6263_v21 = vld [vmem:[%s8110_s2 + $0x118] sm:$0xff] }
 0x23a   :  { %1470 = vmatprep.subr.mxu0 %v5691_v24  ;;  %4278 = vmatprep.subr.mxu1 %v8238_v61  ;;  %v6270_v24 = vld [vmem:[%s8110_s2 + $0x100] sm:$0xff] }
 0x23b   :  { %1471 = vmatpush1.msra.mxu0 %v5697_v27  ;;  %4279 = vmatpush3.msra.mxu1 %v6242_v14  ;;  %v6277_v27 = vld [vmem:[%s8110_s2 + $0xe8] sm:$0xff] }
 0x23c   :  { %1472 = vmatprep.subr.mxu0 %v5703_v30  ;;  %4280 = vmatprep.subr.mxu1 %v8238_v61  ;;  %v6284_v30 = vld [vmem:[%s8110_s2 + $0xd0] sm:$0xff] }
 0x23d   :  { %1473 = vmatpush1.msra.mxu0 %v5709_v33  ;;  %4281 = vmatpush3.msra.mxu1 %v6249_v16  ;;  %v6291_v33 = vld [vmem:[%s8110_s2 + $0xb8] sm:$0xff] }
 0x23e   :  { %1474 = vmatprep.subr.mxu0 %v5715_v36  ;;  %4282 = vmatprep.subr.mxu1 %v8238_v61  ;;  %v6298_v36 = vld [vmem:[%s8110_s2 + $0xa0] sm:$0xff] }
 0x23f   :  { %1475 = vmatpush1.msra.mxu0 %v5721_v39  ;;  %4283 = vmatpush3.msra.mxu1 %v6256_v18  ;;  %v6305_v39 = vld [vmem:[%s8110_s2 + $0x88] sm:$0xff] }
 0x240   :  { %1476 = vmatprep.subr.mxu0 %v5727_v42  ;;  %4284 = vmatprep.subr.mxu1 %v8238_v61  ;;  %v6312_v42 = vld [vmem:[%s8110_s2 + $0x70] sm:$0xff] }
 0x241   :  { %1477 = vmatpush1.msra.mxu0 %v5733_v46  ;;  %4285 = vmatpush3.msra.mxu1 %v6263_v21  ;;  %v6319_v46 = vld [vmem:[%s8110_s2 + $0x58] sm:$0xff] }
 0x242   :  { %1478 = vmatprep.subr.mxu0 %v5739_v49  ;;  %4286 = vmatprep.subr.mxu1 %v8238_v61  ;;  %v6326_v49 = vld [vmem:[%s8110_s2 + $0x40] sm:$0xff] }
 0x243   :  { %1479 = vmatpush1.msra.mxu0 %v5745_v52  ;;  %4287 = vmatpush3.msra.mxu1 %v6270_v24  ;;  %v6333_v52 = vld [vmem:[%s8110_s2 + $0x28] sm:$0xff] }
 0x244   :  { %1480 = vmatprep.subr.mxu0 %v5751_v55  ;;  %4288 = vmatprep.subr.mxu1 %v8238_v61  ;;  %v6340_v55 = vld [vmem:[%s8110_s2 + $0x10] sm:$0xff] }
 0x245   :  { %1481 = vmatpush1.msra.mxu0 %v5757_v56  ;;  %4289 = vmatpush3.msra.mxu1 %v6277_v27  ;;  %v3714_v56 = vld [vmem:[%s8112_s0 + $0x30] sm:$0xff] }
 0x246   :  { %1482 = vmatprep.subr.mxu0 %v5763_v58  ;;  %4290 = vmatprep.subr.mxu1 %v8238_v61 }
 0x247   :  { %1483 = vmatpush1.msra.mxu0 %v5769_v0  ;;  %4291 = vmatpush3.msra.mxu1 %v6284_v30 }
 0x248   :  { %1484 = vmatprep.subr.mxu0 %v5775_v1  ;;  %4292 = vmatprep.subr.mxu1 %v8238_v61 }
 0x249   :  { %1485 = vmatpush1.msra.mxu0 %v5781_v13  ;;  %4293 = vmatpush3.msra.mxu1 %v6291_v33 }
 0x24a   :  { %1486 = vmatprep.subr.mxu0 %v5787_v48  ;;  %4294 = vmatprep.subr.mxu1 %v8238_v61 }
 0x24b   :  { %1487 = vmatpush1.msra.mxu0 %v5793_v60  ;;  %4295 = vmatpush3.msra.mxu1 %v6298_v36  ;;  %v3715_v60 = vld [vmem:[%s8112_s0 + $0x38] sm:$0xff] }
 0x24c   :  { %1488 = vmatprep.subr.mxu0 %v5799_v15  ;;  %4296 = vmatprep.subr.mxu1 %v8238_v61 }
 0x24d   :  { %1489 = vmatpush1.msra.mxu0 %v5805_v50  ;;  %4297 = vmatpush3.msra.mxu1 %v6305_v39 }
 0x24e   :  { %1490 = vmatprep.subr.mxu0 %v5811_v51  ;;  %4298 = vmatprep.subr.mxu1 %v8238_v61 }
 0x24f   :  { %1491 = vmatpush1.msra.mxu0 %v5817_v17  ;;  %4299 = vmatpush3.msra.mxu1 %v6312_v42 }
 0x250   :  { %1492 = vmatprep.subr.mxu0 %v5823_v20  ;;  %4300 = vmatprep.subr.mxu1 %v8238_v61 }
 0x251   :  { %1493 = vmatpush1.msra.mxu0 %v5829_v22  ;;  %4301 = vmatpush3.msra.mxu1 %v6319_v46 }
 0x252   :  { %1494 = vmatprep.subr.mxu0 %v5835_v23  ;;  %4302 = vmatprep.subr.mxu1 %v8238_v61  ;;  %v6353_v23 = vld [vmem:[%s8113_s4] ss:$0 sm:$0xff] }
 0x253   :  { %1495 = vmatpush1.msra.mxu0 %v5841_v25  ;;  %4303 = vmatpush3.msra.mxu1 %v6326_v49 }
 0x254   :  { %1496 = vmatprep.subr.mxu0 %v5847_v26  ;;  %4304 = vmatprep.subr.mxu1 %v8238_v61  ;;  %v3720_v26 = vld [vmem:[%s8114_s1 + $0x78] sm:$0xff] }
 0x255   :  { %1497 = vmatpush1.msra.mxu0 %v5853_v28  ;;  %4305 = vmatpush3.msra.mxu1 %v6333_v52 }
 0x256   :  { %1688 = vmatprep.subr.mxu0 %v5859_v29  ;;  %4306 = vmatprep.subr.mxu1 %v8238_v61 }
 0x257   :  { %4307 = vmatpush3.msra.mxu1 %v6340_v55 }
 0x258   :  { %4311 = vmatprep.subr.mxu1 %v8238_v61 }
 0x2d4   :  { %v1084_v58 = vpop.f32.mrf.mxu0  ;;  %v1155_v0 = vpop.f32.mrf.mxu1 }
 0x2d5   :  { %v1159_v1 = vadd.f32 %v3714_v56, %v1084_v58  ;;  %v1180_v28 = vadd.f32 %v6353_v23, %v1155_v0 }
 0x2d6   :  { %v4240_v13 = vpop.f32.mrf.mxu1  ;;  %v1086_v15 = vpop.f32.mrf.mxu0 }
 0x2d7   :  { %v3717_v48 = vmul.f32 -1.442695, %v1159_v1  ;;  %v1166_v50 = vadd.f32 %v3715_v60, %v1086_v15  ;;  %v3721_v13 = vld [vmem:[%s8114_s1 + $0x80] sm:$0xff] }
 0x2d9   :  { %4668 = vpow2.f32 %v3717_v48  ;;  %v3718_v51 = vmul.f32 -1.442695, %v1166_v50 }
 0x2db   :  { %4670 = vpow2.f32 %v3718_v51 }
 0x2e6   :  { %v4669_v17 = vpop.eup %4668 }
 0x2e7   :  { %v1163_v20 = vadd.f32 1.0, %v4669_v17 }
 0x2e8   :  { %v4671_v22 = vpop.eup %4670 }
 0x2e9   :  { %4672 = vrcp.f32 %v1163_v20  ;;  %v1170_v25 = vadd.f32 1.0, %v4671_v22 }
 0x2eb   :  { %4674 = vrcp.f32 %v1170_v25 }
 0x2f5   :  { %v1306_v29 = vpop.f32.mrf.mxu0  ;;  %v1377_v35 = vpop.f32.mrf.mxu1 }
 0x2f6   :  { %v4673_v40 = vpop.eup %4672  ;;  %v1381_v7 = vadd.f32 %v3720_v26, %v1306_v29  ;;  %v8325_v29 = vld [vmem:[#allocation11_spill] sm:$0xff] }
 0x2f7   :  { %v1181_v37 = vmul.f32 %v4673_v40, %v1180_v28  ;;  %v4275_v56 = vpop.f32.mrf.mxu1  ;;  %v1308_v48 = vpop.f32.mrf.mxu0  ;;  %v6371_v28 = vld [vmem:[%s8111_s3 + $0x178] sm:$0xff]  ;;  %v8327_v40 = vld [vmem:[#allocation12_spill] sm:$0xff] }
 0x2f8   :  { %v3723_v58 = vmul.f32 -1.442695, %v1381_v7  ;;  %v1388_v0 = vadd.f32 %v3721_v13, %v1308_v48  ;;  %v4675_v15 = vpop.eup %4674  ;;  %v8329_v7 = vld [vmem:[#allocation14_spill] sm:$0xff]  ;;  %v8331_v56 = vld [vmem:[#allocation17_spill] sm:$0xff]  ;;  %v8333_v13 = vld [vmem:[#allocation20_spill] sm:$0xff] }
 0x2f9   :  { %v1182_v1 = vadd.f32 %v3716_v54, %v1181_v37  ;;  %v1184_v51 = vsub.f32 1.0, %v4675_v15  ;;  %v1186_v25 = vmul.f32 %v4675_v15, %v5879_v44  ;;  %v8328_v54 = vld [vmem:[#allocation13_spill] sm:$0xff]  ;;  %v8330_v37 = vld [vmem:[#allocation15_spill] sm:$0xff]  ;;  %v8337_v15 = vld [vmem:[#allocation26_spill] sm:$0xff] }
 0x2fa   :  { %4676 = vpow2.f32 %v3723_v58  ;;  %v3724_v60 = vmul.f32 -1.442695, %v1388_v0  ;;  %v8334_v48 = vld [vmem:[#allocation21_spill] sm:$0xff]  ;;  %v8335_v0 = vld [vmem:[#allocation23_spill] sm:$0xff] }
 0x2fb   :  { %4678 = vtanh.f32 %v1182_v1  ;;  %v8332_v1 = vld [vmem:[#allocation18_spill] sm:$0xff] }
 0x2fc   :  { %4680 = vpow2.f32 %v3724_v60  ;;  %v8336_v60 = vld [vmem:[#allocation24_spill] sm:$0xff] }
 0x307   :  { %v4677_v50 = vpop.eup %4676 }
 0x308   :  { %v4679_v17 = vpop.eup %4678  ;;  %v1385_v20 = vadd.f32 1.0, %v4677_v50 }
 0x309   :  { %v1185_v22 = vmul.f32 %v4679_v17, %v1184_v51  ;;  %v4681_v44 = vpop.eup %4680  ;;  %v8338_v17 = vld [vmem:[#allocation27_spill] sm:$0xff] }
 0x30a   :  { %4682 = vrcp.f32 %v1385_v20 }
 0x30b   :  { %v6366_v26 = vadd.f32 %v1186_v25, %v1185_v22 }
 0x30d   :  { %3726 = vst [vmem:[%s8115_s6 + $0x10] sm:$0xff] %v6366_v26  ;;  %1531 = vmatmul.mubr.f32.vlgmr.msra.gmra.mxu0 %v6366_v26  ;;  %4309 = vmatmul.mubr.f32.vlgmr.msra.gmra.mxu1 %v6366_v26 }
 0x30e   :  { %1689 = vmatpush1.msra.mxu0 %v5884_v53  ;;  %4312 = vmatpush3.msra.mxu1 %v6371_v28  ;;  %v1392_v53 = vadd.f32 1.0, %v4681_v44  ;;  %v6628_v44 = vld [vmem:[%s8110_s2 + $0x68] sm:$0xff] }
 0x30f   :  { %1690 = vmatprep.subr.mxu0 %v5889_v2  ;;  %4313 = vmatprep.subr.mxu1 %v8238_v61  ;;  %v1402_v2 = vadd.f32 %v5555_v11, %v1377_v35  ;;  %v8314_v11 = vld [vmem:[#allocation16_spill] sm:$0xff] }
 0x310   :  { %1691 = vmatpush1.msra.mxu0 %v5900_v9  ;;  %4314 = vmatpush3.msra.mxu1 %v5905_v4  ;;  %v3722_v4 = vld [vmem:[%s8114_s1 + $0x88] sm:$0xff]  ;;  %4684 = vrcp.f32 %v1392_v53  ;;  %v8326_v35 = vld [vmem:[#allocation28_spill] sm:$0xff] }
 0x311   :  { %1692 = vmatprep.subr.mxu0 %v5912_v62  ;;  %4315 = vmatprep.subr.mxu1 %v8238_v61  ;;  %v6634_v53 = vld [vmem:[%s8110_s2 + $0x60] sm:$0xff] }
 0x312   :  { %1693 = vmatpush1.msra.mxu0 %v5919_v5  ;;  %4316 = vmatpush3.msra.mxu1 %v5924_v57  ;;  %v8315_v57 = vld [vmem:[#allocation4_spill] sm:$0xff] }
 0x313   :  { %1694 = vmatprep.subr.mxu0 %v5931_v63  ;;  %4317 = vmatprep.subr.mxu1 %v8238_v61  ;;  %v8316_v63 = vld [vmem:[#allocation5_spill] sm:$0xff] }
 0x314   :  { %1695 = vmatpush1.msra.mxu0 %v5938_v8  ;;  %4318 = vmatpush3.msra.mxu1 %v5943_v59  ;;  %v8317_v8 = vld [vmem:[#allocation19_spill] sm:$0xff]  ;;  %v8318_v59 = vld [vmem:[#allocation6_spill] sm:$0xff] }
 0x315   :  { %1696 = vmatprep.subr.mxu0 %v5950_v10  ;;  %4319 = vmatprep.subr.mxu1 %v8238_v61  ;;  %v8319_v10 = vld [vmem:[#allocation7_spill] sm:$0xff] }
 0x316   :  { %1697 = vmatpush1.msra.mxu0 %v5957_v45  ;;  %4320 = vmatpush3.msra.mxu1 %v5962_v3  ;;  %v8320_v45 = vld [vmem:[#allocation22_spill] sm:$0xff]  ;;  %v8321_v3 = vld [vmem:[#allocation8_spill] sm:$0xff] }
 0x317   :  { %v4683_v9 = vpop.eup %4682  ;;  %1698 = vmatprep.subr.mxu0 %v5969_v31  ;;  %4321 = vmatprep.subr.mxu1 %v8238_v61  ;;  %v8322_v31 = vld [vmem:[#allocation9_spill] sm:$0xff] }
 0x318   :  { %v1403_v62 = vmul.f32 %v4683_v9, %v1402_v2  ;;  %1699 = vmatpush1.msra.mxu0 %v5976_v32  ;;  %4322 = vmatpush3.msra.mxu1 %v5981_v19  ;;  %v8323_v32 = vld [vmem:[#allocation25_spill] sm:$0xff]  ;;  %v8324_v19 = vld [vmem:[#allocation10_spill] sm:$0xff] }
 0x319   :  { %1700 = vmatprep.subr.mxu0 %v8314_v11  ;;  %4323 = vmatprep.subr.mxu1 %v8238_v61  ;;  %v6640_v2 = vld [vmem:[%s8110_s2 + $0x50] sm:$0xff]  ;;  %v6646_v9 = vld [vmem:[%s8110_s2 + $0x48] sm:$0xff]  ;;  %v6664_v11 = vld [vmem:[%s8110_s2 + $0x20] sm:$0xff] }
 0x31a   :  { %v1404_v5 = vadd.f32 %v3722_v4, %v1403_v62  ;;  %1701 = vmatpush1.msra.mxu0 %v8315_v57  ;;  %4324 = vmatpush3.msra.mxu1 %v8316_v63  ;;  %v6652_v4 = vld [vmem:[%s8110_s2 + $0x38] sm:$0xff]  ;;  %v6658_v62 = vld [vmem:[%s8110_s2 + $0x30] sm:$0xff]  ;;  %v6676_v57 = vld [vmem:[%s8110_s2 + $0x8] sm:$0xff] }
 0x31b   :  { %1702 = vmatprep.subr.mxu0 %v8317_v8  ;;  %4325 = vmatprep.subr.mxu1 %v8238_v61  ;;  %v6682_v63 = vld [vmem:[%s8110_s2] sm:$0xff]  ;;  %v6688_v8 = vld [vmem:[%s8111_s3 + $0x170] sm:$0xff] }
 0x31c   :  { %4686 = vtanh.f32 %v1404_v5  ;;  %1703 = vmatpush1.msra.mxu0 %v8318_v59  ;;  %4326 = vmatpush3.msra.mxu1 %v8319_v10  ;;  %v6670_v5 = vld [vmem:[%s8110_s2 + $0x18] sm:$0xff]  ;;  %v3728_v59 = vld [vmem:[%s8112_s0 + $0x48] sm:$0xff] }
 0x31d   :  { %1704 = vmatprep.subr.mxu0 %v8320_v45  ;;  %4327 = vmatprep.subr.mxu1 %v8238_v61  ;;  %v4685_v58 = vpop.eup %4684 }
 0x31e   :  { %1705 = vmatpush1.msra.mxu0 %v8321_v3  ;;  %4328 = vmatpush3.msra.mxu1 %v8322_v31  ;;  %v1406_v50 = vsub.f32 1.0, %v4685_v58  ;;  %v1408_v22 = vmul.f32 %v4685_v58, %v6184_v34  ;;  %v6508_v34 = vld [vmem:[%s8110_s2 + $0x158] sm:$0xff]  ;;  %v3734_v58 = vld [vmem:[%s8114_s1 + $0x60] sm:$0xff] }
 0x31f   :  { %1706 = vmatprep.subr.mxu0 %v8323_v32  ;;  %4329 = vmatprep.subr.mxu1 %v8238_v61 }
 0x320   :  { %1707 = vmatpush1.msra.mxu0 %v8324_v19  ;;  %4330 = vmatpush3.msra.mxu1 %v8325_v29  ;;  %v3729_v19 = vld [vmem:[%s8112_s0 + $0x50] sm:$0xff] }
 0x321   :  { %1708 = vmatprep.subr.mxu0 %v8326_v35  ;;  %4331 = vmatprep.subr.mxu1 %v8238_v61 }
 0x322   :  { %1709 = vmatpush1.msra.mxu0 %v8327_v40  ;;  %4332 = vmatpush3.msra.mxu1 %v8328_v54 }
 0x323   :  { %1710 = vmatprep.subr.mxu0 %v8329_v7  ;;  %4333 = vmatprep.subr.mxu1 %v8238_v61 }
 0x324   :  { %1711 = vmatpush1.msra.mxu0 %v8330_v37  ;;  %4334 = vmatpush3.msra.mxu1 %v8331_v56 }
 0x325   :  { %1712 = vmatprep.subr.mxu0 %v8332_v1  ;;  %4335 = vmatprep.subr.mxu1 %v8238_v61 }
 0x326   :  { %1713 = vmatpush1.msra.mxu0 %v8333_v13  ;;  %4336 = vmatpush3.msra.mxu1 %v8334_v48 }
 0x327   :  { %1714 = vmatprep.subr.mxu0 %v8335_v0  ;;  %4337 = vmatprep.subr.mxu1 %v8238_v61 }
 0x328   :  { %1715 = vmatpush1.msra.mxu0 %v8336_v60  ;;  %4338 = vmatpush3.msra.mxu1 %v8337_v15  ;;  %v3730_v60 = vld [vmem:[%s8112_s0 + $0x58] sm:$0xff] }
 0x329   :  { %v4687_v51 = vpop.eup %4686  ;;  %1716 = vmatprep.subr.mxu0 %v8338_v17  ;;  %4339 = vmatprep.subr.mxu1 %v8238_v61 }
 0x32a   :  { %1717 = vmatpush1.msra.mxu0 %v6151_v43  ;;  %4340 = vmatpush3.msra.mxu1 %v6156_v12  ;;  %v1407_v20 = vmul.f32 %v4687_v51, %v1406_v50  ;;  %v6502_v43 = vld [vmem:[%s8110_s2 + $0x168] sm:$0xff]  ;;  %v6526_v12 = vld [vmem:[%s8110_s2 + $0x138] sm:$0xff] }
 0x32b   :  { %1718 = vmatprep.subr.mxu0 %v6163_v41  ;;  %4341 = vmatprep.subr.mxu1 %v8238_v61  ;;  %v6520_v41 = vld [vmem:[%s8110_s2 + $0x140] sm:$0xff] }
 0x32c   :  { %1719 = vmatpush1.msra.mxu0 %v6170_v6  ;;  %1752 = vmatprep.mubr.f32.mxu0 %v8238_v61  ;;  %v6446_v25 = vadd.f32 %v1408_v22, %v1407_v20  ;;  %v6496_v6 = vld [vmem:[%s8110_s2 + $0x170] sm:$0xff]  ;;  %v3735_v22 = vld [vmem:[%s8114_s1 + $0x68] sm:$0xff] }
 0x32d   :  { %4342 = vmatpush3.msra.mxu1 %v6177_v38  ;;  %4343 = vmatprep.mubr.msk.f32.mxu1 %vm4789_vm0, %v8238_v61  ;;  %v6514_v38 = vld [vmem:[%s8110_s2 + $0x150] sm:$0xff] }
 0x32e   :  { %3727 = vst [vmem:[%s8117_s7 + $0x28] sm:$0xff] %v6446_v25  ;;  %1753 = vmatmul.mubr.f32.vlgmr.msra.gmra.mxu0 %v6446_v25  ;;  %4344 = vmatmul.mubr.f32.vlgmr.msra.gmra.mxu1 %v6446_v25 }
 0x32f   :  { %4346 = vmatprep.subr.mxu1 %v8238_v61  ;;  %1978 = vmatprep.mubr.f32.mxu0 %v8238_v61 }
 0x330   :  { %4347 = vmatpush3.msra.mxu1 %v6235_v47  ;;  %4378 = vmatprep.mubr.msk.f32.mxu1 %vm4789_vm0, %v8238_v61  ;;  %v6532_v47 = vld [vmem:[%s8110_s2 + $0x128] sm:$0xff] }
 0x331   :  { %4348 = vmatprep.subr.mxu1 %v8238_v61  ;;  %1914 = vmatprep.subr.mxu0 %v6496_v6 }
 0x332   :  { %4349 = vmatpush3.msra.mxu1 %v6242_v14  ;;  %1915 = vmatpush1.msra.mxu0 %v6502_v43  ;;  %v6538_v14 = vld [vmem:[%s8110_s2 + $0x120] sm:$0xff] }
 0x333   :  { %4350 = vmatprep.subr.mxu1 %v8238_v61  ;;  %1916 = vmatprep.subr.mxu0 %v6508_v34 }
 0x334   :  { %4351 = vmatpush3.msra.mxu1 %v6249_v16  ;;  %1917 = vmatpush1.msra.mxu0 %v6514_v38  ;;  %v6544_v16 = vld [vmem:[%s8110_s2 + $0x110] sm:$0xff] }
 0x335   :  { %4352 = vmatprep.subr.mxu1 %v8238_v61  ;;  %1918 = vmatprep.subr.mxu0 %v6520_v41 }
 0x336   :  { %4353 = vmatpush3.msra.mxu1 %v6256_v18  ;;  %1919 = vmatpush1.msra.mxu0 %v6526_v12  ;;  %v6550_v18 = vld [vmem:[%s8110_s2 + $0x108] sm:$0xff] }
 0x337   :  { %4354 = vmatprep.subr.mxu1 %v8238_v61  ;;  %1920 = vmatprep.subr.mxu0 %v6532_v47 }
 0x338   :  { %4355 = vmatpush3.msra.mxu1 %v6263_v21  ;;  %1921 = vmatpush1.msra.mxu0 %v6538_v14  ;;  %v6556_v21 = vld [vmem:[%s8110_s2 + $0xf8] sm:$0xff] }
 0x339   :  { %4356 = vmatprep.subr.mxu1 %v8238_v61  ;;  %1922 = vmatprep.subr.mxu0 %v6544_v16 }
 0x33a   :  { %4357 = vmatpush3.msra.mxu1 %v6270_v24  ;;  %1923 = vmatpush1.msra.mxu0 %v6550_v18  ;;  %v6562_v24 = vld [vmem:[%s8110_s2 + $0xf0] sm:$0xff] }
 0x33b   :  { %4358 = vmatprep.subr.mxu1 %v8238_v61  ;;  %1924 = vmatprep.subr.mxu0 %v6556_v21 }
 0x33c   :  { %4359 = vmatpush3.msra.mxu1 %v6277_v27  ;;  %1925 = vmatpush1.msra.mxu0 %v6562_v24  ;;  %v6568_v27 = vld [vmem:[%s8110_s2 + $0xe0] sm:$0xff] }
 0x33d   :  { %4360 = vmatprep.subr.mxu1 %v8238_v61  ;;  %1926 = vmatprep.subr.mxu0 %v6568_v27 }
 0x33e   :  { %4361 = vmatpush3.msra.mxu1 %v6284_v30  ;;  %v6574_v30 = vld [vmem:[%s8110_s2 + $0xd8] sm:$0xff] }
 0x33f   :  { %4362 = vmatprep.subr.mxu1 %v8238_v61  ;;  %1927 = vmatpush1.msra.mxu0 %v6574_v30 }
 0x340   :  { %4363 = vmatpush3.msra.mxu1 %v6291_v33  ;;  %v6580_v33 = vld [vmem:[%s8110_s2 + $0xc8] sm:$0xff] }
 0x341   :  { %4364 = vmatprep.subr.mxu1 %v8238_v61  ;;  %1928 = vmatprep.subr.mxu0 %v6580_v33 }
 0x342   :  { %4365 = vmatpush3.msra.mxu1 %v6298_v36  ;;  %v6586_v36 = vld [vmem:[%s8110_s2 + $0xc0] sm:$0xff] }
 0x343   :  { %4366 = vmatprep.subr.mxu1 %v8238_v61  ;;  %1929 = vmatpush1.msra.mxu0 %v6586_v36 }
 0x344   :  { %4367 = vmatpush3.msra.mxu1 %v6305_v39  ;;  %v6592_v39 = vld [vmem:[%s8110_s2 + $0xb0] sm:$0xff] }
 0x345   :  { %4368 = vmatprep.subr.mxu1 %v8238_v61  ;;  %1930 = vmatprep.subr.mxu0 %v6592_v39 }
 0x346   :  { %4369 = vmatpush3.msra.mxu1 %v6312_v42  ;;  %v6598_v42 = vld [vmem:[%s8110_s2 + $0xa8] sm:$0xff] }
 0x347   :  { %4370 = vmatprep.subr.mxu1 %v8238_v61  ;;  %1931 = vmatpush1.msra.mxu0 %v6598_v42 }
 0x348   :  { %4371 = vmatpush3.msra.mxu1 %v6319_v46  ;;  %v6604_v46 = vld [vmem:[%s8110_s2 + $0x98] sm:$0xff] }
 0x349   :  { %4372 = vmatprep.subr.mxu1 %v8238_v61  ;;  %1932 = vmatprep.subr.mxu0 %v6604_v46 }
 0x34a   :  { %4373 = vmatpush3.msra.mxu1 %v6326_v49  ;;  %v6610_v49 = vld [vmem:[%s8110_s2 + $0x90] sm:$0xff] }
 0x34b   :  { %4374 = vmatprep.subr.mxu1 %v8238_v61  ;;  %1933 = vmatpush1.msra.mxu0 %v6610_v49 }
 0x34c   :  { %4375 = vmatpush3.msra.mxu1 %v6333_v52  ;;  %v6616_v52 = vld [vmem:[%s8110_s2 + $0x80] sm:$0xff] }
 0x34d   :  { %4376 = vmatprep.subr.mxu1 %v8238_v61  ;;  %1934 = vmatprep.subr.mxu0 %v6616_v52 }
 0x34e   :  { %4377 = vmatpush3.msra.mxu1 %v6340_v55  ;;  %v6622_v55 = vld [vmem:[%s8110_s2 + $0x78] sm:$0xff] }
 0x34f   :  { %4381 = vmatprep.subr.mxu1 %v8238_v61  ;;  %1935 = vmatpush1.msra.mxu0 %v6622_v55 }
 0x350   :  { %1936 = vmatprep.subr.mxu0 %v6628_v44 }
 0x351   :  { %1937 = vmatpush1.msra.mxu0 %v6634_v53 }
 0x352   :  { %1938 = vmatprep.subr.mxu0 %v6640_v2 }
 0x353   :  { %1939 = vmatpush1.msra.mxu0 %v6646_v9 }
 0x354   :  { %1940 = vmatprep.subr.mxu0 %v6652_v4 }
 0x355   :  { %1941 = vmatpush1.msra.mxu0 %v6658_v62 }
 0x356   :  { %1942 = vmatprep.subr.mxu0 %v6664_v11 }
 0x357   :  { %1943 = vmatpush1.msra.mxu0 %v6670_v5 }
 0x358   :  { %1944 = vmatprep.subr.mxu0 %v6676_v57 }
 0x359   :  { %1945 = vmatpush1.msra.mxu0 %v6682_v63 }
 0x35a   :  { %2136 = vmatprep.subr.mxu0 %v6688_v8 }
 0x3cd   :  { %v1532_v10 = vpop.f32.mrf.mxu0  ;;  %v1603_v45 = vpop.f32.mrf.mxu1 }
 0x3ce   :  { %v1607_v3 = vadd.f32 %v3728_v59, %v1532_v10  ;;  %v1628_v1 = vadd.f32 %v6353_v23, %v1603_v45 }
 0x3cf   :  { %v4310_v31 = vpop.f32.mrf.mxu1  ;;  %v1534_v29 = vpop.f32.mrf.mxu0 }
 0x3d0   :  { %v3731_v32 = vmul.f32 -1.442695, %v1607_v3  ;;  %v1614_v35 = vadd.f32 %v3729_v19, %v1534_v29 }
 0x3d2   :  { %4688 = vpow2.f32 %v3731_v32  ;;  %v3732_v40 = vmul.f32 -1.442695, %v1614_v35 }
 0x3d4   :  { %4690 = vpow2.f32 %v3732_v40 }
 0x3df   :  { %v4689_v54 = vpop.eup %4688 }
 0x3e0   :  { %v1611_v7 = vadd.f32 1.0, %v4689_v54  ;;  %v6715_v54 = vld [vmem:[%s8111_s3 + $0x168] sm:$0xff] }
 0x3e1   :  { %v4691_v37 = vpop.eup %4690 }
 0x3e2   :  { %4692 = vrcp.f32 %v1611_v7  ;;  %v1618_v56 = vadd.f32 1.0, %v4691_v37  ;;  %v6720_v7 = vld [vmem:[%s8111_s3 + $0x158] sm:$0xff]  ;;  %v6736_v37 = vld [vmem:[%s8111_s3 + $0x160] sm:$0xff] }
 0x3e4   :  { %4694 = vrcp.f32 %v1618_v56  ;;  %v6743_v56 = vld [vmem:[%s8111_s3 + $0x140] sm:$0xff] }
 0x3ee   :  { %v1754_v13 = vpop.f32.mrf.mxu0  ;;  %v6701_v48 = vpop.f32.mrf.mxu1 }
 0x3ef   :  { %v4693_v0 = vpop.eup %4692  ;;  %v1829_v15 = vadd.f32 %v3734_v58, %v1754_v13  ;;  %v6750_v58 = vld [vmem:[%s8111_s3 + $0x138] sm:$0xff] }
 0x3f0   :  { %v1629_v50 = vmul.f32 %v4693_v0, %v1628_v1  ;;  %v4345_v51 = vpop.f32.mrf.mxu1  ;;  %v1756_v59 = vpop.f32.mrf.mxu0  ;;  %v6755_v1 = vld [vmem:[%s8111_s3 + $0x148] sm:$0xff]  ;;  %v6769_v0 = vld [vmem:[%s8111_s3 + $0x120] sm:$0xff] }
 0x3f1   :  { %v3737_v17 = vmul.f32 -1.442695, %v1829_v15  ;;  %v1836_v23 = vadd.f32 %v3735_v22, %v1756_v59  ;;  %v4695_v45 = vpop.eup %4694  ;;  %v6781_v15 = vld [vmem:[%s8111_s3 + $0x110] sm:$0xff]  ;;  %v6793_v51 = vld [vmem:[%s8111_s3 + $0x108] sm:$0xff]  ;;  %v6805_v22 = vld [vmem:[%s8111_s3 + $0xf8] sm:$0xff] }
 0x3f2   :  { %v1630_v20 = vadd.f32 %v3730_v60, %v1629_v50  ;;  %v1632_v31 = vsub.f32 1.0, %v4695_v45  ;;  %v1634_v35 = vmul.f32 %v4695_v45, %v6366_v26  ;;  %v6731_v26 = vld [vmem:[%s8111_s3 + $0x150] sm:$0xff]  ;;  %v6786_v50 = vld [vmem:[%s8116_s5] ss:$0 sm:$0xff] }
 0x3f3   :  { %4696 = vpow2.f32 %v3737_v17  ;;  %v3738_v10 = vmul.f32 -1.442695, %v1836_v23  ;;  %v6774_v60 = vld [vmem:[%s8111_s3 + $0x130] sm:$0xff]  ;;  %v6798_v17 = vld [vmem:[%s8111_s3 + $0x118] sm:$0xff]  ;;  %v6817_v23 = vld [vmem:[%s8111_s3 + $0x100] sm:$0xff] }
 0x3f4   :  { %4698 = vtanh.f32 %v1630_v20  ;;  %v6812_v59 = vld [vmem:[%s8111_s3 + $0xf0] sm:$0xff]  ;;  %v6826_v45 = vld [vmem:[%s8111_s3 + $0xe0] sm:$0xff] }
 0x3f5   :  { %4700 = vpow2.f32 %v3738_v10  ;;  %v1850_v10 = vadd.f32 %v6786_v50, %v6701_v48  ;;  %8339 = vst [vmem:[#allocation29_spill] sm:$0xff] %v6826_v45  ;;  %v6836_v48 = vld [vmem:[%s8111_s3 + $0xd8] sm:$0xff] }
 0x3f6   :  { %8340 = vst [vmem:[#allocation30_spill] sm:$0xff] %v6836_v48 }
 0x400   :  { %v4697_v3 = vpop.eup %4696 }
 0x401   :  { %v4699_v32 = vpop.eup %4698  ;;  %v1833_v19 = vadd.f32 1.0, %v4697_v3 }
 0x402   :  { %v1633_v29 = vmul.f32 %v4699_v32, %v1632_v31  ;;  %v4701_v13 = vpop.eup %4700  ;;  %v3736_v31 = vld [vmem:[%s8114_s1 + $0x70] sm:$0xff]  ;;  %v6841_v32 = vld [vmem:[%s8111_s3 + $0xe8] sm:$0xff] }
 0x403   :  { %4702 = vrcp.f32 %v1833_v19  ;;  %v1840_v20 = vadd.f32 1.0, %v4701_v13  ;;  %8341 = vst [vmem:[#allocation31_spill] sm:$0xff] %v6841_v32  ;;  %v6860_v13 = vld [vmem:[%s8111_s3 + $0xd0] sm:$0xff] }
 0x404   :  { %v6710_v40 = vadd.f32 %v1634_v35, %v1633_v29  ;;  %v6848_v29 = vld [vmem:[%s8111_s3 + $0xc8] sm:$0xff]  ;;  %v6855_v35 = vld [vmem:[%s8111_s3 + $0xc0] sm:$0xff]  ;;  %8344 = vst [vmem:[#allocation34_spill] sm:$0xff] %v6860_v13 }
 0x405   :  { %4704 = vrcp.f32 %v1840_v20  ;;  %8342 = vst [vmem:[#allocation32_spill] sm:$0xff] %v6848_v29  ;;  %8343 = vst [vmem:[#allocation33_spill] sm:$0xff] %v6855_v35 }
 0x406   :  { %3740 = vst [vmem:[%s8115_s6 + $0x18] sm:$0xff] %v6710_v40  ;;  %1979 = vmatmul.mubr.f32.vlgmr.msra.gmra.mxu0 %v6710_v40  ;;  %4379 = vmatmul.mubr.f32.vlgmr.msra.gmra.mxu1 %v6710_v40 }
 0x407   :  { %2137 = vmatpush1.msra.mxu0 %v6715_v54  ;;  %4382 = vmatpush3.msra.mxu1 %v6371_v28  ;;  %v6762_v28 = vld [vmem:[%s8111_s3 + $0x128] sm:$0xff] }
 0x408   :  { %2138 = vmatprep.subr.mxu0 %v6720_v7  ;;  %4383 = vmatprep.subr.mxu1 %v8238_v61 }
 0x409   :  { %2139 = vmatpush1.msra.mxu0 %v6731_v26  ;;  %4384 = vmatpush3.msra.mxu1 %v6736_v37 }
 0x40a   :  { %2140 = vmatprep.subr.mxu0 %v6743_v56  ;;  %4385 = vmatprep.subr.mxu1 %v8238_v61 }
 0x40b   :  { %2141 = vmatpush1.msra.mxu0 %v6750_v58  ;;  %4386 = vmatpush3.msra.mxu1 %v6755_v1 }
 0x40c   :  { %2142 = vmatprep.subr.mxu0 %v6762_v28  ;;  %4387 = vmatprep.subr.mxu1 %v8238_v61 }
 0x40d   :  { %2143 = vmatpush1.msra.mxu0 %v6769_v0  ;;  %4388 = vmatpush3.msra.mxu1 %v6774_v60 }
 0x40e   :  { %2144 = vmatprep.subr.mxu0 %v6781_v15  ;;  %4389 = vmatprep.subr.mxu1 %v8238_v61 }
 0x40f   :  { %2145 = vmatpush1.msra.mxu0 %v6793_v51  ;;  %4390 = vmatpush3.msra.mxu1 %v6798_v17 }
 0x410   :  { %v4703_v3 = vpop.eup %4702  ;;  %2146 = vmatprep.subr.mxu0 %v6805_v22  ;;  %4391 = vmatprep.subr.mxu1 %v8238_v61 }
 0x411   :  { %v1851_v19 = vmul.f32 %v4703_v3, %v1850_v10  ;;  %2147 = vmatpush1.msra.mxu0 %v6812_v59  ;;  %4392 = vmatpush3.msra.mxu1 %v6817_v23  ;;  %v6867_v10 = vld [vmem:[%s8111_s3 + $0xb0] sm:$0xff]  ;;  %v6874_v3 = vld [vmem:[%s8111_s3 + $0xa8] sm:$0xff] }
 0x412   :  { %2148 = vmatprep.subr.mxu0 %v6826_v45  ;;  %4393 = vmatprep.subr.mxu1 %v8238_v61  ;;  %8345 = vst [vmem:[#allocation16_spill] sm:$0xff] %v6867_v10  ;;  %8346 = vst [vmem:[#allocation4_spill] sm:$0xff] %v6874_v3 }
 0x413   :  { %v1852_v20 = vadd.f32 %v3736_v31, %v1851_v19  ;;  %2149 = vmatpush1.msra.mxu0 %v6836_v48  ;;  %4394 = vmatpush3.msra.mxu1 %v6841_v32  ;;  %v6879_v31 = vld [vmem:[%s8111_s3 + $0xb8] sm:$0xff]  ;;  %v7007_v48 = vld [vmem:[%s8111_s3] sm:$0xff] }
 0x414   :  { %2150 = vmatprep.subr.mxu0 %v6848_v29  ;;  %4395 = vmatprep.subr.mxu1 %v8238_v61  ;;  %8347 = vst [vmem:[#allocation5_spill] sm:$0xff] %v6879_v31  ;;  %v6886_v19 = vld [vmem:[%s8111_s3 + $0x98] sm:$0xff]  ;;  %v6893_v29 = vld [vmem:[%s8111_s3 + $0x90] sm:$0xff] }
 0x415   :  { %4706 = vtanh.f32 %v1852_v20  ;;  %2151 = vmatpush1.msra.mxu0 %v6855_v35  ;;  %4396 = vmatpush3.msra.mxu1 %v6860_v13  ;;  %8348 = vst [vmem:[#allocation19_spill] sm:$0xff] %v6886_v19  ;;  %8349 = vst [vmem:[#allocation6_spill] sm:$0xff] %v6893_v29  ;;  %v6898_v20 = vld [vmem:[%s8111_s3 + $0xa0] sm:$0xff]  ;;  %v6912_v13 = vld [vmem:[%s8111_s3 + $0x78] sm:$0xff] }
 0x416   :  { %2152 = vmatprep.subr.mxu0 %v6867_v10  ;;  %4397 = vmatprep.subr.mxu1 %v8238_v61  ;;  %8350 = vst [vmem:[#allocation7_spill] sm:$0xff] %v6898_v20  ;;  %v6905_v10 = vld [vmem:[%s8111_s3 + $0x80] sm:$0xff]  ;;  %8352 = vst [vmem:[#allocation8_spill] sm:$0xff] %v6912_v13  ;;  %v6969_v35 = vld [vmem:[%s8111_s3 + $0x30] sm:$0xff] }
 0x417   :  { %2153 = vmatpush1.msra.mxu0 %v6874_v3  ;;  %4398 = vmatpush3.msra.mxu1 %v6879_v31  ;;  %8351 = vst [vmem:[#allocation22_spill] sm:$0xff] %v6905_v10  ;;  %v6917_v3 = vld [vmem:[%s8111_s3 + $0x88] sm:$0xff]  ;;  %v6931_v31 = vld [vmem:[%s8111_s3 + $0x60] sm:$0xff]  ;;  %8361 = vst [vmem:[#allocation15_spill] sm:$0xff] %v6969_v35 }
 0x418   :  { %2154 = vmatprep.subr.mxu0 %v6886_v19  ;;  %4399 = vmatprep.subr.mxu1 %v8238_v61  ;;  %8353 = vst [vmem:[#allocation9_spill] sm:$0xff] %v6917_v3  ;;  %v6924_v19 = vld [vmem:[%s8111_s3 + $0x68] sm:$0xff]  ;;  %8355 = vst [vmem:[#allocation10_spill] sm:$0xff] %v6931_v31 }
 0x419   :  { %2155 = vmatpush1.msra.mxu0 %v6893_v29  ;;  %4400 = vmatpush3.msra.mxu1 %v6898_v20  ;;  %8354 = vst [vmem:[#allocation25_spill] sm:$0xff] %v6924_v19  ;;  %v6936_v29 = vld [vmem:[%s8111_s3 + $0x70] sm:$0xff]  ;;  %v6950_v20 = vld [vmem:[%s8111_s3 + $0x48] sm:$0xff] }
 0x41a   :  { %2156 = vmatprep.subr.mxu0 %v6905_v10  ;;  %4401 = vmatprep.subr.mxu1 %v8238_v61  ;;  %8356 = vst [vmem:[#allocation11_spill] sm:$0xff] %v6936_v29  ;;  %v6943_v10 = vld [vmem:[%s8111_s3 + $0x50] sm:$0xff]  ;;  %8358 = vst [vmem:[#allocation12_spill] sm:$0xff] %v6950_v20 }
 0x41b   :  { %2157 = vmatpush1.msra.mxu0 %v6912_v13  ;;  %4402 = vmatpush3.msra.mxu1 %v6917_v3  ;;  %8357 = vst [vmem:[#allocation28_spill] sm:$0xff] %v6943_v10  ;;  %v6955_v13 = vld [vmem:[%s8111_s3 + $0x58] sm:$0xff]  ;;  %v4705_v3 = vpop.eup %4704 }
 0x41c   :  { %2158 = vmatprep.subr.mxu0 %v6924_v19  ;;  %4403 = vmatprep.subr.mxu1 %v8238_v61  ;;  %8359 = vst [vmem:[#allocation13_spill] sm:$0xff] %v6955_v13  ;;  %v6962_v19 = vld [vmem:[%s8111_s3 + $0x38] sm:$0xff]  ;;  %v1856_v45 = vmul.f32 %v4705_v3, %v6446_v25 }
 0x41d   :  { %2159 = vmatpush1.msra.mxu0 %v6931_v31  ;;  %4404 = vmatpush3.msra.mxu1 %v6936_v29  ;;  %8360 = vst [vmem:[#allocation14_spill] sm:$0xff] %v6962_v19  ;;  %v6974_v31 = vld [vmem:[%s8111_s3 + $0x40] sm:$0xff]  ;;  %v6988_v29 = vld [vmem:[%s8111_s3 + $0x18] sm:$0xff] }
 0x41e   :  { %2160 = vmatprep.subr.mxu0 %v6943_v10  ;;  %4405 = vmatprep.subr.mxu1 %v8238_v61  ;;  %8362 = vst [vmem:[#allocation17_spill] sm:$0xff] %v6974_v31  ;;  %v6981_v10 = vld [vmem:[%s8111_s3 + $0x20] sm:$0xff]  ;;  %v7072_v25 = vld [vmem:[%s8110_s2 + $0x178] sm:$0xff] }
 0x41f   :  { %2161 = vmatpush1.msra.mxu0 %v6950_v20  ;;  %4406 = vmatpush3.msra.mxu1 %v6955_v13  ;;  %8363 = vst [vmem:[#allocation18_spill] sm:$0xff] %v6981_v10  ;;  %v6993_v20 = vld [vmem:[%s8111_s3 + $0x28] sm:$0xff]  ;;  %v1854_v13 = vsub.f32 1.0, %v4705_v3 }
 0x420   :  { %2162 = vmatprep.subr.mxu0 %v6962_v19  ;;  %4407 = vmatprep.subr.mxu1 %v8238_v61  ;;  %v7000_v19 = vld [vmem:[%s8111_s3 + $0x8] sm:$0xff] }
 0x421   :  { %2163 = vmatpush1.msra.mxu0 %v6969_v35  ;;  %4408 = vmatpush3.msra.mxu1 %v6974_v31  ;;  %v7014_v31 = vld [vmem:[%s8111_s3 + $0x10] sm:$0xff] }
 0x422   :  { %v4707_v32 = vpop.eup %4706  ;;  %2164 = vmatprep.subr.mxu0 %v6981_v10  ;;  %4409 = vmatprep.subr.mxu1 %v8238_v61 }
 0x423   :  { %2165 = vmatpush1.msra.mxu0 %v6988_v29  ;;  %4410 = vmatpush3.msra.mxu1 %v6993_v20  ;;  %v1855_v35 = vmul.f32 %v4707_v32, %v1854_v13 }
 0x424   :  { %2166 = vmatprep.subr.mxu0 %v7000_v19  ;;  %4411 = vmatprep.subr.mxu1 %v8238_v61 }
 0x425   :  { %2167 = vmatpush1.msra.mxu0 %v7007_v48  ;;  %2200 = vmatprep.mubr.f32.mxu0 %v8238_v61  ;;  %v7021_v10 = vadd.f32 %v1856_v45, %v1855_v35  ;;  %v3744_v35 = vld [vmem:[%s8112_s0 + $0x70] sm:$0xff] }
 0x426   :  { %4412 = vmatpush3.msra.mxu1 %v7014_v31  ;;  %4413 = vmatprep.mubr.msk.f32.mxu1 %vm4789_vm0, %v8238_v61 }
 0x427   :  { %3741 = vst [vmem:[%s8117_s7 + $0x20] sm:$0xff] %v7021_v10  ;;  %2201 = vmatmul.mubr.f32.vlgmr.msra.gmra.mxu0 %v7021_v10  ;;  %4414 = vmatmul.mubr.f32.vlgmr.msra.gmra.mxu1 %v7021_v10 }
 0x428   :  { %2362 = vmatprep.subr.mxu0 %v6496_v6  ;;  %4416 = vmatprep.subr.mxu1 %v8238_v61  ;;  %v7079_v6 = vld [vmem:[%s8110_s2 + $0x160] sm:$0xff] }
 0x429   :  { %2363 = vmatpush1.msra.mxu0 %v6502_v43  ;;  %2426 = vmatprep.mubr.f32.mxu0 %v8238_v61  ;;  %v7086_v43 = vld [vmem:[%s8110_s2 + $0x148] sm:$0xff] }
 0x42a   :  { %2364 = vmatprep.subr.mxu0 %v6508_v34  ;;  %4448 = vmatprep.mubr.msk.f32.mxu1 %vm4789_vm0, %v8238_v61  ;;  %v7093_v34 = vld [vmem:[%s8110_s2 + $0x130] sm:$0xff] }
 0x42b   :  { %2365 = vmatpush1.msra.mxu0 %v6514_v38  ;;  %4417 = vmatpush3.msra.mxu1 %v7072_v25  ;;  %v7100_v38 = vld [vmem:[%s8110_s2 + $0x118] sm:$0xff] }
 0x42c   :  { %2366 = vmatprep.subr.mxu0 %v6520_v41  ;;  %4418 = vmatprep.subr.mxu1 %v8238_v61  ;;  %v7107_v41 = vld [vmem:[%s8110_s2 + $0x100] sm:$0xff] }
 0x42d   :  { %2367 = vmatpush1.msra.mxu0 %v6526_v12  ;;  %4419 = vmatpush3.msra.mxu1 %v7079_v6  ;;  %v7114_v12 = vld [vmem:[%s8110_s2 + $0xe8] sm:$0xff] }
 0x42e   :  { %2368 = vmatprep.subr.mxu0 %v6532_v47  ;;  %4420 = vmatprep.subr.mxu1 %v8238_v61  ;;  %v7121_v47 = vld [vmem:[%s8110_s2 + $0xd0] sm:$0xff] }
 0x42f   :  { %2369 = vmatpush1.msra.mxu0 %v6538_v14  ;;  %4421 = vmatpush3.msra.mxu1 %v7086_v43  ;;  %v7128_v14 = vld [vmem:[%s8110_s2 + $0xb8] sm:$0xff] }
 0x430   :  { %2370 = vmatprep.subr.mxu0 %v6544_v16  ;;  %4422 = vmatprep.subr.mxu1 %v8238_v61  ;;  %v7135_v16 = vld [vmem:[%s8110_s2 + $0xa0] sm:$0xff] }
 0x431   :  { %2371 = vmatpush1.msra.mxu0 %v6550_v18  ;;  %4423 = vmatpush3.msra.mxu1 %v7093_v34  ;;  %v7142_v18 = vld [vmem:[%s8110_s2 + $0x88] sm:$0xff] }
 0x432   :  { %2372 = vmatprep.subr.mxu0 %v6556_v21  ;;  %4424 = vmatprep.subr.mxu1 %v8238_v61  ;;  %v7149_v21 = vld [vmem:[%s8110_s2 + $0x70] sm:$0xff] }
 0x433   :  { %2373 = vmatpush1.msra.mxu0 %v6562_v24  ;;  %4425 = vmatpush3.msra.mxu1 %v7100_v38  ;;  %v7156_v24 = vld [vmem:[%s8110_s2 + $0x58] sm:$0xff] }
 0x434   :  { %2374 = vmatprep.subr.mxu0 %v6568_v27  ;;  %4426 = vmatprep.subr.mxu1 %v8238_v61  ;;  %v7163_v27 = vld [vmem:[%s8110_s2 + $0x40] sm:$0xff] }
 0x435   :  { %2375 = vmatpush1.msra.mxu0 %v6574_v30  ;;  %4427 = vmatpush3.msra.mxu1 %v7107_v41  ;;  %v7170_v30 = vld [vmem:[%s8110_s2 + $0x28] sm:$0xff] }
 0x436   :  { %2376 = vmatprep.subr.mxu0 %v6580_v33  ;;  %4428 = vmatprep.subr.mxu1 %v8238_v61  ;;  %v7177_v33 = vld [vmem:[%s8110_s2 + $0x10] sm:$0xff] }
 0x437   :  { %2377 = vmatpush1.msra.mxu0 %v6586_v36  ;;  %4429 = vmatpush3.msra.mxu1 %v7114_v12  ;;  %v3742_v36 = vld [vmem:[%s8112_s0 + $0x60] sm:$0xff] }
 0x438   :  { %2378 = vmatprep.subr.mxu0 %v6592_v39  ;;  %4430 = vmatprep.subr.mxu1 %v8238_v61 }
 0x439   :  { %2379 = vmatpush1.msra.mxu0 %v6598_v42  ;;  %4431 = vmatpush3.msra.mxu1 %v7121_v47 }
 0x43a   :  { %2380 = vmatprep.subr.mxu0 %v6604_v46  ;;  %4432 = vmatprep.subr.mxu1 %v8238_v61 }
 0x43b   :  { %2381 = vmatpush1.msra.mxu0 %v6610_v49  ;;  %4433 = vmatpush3.msra.mxu1 %v7128_v14 }
 0x43c   :  { %2382 = vmatprep.subr.mxu0 %v6616_v52  ;;  %4434 = vmatprep.subr.mxu1 %v8238_v61 }
 0x43d   :  { %2383 = vmatpush1.msra.mxu0 %v6622_v55  ;;  %4435 = vmatpush3.msra.mxu1 %v7135_v16  ;;  %v3743_v55 = vld [vmem:[%s8112_s0 + $0x68] sm:$0xff] }
 0x43e   :  { %2384 = vmatprep.subr.mxu0 %v6628_v44  ;;  %4436 = vmatprep.subr.mxu1 %v8238_v61 }
 0x43f   :  { %2385 = vmatpush1.msra.mxu0 %v6634_v53  ;;  %4437 = vmatpush3.msra.mxu1 %v7142_v18 }
 0x440   :  { %2386 = vmatprep.subr.mxu0 %v6640_v2  ;;  %4438 = vmatprep.subr.mxu1 %v8238_v61 }
 0x441   :  { %2387 = vmatpush1.msra.mxu0 %v6646_v9  ;;  %4439 = vmatpush3.msra.mxu1 %v7149_v21 }
 0x442   :  { %2388 = vmatprep.subr.mxu0 %v6652_v4  ;;  %4440 = vmatprep.subr.mxu1 %v8238_v61 }
 0x443   :  { %2389 = vmatpush1.msra.mxu0 %v6658_v62  ;;  %4441 = vmatpush3.msra.mxu1 %v7156_v24 }
 0x444   :  { %2390 = vmatprep.subr.mxu0 %v6664_v11  ;;  %4442 = vmatprep.subr.mxu1 %v8238_v61  ;;  %v7190_v11 = vld [vmem:[%s8113_s4] ss:$0 sm:$0xff] }
 0x445   :  { %2391 = vmatpush1.msra.mxu0 %v6670_v5  ;;  %4443 = vmatpush3.msra.mxu1 %v7163_v27 }
 0x446   :  { %2392 = vmatprep.subr.mxu0 %v6676_v57  ;;  %4444 = vmatprep.subr.mxu1 %v8238_v61  ;;  %v3748_v57 = vld [vmem:[%s8114_s1 + $0x48] sm:$0xff] }
 0x447   :  { %2393 = vmatpush1.msra.mxu0 %v6682_v63  ;;  %4445 = vmatpush3.msra.mxu1 %v7170_v30 }
 0x448   :  { %2584 = vmatprep.subr.mxu0 %v6688_v8  ;;  %4446 = vmatprep.subr.mxu1 %v8238_v61 }
 0x449   :  { %4447 = vmatpush3.msra.mxu1 %v7177_v33 }
 0x44a   :  { %4451 = vmatprep.subr.mxu1 %v8238_v61 }
 0x4c6   :  { %v1980_v39 = vpop.f32.mrf.mxu0  ;;  %v2051_v42 = vpop.f32.mrf.mxu1 }
 0x4c7   :  { %v2055_v46 = vadd.f32 %v3742_v36, %v1980_v39  ;;  %v2076_v63 = vadd.f32 %v7190_v11, %v2051_v42 }
 0x4c8   :  { %v4380_v49 = vpop.f32.mrf.mxu1  ;;  %v1982_v44 = vpop.f32.mrf.mxu0 }
 0x4c9   :  { %v3745_v52 = vmul.f32 -1.442695, %v2055_v46  ;;  %v2062_v53 = vadd.f32 %v3743_v55, %v1982_v44  ;;  %v3749_v49 = vld [vmem:[%s8114_s1 + $0x50] sm:$0xff] }
 0x4cb   :  { %4708 = vpow2.f32 %v3745_v52  ;;  %v3746_v2 = vmul.f32 -1.442695, %v2062_v53 }
 0x4cd   :  { %4710 = vpow2.f32 %v3746_v2 }
 0x4d8   :  { %v4709_v9 = vpop.eup %4708 }
 0x4d9   :  { %v2059_v4 = vadd.f32 1.0, %v4709_v9 }
 0x4da   :  { %v4711_v62 = vpop.eup %4710 }
 0x4db   :  { %4712 = vrcp.f32 %v2059_v4  ;;  %v2066_v5 = vadd.f32 1.0, %v4711_v62 }
 0x4dd   :  { %4714 = vrcp.f32 %v2066_v5 }
 0x4e7   :  { %v2202_v8 = vpop.f32.mrf.mxu0  ;;  %v2273_v45 = vpop.f32.mrf.mxu1 }
 0x4e8   :  { %v4713_v32 = vpop.eup %4712  ;;  %v2277_v13 = vadd.f32 %v3748_v57, %v2202_v8  ;;  %v8375_v8 = vld [vmem:[#allocation7_spill] sm:$0xff] }
 0x4e9   :  { %v2077_v3 = vmul.f32 %v4713_v32, %v2076_v63  ;;  %v4415_v36 = vpop.f32.mrf.mxu1  ;;  %v2204_v52 = vpop.f32.mrf.mxu0  ;;  %v7208_v63 = vld [vmem:[%s8111_s3 + $0x178] sm:$0xff]  ;;  %v8377_v32 = vld [vmem:[#allocation8_spill] sm:$0xff] }
 0x4ea   :  { %v3751_v39 = vmul.f32 -1.442695, %v2277_v13  ;;  %v2284_v42 = vadd.f32 %v3749_v49, %v2204_v52  ;;  %v4715_v44 = vpop.eup %4714  ;;  %v8379_v13 = vld [vmem:[#allocation25_spill] sm:$0xff]  ;;  %v8381_v36 = vld [vmem:[#allocation11_spill] sm:$0xff]  ;;  %v8383_v49 = vld [vmem:[#allocation12_spill] sm:$0xff] }
 0x4eb   :  { %v2078_v46 = vadd.f32 %v3744_v35, %v2077_v3  ;;  %v2080_v2 = vsub.f32 1.0, %v4715_v44  ;;  %v2082_v5 = vmul.f32 %v4715_v44, %v6710_v40  ;;  %v8378_v35 = vld [vmem:[#allocation9_spill] sm:$0xff]  ;;  %v8380_v3 = vld [vmem:[#allocation10_spill] sm:$0xff] }
 0x4ec   :  { %4716 = vpow2.f32 %v3751_v39  ;;  %v3752_v55 = vmul.f32 -1.442695, %v2284_v42  ;;  %v8384_v52 = vld [vmem:[#allocation13_spill] sm:$0xff]  ;;  %v8385_v42 = vld [vmem:[#allocation14_spill] sm:$0xff] }
 0x4ed   :  { %4718 = vtanh.f32 %v2078_v46  ;;  %v8382_v46 = vld [vmem:[#allocation28_spill] sm:$0xff]  ;;  %v8387_v44 = vld [vmem:[#allocation17_spill] sm:$0xff] }
 0x4ee   :  { %4720 = vpow2.f32 %v3752_v55  ;;  %v8386_v55 = vld [vmem:[#allocation15_spill] sm:$0xff] }
 0x4f9   :  { %v4717_v53 = vpop.eup %4716 }
 0x4fa   :  { %v4719_v9 = vpop.eup %4718  ;;  %v2281_v4 = vadd.f32 1.0, %v4717_v53 }
 0x4fb   :  { %v2081_v62 = vmul.f32 %v4719_v9, %v2080_v2  ;;  %v4721_v40 = vpop.eup %4720  ;;  %v8388_v9 = vld [vmem:[#allocation18_spill] sm:$0xff] }
 0x4fc   :  { %4722 = vrcp.f32 %v2281_v4 }
 0x4fd   :  { %v7203_v57 = vadd.f32 %v2082_v5, %v2081_v62 }
 0x4ff   :  { %3754 = vst [vmem:[%s8115_s6 + $0x20] sm:$0xff] %v7203_v57  ;;  %2427 = vmatmul.mubr.f32.vlgmr.msra.gmra.mxu0 %v7203_v57  ;;  %4449 = vmatmul.mubr.f32.vlgmr.msra.gmra.mxu1 %v7203_v57 }
 0x500   :  { %2585 = vmatpush1.msra.mxu0 %v6715_v54  ;;  %4452 = vmatpush3.msra.mxu1 %v7208_v63  ;;  %v2288_v54 = vadd.f32 1.0, %v4721_v40  ;;  %v7465_v40 = vld [vmem:[%s8110_s2 + $0x68] sm:$0xff] }
 0x501   :  { %2586 = vmatprep.subr.mxu0 %v6720_v7  ;;  %4453 = vmatprep.subr.mxu1 %v8238_v61  ;;  %v2298_v7 = vadd.f32 %v6786_v50, %v2273_v45  ;;  %v8369_v50 = vld [vmem:[#allocation34_spill] sm:$0xff] }
 0x502   :  { %2587 = vmatpush1.msra.mxu0 %v6731_v26  ;;  %4454 = vmatpush3.msra.mxu1 %v6736_v37  ;;  %v3750_v37 = vld [vmem:[%s8114_s1 + $0x58] sm:$0xff]  ;;  %4724 = vrcp.f32 %v2288_v54  ;;  %v8376_v45 = vld [vmem:[#allocation22_spill] sm:$0xff]  ;;  %v7471_v54 = vld [vmem:[%s8110_s2 + $0x60] sm:$0xff] }
 0x503   :  { %2588 = vmatprep.subr.mxu0 %v6743_v56  ;;  %4455 = vmatprep.subr.mxu1 %v8238_v61 }
 0x504   :  { %2589 = vmatpush1.msra.mxu0 %v6750_v58  ;;  %4456 = vmatpush3.msra.mxu1 %v6755_v1  ;;  %v8364_v58 = vld [vmem:[#allocation29_spill] sm:$0xff] }
 0x505   :  { %2590 = vmatprep.subr.mxu0 %v6762_v28  ;;  %4457 = vmatprep.subr.mxu1 %v8238_v61  ;;  %v8365_v28 = vld [vmem:[#allocation30_spill] sm:$0xff] }
 0x506   :  { %2591 = vmatpush1.msra.mxu0 %v6769_v0  ;;  %4458 = vmatpush3.msra.mxu1 %v6774_v60  ;;  %v8366_v0 = vld [vmem:[#allocation31_spill] sm:$0xff]  ;;  %v8367_v60 = vld [vmem:[#allocation32_spill] sm:$0xff] }
 0x507   :  { %2592 = vmatprep.subr.mxu0 %v6781_v15  ;;  %4459 = vmatprep.subr.mxu1 %v8238_v61  ;;  %v8368_v15 = vld [vmem:[#allocation33_spill] sm:$0xff] }
 0x508   :  { %2593 = vmatpush1.msra.mxu0 %v6793_v51  ;;  %4460 = vmatpush3.msra.mxu1 %v6798_v17  ;;  %v8370_v51 = vld [vmem:[#allocation16_spill] sm:$0xff] }
 0x509   :  { %v4723_v26 = vpop.eup %4722  ;;  %2594 = vmatprep.subr.mxu0 %v6805_v22  ;;  %4461 = vmatprep.subr.mxu1 %v8238_v61  ;;  %v8371_v17 = vld [vmem:[#allocation4_spill] sm:$0xff]  ;;  %v8372_v22 = vld [vmem:[#allocation5_spill] sm:$0xff] }
 0x50a   :  { %v2299_v56 = vmul.f32 %v4723_v26, %v2298_v7  ;;  %2595 = vmatpush1.msra.mxu0 %v6812_v59  ;;  %4462 = vmatpush3.msra.mxu1 %v6817_v23  ;;  %v8373_v59 = vld [vmem:[#allocation19_spill] sm:$0xff]  ;;  %v8374_v23 = vld [vmem:[#allocation6_spill] sm:$0xff]  ;;  %v7483_v26 = vld [vmem:[%s8110_s2 + $0x48] sm:$0xff] }
 0x50b   :  { %2596 = vmatprep.subr.mxu0 %v8364_v58  ;;  %4463 = vmatprep.subr.mxu1 %v8238_v61  ;;  %v7477_v7 = vld [vmem:[%s8110_s2 + $0x50] sm:$0xff]  ;;  %v7501_v58 = vld [vmem:[%s8110_s2 + $0x20] sm:$0xff] }
 0x50c   :  { %v2300_v1 = vadd.f32 %v3750_v37, %v2299_v56  ;;  %2597 = vmatpush1.msra.mxu0 %v8365_v28  ;;  %4464 = vmatpush3.msra.mxu1 %v8366_v0  ;;  %v7489_v37 = vld [vmem:[%s8110_s2 + $0x38] sm:$0xff]  ;;  %v7495_v56 = vld [vmem:[%s8110_s2 + $0x30] sm:$0xff]  ;;  %v7513_v28 = vld [vmem:[%s8110_s2 + $0x8] sm:$0xff] }
 0x50d   :  { %2598 = vmatprep.subr.mxu0 %v8367_v60  ;;  %4465 = vmatprep.subr.mxu1 %v8238_v61  ;;  %v7519_v0 = vld [vmem:[%s8110_s2] sm:$0xff]  ;;  %v7525_v60 = vld [vmem:[%s8111_s3 + $0x170] sm:$0xff] }
 0x50e   :  { %4726 = vtanh.f32 %v2300_v1  ;;  %2599 = vmatpush1.msra.mxu0 %v8368_v15  ;;  %4466 = vmatpush3.msra.mxu1 %v8369_v50  ;;  %v7507_v1 = vld [vmem:[%s8110_s2 + $0x18] sm:$0xff] }
 0x50f   :  { %2600 = vmatprep.subr.mxu0 %v8370_v51  ;;  %4467 = vmatprep.subr.mxu1 %v8238_v61  ;;  %v4725_v39 = vpop.eup %4724  ;;  %v3756_v15 = vld [vmem:[%s8112_s0 + $0x78] sm:$0xff] }
 0x510   :  { %2601 = vmatpush1.msra.mxu0 %v8371_v17  ;;  %4468 = vmatpush3.msra.mxu1 %v8372_v22  ;;  %v2302_v53 = vsub.f32 1.0, %v4725_v39  ;;  %v2304_v62 = vmul.f32 %v4725_v39, %v7021_v10  ;;  %v7345_v10 = vld [vmem:[%s8110_s2 + $0x158] sm:$0xff]  ;;  %v3762_v39 = vld [vmem:[%s8114_s1 + $0x30] sm:$0xff] }
 0x511   :  { %2602 = vmatprep.subr.mxu0 %v8373_v59  ;;  %4469 = vmatprep.subr.mxu1 %v8238_v61 }
 0x512   :  { %2603 = vmatpush1.msra.mxu0 %v8374_v23  ;;  %4470 = vmatpush3.msra.mxu1 %v8375_v8  ;;  %v3757_v23 = vld [vmem:[%s8112_s0 + $0x80] sm:$0xff] }
 0x513   :  { %2604 = vmatprep.subr.mxu0 %v8376_v45  ;;  %4471 = vmatprep.subr.mxu1 %v8238_v61 }
 0x514   :  { %2605 = vmatpush1.msra.mxu0 %v8377_v32  ;;  %4472 = vmatpush3.msra.mxu1 %v8378_v35 }
 0x515   :  { %2606 = vmatprep.subr.mxu0 %v8379_v13  ;;  %4473 = vmatprep.subr.mxu1 %v8238_v61 }
 0x516   :  { %2607 = vmatpush1.msra.mxu0 %v8380_v3  ;;  %4474 = vmatpush3.msra.mxu1 %v8381_v36 }
 0x517   :  { %2608 = vmatprep.subr.mxu0 %v8382_v46  ;;  %4475 = vmatprep.subr.mxu1 %v8238_v61 }
 0x518   :  { %2609 = vmatpush1.msra.mxu0 %v8383_v49  ;;  %4476 = vmatpush3.msra.mxu1 %v8384_v52 }
 0x519   :  { %2610 = vmatprep.subr.mxu0 %v8385_v42  ;;  %4477 = vmatprep.subr.mxu1 %v8238_v61 }
 0x51a   :  { %2611 = vmatpush1.msra.mxu0 %v8386_v55  ;;  %4478 = vmatpush3.msra.mxu1 %v8387_v44  ;;  %v3758_v55 = vld [vmem:[%s8112_s0 + $0x88] sm:$0xff] }
 0x51b   :  { %v4727_v2 = vpop.eup %4726  ;;  %2612 = vmatprep.subr.mxu0 %v8388_v9  ;;  %4479 = vmatprep.subr.mxu1 %v8238_v61 }
 0x51c   :  { %2613 = vmatpush1.msra.mxu0 %v6988_v29  ;;  %4480 = vmatpush3.msra.mxu1 %v6993_v20  ;;  %v2303_v4 = vmul.f32 %v4727_v2, %v2302_v53  ;;  %v7339_v29 = vld [vmem:[%s8110_s2 + $0x168] sm:$0xff]  ;;  %v7363_v20 = vld [vmem:[%s8110_s2 + $0x138] sm:$0xff] }
 0x51d   :  { %2614 = vmatprep.subr.mxu0 %v7000_v19  ;;  %4481 = vmatprep.subr.mxu1 %v8238_v61  ;;  %v7357_v19 = vld [vmem:[%s8110_s2 + $0x140] sm:$0xff] }
 0x51e   :  { %2615 = vmatpush1.msra.mxu0 %v7007_v48  ;;  %2648 = vmatprep.mubr.f32.mxu0 %v8238_v61  ;;  %v7283_v5 = vadd.f32 %v2304_v62, %v2303_v4  ;;  %v7333_v48 = vld [vmem:[%s8110_s2 + $0x170] sm:$0xff]  ;;  %v3763_v62 = vld [vmem:[%s8114_s1 + $0x38] sm:$0xff] }
 0x51f   :  { %4482 = vmatpush3.msra.mxu1 %v7014_v31  ;;  %4483 = vmatprep.mubr.msk.f32.mxu1 %vm4789_vm0, %v8238_v61  ;;  %v7351_v31 = vld [vmem:[%s8110_s2 + $0x150] sm:$0xff] }
 0x520   :  { %3755 = vst [vmem:[%s8117_s7 + $0x18] sm:$0xff] %v7283_v5  ;;  %2649 = vmatmul.mubr.f32.vlgmr.msra.gmra.mxu0 %v7283_v5  ;;  %4484 = vmatmul.mubr.f32.vlgmr.msra.gmra.mxu1 %v7283_v5 }
 0x521   :  { %4486 = vmatprep.subr.mxu1 %v8238_v61  ;;  %2874 = vmatprep.mubr.f32.mxu0 %v8238_v61 }
 0x522   :  { %4487 = vmatpush3.msra.mxu1 %v7072_v25  ;;  %4518 = vmatprep.mubr.msk.f32.mxu1 %vm4789_vm0, %v8238_v61  ;;  %v7369_v25 = vld [vmem:[%s8110_s2 + $0x128] sm:$0xff] }
 0x523   :  { %4488 = vmatprep.subr.mxu1 %v8238_v61  ;;  %2810 = vmatprep.subr.mxu0 %v7333_v48 }
 0x524   :  { %4489 = vmatpush3.msra.mxu1 %v7079_v6  ;;  %2811 = vmatpush1.msra.mxu0 %v7339_v29  ;;  %v7375_v6 = vld [vmem:[%s8110_s2 + $0x120] sm:$0xff] }
 0x525   :  { %4490 = vmatprep.subr.mxu1 %v8238_v61  ;;  %2812 = vmatprep.subr.mxu0 %v7345_v10 }
 0x526   :  { %4491 = vmatpush3.msra.mxu1 %v7086_v43  ;;  %2813 = vmatpush1.msra.mxu0 %v7351_v31  ;;  %v7381_v43 = vld [vmem:[%s8110_s2 + $0x110] sm:$0xff] }
 0x527   :  { %4492 = vmatprep.subr.mxu1 %v8238_v61  ;;  %2814 = vmatprep.subr.mxu0 %v7357_v19 }
 0x528   :  { %4493 = vmatpush3.msra.mxu1 %v7093_v34  ;;  %2815 = vmatpush1.msra.mxu0 %v7363_v20  ;;  %v7387_v34 = vld [vmem:[%s8110_s2 + $0x108] sm:$0xff] }
 0x529   :  { %4494 = vmatprep.subr.mxu1 %v8238_v61  ;;  %2816 = vmatprep.subr.mxu0 %v7369_v25 }
 0x52a   :  { %4495 = vmatpush3.msra.mxu1 %v7100_v38  ;;  %2817 = vmatpush1.msra.mxu0 %v7375_v6  ;;  %v7393_v38 = vld [vmem:[%s8110_s2 + $0xf8] sm:$0xff] }
 0x52b   :  { %4496 = vmatprep.subr.mxu1 %v8238_v61  ;;  %2818 = vmatprep.subr.mxu0 %v7381_v43 }
 0x52c   :  { %4497 = vmatpush3.msra.mxu1 %v7107_v41  ;;  %2819 = vmatpush1.msra.mxu0 %v7387_v34  ;;  %v7399_v41 = vld [vmem:[%s8110_s2 + $0xf0] sm:$0xff] }
 0x52d   :  { %4498 = vmatprep.subr.mxu1 %v8238_v61  ;;  %2820 = vmatprep.subr.mxu0 %v7393_v38 }
 0x52e   :  { %4499 = vmatpush3.msra.mxu1 %v7114_v12  ;;  %2821 = vmatpush1.msra.mxu0 %v7399_v41  ;;  %v7405_v12 = vld [vmem:[%s8110_s2 + $0xe0] sm:$0xff] }
 0x52f   :  { %4500 = vmatprep.subr.mxu1 %v8238_v61  ;;  %2822 = vmatprep.subr.mxu0 %v7405_v12 }
 0x530   :  { %4501 = vmatpush3.msra.mxu1 %v7121_v47  ;;  %v7411_v47 = vld [vmem:[%s8110_s2 + $0xd8] sm:$0xff] }
 0x531   :  { %4502 = vmatprep.subr.mxu1 %v8238_v61  ;;  %2823 = vmatpush1.msra.mxu0 %v7411_v47 }
 0x532   :  { %4503 = vmatpush3.msra.mxu1 %v7128_v14  ;;  %v7417_v14 = vld [vmem:[%s8110_s2 + $0xc8] sm:$0xff] }
 0x533   :  { %4504 = vmatprep.subr.mxu1 %v8238_v61  ;;  %2824 = vmatprep.subr.mxu0 %v7417_v14 }
 0x534   :  { %4505 = vmatpush3.msra.mxu1 %v7135_v16  ;;  %v7423_v16 = vld [vmem:[%s8110_s2 + $0xc0] sm:$0xff] }
 0x535   :  { %4506 = vmatprep.subr.mxu1 %v8238_v61  ;;  %2825 = vmatpush1.msra.mxu0 %v7423_v16 }
 0x536   :  { %4507 = vmatpush3.msra.mxu1 %v7142_v18  ;;  %v7429_v18 = vld [vmem:[%s8110_s2 + $0xb0] sm:$0xff] }
 0x537   :  { %4508 = vmatprep.subr.mxu1 %v8238_v61  ;;  %2826 = vmatprep.subr.mxu0 %v7429_v18 }
 0x538   :  { %4509 = vmatpush3.msra.mxu1 %v7149_v21  ;;  %v7435_v21 = vld [vmem:[%s8110_s2 + $0xa8] sm:$0xff] }
 0x539   :  { %4510 = vmatprep.subr.mxu1 %v8238_v61  ;;  %2827 = vmatpush1.msra.mxu0 %v7435_v21 }
 0x53a   :  { %4511 = vmatpush3.msra.mxu1 %v7156_v24  ;;  %v7441_v24 = vld [vmem:[%s8110_s2 + $0x98] sm:$0xff] }
 0x53b   :  { %4512 = vmatprep.subr.mxu1 %v8238_v61  ;;  %2828 = vmatprep.subr.mxu0 %v7441_v24 }
 0x53c   :  { %4513 = vmatpush3.msra.mxu1 %v7163_v27  ;;  %v7447_v27 = vld [vmem:[%s8110_s2 + $0x90] sm:$0xff] }
 0x53d   :  { %4514 = vmatprep.subr.mxu1 %v8238_v61  ;;  %2829 = vmatpush1.msra.mxu0 %v7447_v27 }
 0x53e   :  { %4515 = vmatpush3.msra.mxu1 %v7170_v30  ;;  %v7453_v30 = vld [vmem:[%s8110_s2 + $0x80] sm:$0xff] }
 0x53f   :  { %4516 = vmatprep.subr.mxu1 %v8238_v61  ;;  %2830 = vmatprep.subr.mxu0 %v7453_v30 }
 0x540   :  { %4517 = vmatpush3.msra.mxu1 %v7177_v33  ;;  %v7459_v33 = vld [vmem:[%s8110_s2 + $0x78] sm:$0xff] }
 0x541   :  { %4521 = vmatprep.subr.mxu1 %v8238_v61  ;;  %2831 = vmatpush1.msra.mxu0 %v7459_v33 }
 0x542   :  { %2832 = vmatprep.subr.mxu0 %v7465_v40 }
 0x543   :  { %2833 = vmatpush1.msra.mxu0 %v7471_v54 }
 0x544   :  { %2834 = vmatprep.subr.mxu0 %v7477_v7 }
 0x545   :  { %2835 = vmatpush1.msra.mxu0 %v7483_v26 }
 0x546   :  { %2836 = vmatprep.subr.mxu0 %v7489_v37 }
 0x547   :  { %2837 = vmatpush1.msra.mxu0 %v7495_v56 }
 0x548   :  { %2838 = vmatprep.subr.mxu0 %v7501_v58 }
 0x549   :  { %2839 = vmatpush1.msra.mxu0 %v7507_v1 }
 0x54a   :  { %2840 = vmatprep.subr.mxu0 %v7513_v28 }
 0x54b   :  { %2841 = vmatpush1.msra.mxu0 %v7519_v0 }
 0x54c   :  { %3032 = vmatprep.subr.mxu0 %v7525_v60 }
 0x5bf   :  { %v2428_v50 = vpop.f32.mrf.mxu0  ;;  %v2499_v51 = vpop.f32.mrf.mxu1 }
 0x5c0   :  { %v2503_v17 = vadd.f32 %v3756_v15, %v2428_v50  ;;  %v2524_v46 = vadd.f32 %v7190_v11, %v2499_v51 }
 0x5c1   :  { %v4450_v22 = vpop.f32.mrf.mxu1  ;;  %v2430_v8 = vpop.f32.mrf.mxu0 }
 0x5c2   :  { %v3759_v59 = vmul.f32 -1.442695, %v2503_v17  ;;  %v2510_v45 = vadd.f32 %v3757_v23, %v2430_v8 }
 0x5c4   :  { %4728 = vpow2.f32 %v3759_v59  ;;  %v3760_v32 = vmul.f32 -1.442695, %v2510_v45 }
 0x5c6   :  { %4730 = vpow2.f32 %v3760_v32 }
 0x5d1   :  { %v4729_v35 = vpop.eup %4728 }
 0x5d2   :  { %v2507_v13 = vadd.f32 1.0, %v4729_v35  ;;  %v7552_v35 = vld [vmem:[%s8111_s3 + $0x168] sm:$0xff] }
 0x5d3   :  { %v4731_v3 = vpop.eup %4730 }
 0x5d4   :  { %4732 = vrcp.f32 %v2507_v13  ;;  %v2514_v36 = vadd.f32 1.0, %v4731_v3  ;;  %v7557_v13 = vld [vmem:[%s8111_s3 + $0x158] sm:$0xff]  ;;  %v7573_v3 = vld [vmem:[%s8111_s3 + $0x160] sm:$0xff] }
 0x5d6   :  { %4734 = vrcp.f32 %v2514_v36  ;;  %v7580_v36 = vld [vmem:[%s8111_s3 + $0x140] sm:$0xff] }
 0x5e0   :  { %v2650_v49 = vpop.f32.mrf.mxu0  ;;  %v7538_v52 = vpop.f32.mrf.mxu1 }
 0x5e1   :  { %v4733_v42 = vpop.eup %4732  ;;  %v2725_v44 = vadd.f32 %v3762_v39, %v2650_v49  ;;  %v7587_v39 = vld [vmem:[%s8111_s3 + $0x138] sm:$0xff] }
 0x5e2   :  { %v2525_v53 = vmul.f32 %v4733_v42, %v2524_v46  ;;  %v4485_v2 = vpop.f32.mrf.mxu1  ;;  %v2652_v15 = vpop.f32.mrf.mxu0  ;;  %v7592_v46 = vld [vmem:[%s8111_s3 + $0x148] sm:$0xff]  ;;  %v7606_v42 = vld [vmem:[%s8111_s3 + $0x120] sm:$0xff] }
 0x5e3   :  { %v3765_v9 = vmul.f32 -1.442695, %v2725_v44  ;;  %v2732_v11 = vadd.f32 %v3763_v62, %v2652_v15  ;;  %v4735_v51 = vpop.eup %4734  ;;  %v7618_v44 = vld [vmem:[%s8111_s3 + $0x110] sm:$0xff]  ;;  %v7630_v2 = vld [vmem:[%s8111_s3 + $0x108] sm:$0xff]  ;;  %v7642_v62 = vld [vmem:[%s8111_s3 + $0xf8] sm:$0xff] }
 0x5e4   :  { %v2526_v4 = vadd.f32 %v3758_v55, %v2525_v53  ;;  %v2528_v22 = vsub.f32 1.0, %v4735_v51  ;;  %v2530_v45 = vmul.f32 %v4735_v51, %v7203_v57  ;;  %v7568_v57 = vld [vmem:[%s8111_s3 + $0x150] sm:$0xff]  ;;  %v7623_v53 = vld [vmem:[%s8116_s5] ss:$0 sm:$0xff] }
 0x5e5   :  { %4736 = vpow2.f32 %v3765_v9  ;;  %v3766_v50 = vmul.f32 -1.442695, %v2732_v11  ;;  %v7611_v55 = vld [vmem:[%s8111_s3 + $0x130] sm:$0xff]  ;;  %v7635_v9 = vld [vmem:[%s8111_s3 + $0x118] sm:$0xff]  ;;  %v7654_v11 = vld [vmem:[%s8111_s3 + $0x100] sm:$0xff] }
 0x5e6   :  { %4738 = vtanh.f32 %v2526_v4  ;;  %v7649_v15 = vld [vmem:[%s8111_s3 + $0xf0] sm:$0xff]  ;;  %v7663_v51 = vld [vmem:[%s8111_s3 + $0xe0] sm:$0xff] }
 0x5e7   :  { %4740 = vpow2.f32 %v3766_v50  ;;  %v2746_v50 = vadd.f32 %v7623_v53, %v7538_v52  ;;  %8389 = vst [vmem:[#allocation20_spill] sm:$0xff] %v7663_v51  ;;  %v7673_v52 = vld [vmem:[%s8111_s3 + $0xd8] sm:$0xff] }
 0x5e8   :  { %8390 = vst [vmem:[#allocation21_spill] sm:$0xff] %v7673_v52 }
 0x5f2   :  { %v4737_v17 = vpop.eup %4736 }
 0x5f3   :  { %v4739_v59 = vpop.eup %4738  ;;  %v2729_v23 = vadd.f32 1.0, %v4737_v17 }
 0x5f4   :  { %v2529_v8 = vmul.f32 %v4739_v59, %v2528_v22  ;;  %v4741_v49 = vpop.eup %4740  ;;  %v3764_v22 = vld [vmem:[%s8114_s1 + $0x40] sm:$0xff]  ;;  %v7678_v59 = vld [vmem:[%s8111_s3 + $0xe8] sm:$0xff] }
 0x5f5   :  { %4742 = vrcp.f32 %v2729_v23  ;;  %v2736_v4 = vadd.f32 1.0, %v4741_v49  ;;  %8391 = vst [vmem:[#allocation23_spill] sm:$0xff] %v7678_v59  ;;  %v7697_v49 = vld [vmem:[%s8111_s3 + $0xd0] sm:$0xff] }
 0x5f6   :  { %v7547_v32 = vadd.f32 %v2530_v45, %v2529_v8  ;;  %v7685_v8 = vld [vmem:[%s8111_s3 + $0xc8] sm:$0xff]  ;;  %v7692_v45 = vld [vmem:[%s8111_s3 + $0xc0] sm:$0xff]  ;;  %8394 = vst [vmem:[#allocation27_spill] sm:$0xff] %v7697_v49 }
 0x5f7   :  { %4744 = vrcp.f32 %v2736_v4  ;;  %8392 = vst [vmem:[#allocation24_spill] sm:$0xff] %v7685_v8  ;;  %8393 = vst [vmem:[#allocation26_spill] sm:$0xff] %v7692_v45 }
 0x5f8   :  { %3768 = vst [vmem:[%s8115_s6 + $0x28] sm:$0xff] %v7547_v32  ;;  %2875 = vmatmul.mubr.f32.vlgmr.msra.gmra.mxu0 %v7547_v32  ;;  %4519 = vmatmul.mubr.f32.vlgmr.msra.gmra.mxu1 %v7547_v32 }
 0x5f9   :  { %3033 = vmatpush1.msra.mxu0 %v7552_v35  ;;  %4522 = vmatpush3.msra.mxu1 %v7208_v63  ;;  %v7599_v63 = vld [vmem:[%s8111_s3 + $0x128] sm:$0xff] }
 0x5fa   :  { %3034 = vmatprep.subr.mxu0 %v7557_v13  ;;  %4523 = vmatprep.subr.mxu1 %v8238_v61 }
 0x5fb   :  { %3035 = vmatpush1.msra.mxu0 %v7568_v57  ;;  %4524 = vmatpush3.msra.mxu1 %v7573_v3 }
 0x5fc   :  { %3036 = vmatprep.subr.mxu0 %v7580_v36  ;;  %4525 = vmatprep.subr.mxu1 %v8238_v61 }
 0x5fd   :  { %3037 = vmatpush1.msra.mxu0 %v7587_v39  ;;  %4526 = vmatpush3.msra.mxu1 %v7592_v46 }
 0x5fe   :  { %3038 = vmatprep.subr.mxu0 %v7599_v63  ;;  %4527 = vmatprep.subr.mxu1 %v8238_v61 }
 0x5ff   :  { %3039 = vmatpush1.msra.mxu0 %v7606_v42  ;;  %4528 = vmatpush3.msra.mxu1 %v7611_v55 }
 0x600   :  { %3040 = vmatprep.subr.mxu0 %v7618_v44  ;;  %4529 = vmatprep.subr.mxu1 %v8238_v61 }
 0x601   :  { %3041 = vmatpush1.msra.mxu0 %v7630_v2  ;;  %4530 = vmatpush3.msra.mxu1 %v7635_v9 }
 0x602   :  { %v4743_v17 = vpop.eup %4742  ;;  %3042 = vmatprep.subr.mxu0 %v7642_v62  ;;  %4531 = vmatprep.subr.mxu1 %v8238_v61 }
 0x603   :  { %v2747_v23 = vmul.f32 %v4743_v17, %v2746_v50  ;;  %3043 = vmatpush1.msra.mxu0 %v7649_v15  ;;  %4532 = vmatpush3.msra.mxu1 %v7654_v11  ;;  %v7704_v50 = vld [vmem:[%s8111_s3 + $0xb0] sm:$0xff]  ;;  %v7711_v17 = vld [vmem:[%s8111_s3 + $0xa8] sm:$0xff] }
 0x604   :  { %3044 = vmatprep.subr.mxu0 %v7663_v51  ;;  %4533 = vmatprep.subr.mxu1 %v8238_v61  ;;  %8395 = vst [vmem:[#allocation29_spill] sm:$0xff] %v7704_v50  ;;  %8396 = vst [vmem:[#allocation30_spill] sm:$0xff] %v7711_v17 }
 0x605   :  { %v2748_v4 = vadd.f32 %v3764_v22, %v2747_v23  ;;  %3045 = vmatpush1.msra.mxu0 %v7673_v52  ;;  %4534 = vmatpush3.msra.mxu1 %v7678_v59  ;;  %v7716_v22 = vld [vmem:[%s8111_s3 + $0xb8] sm:$0xff]  ;;  %v7844_v52 = vld [vmem:[%s8111_s3] sm:$0xff] }
 0x606   :  { %3046 = vmatprep.subr.mxu0 %v7685_v8  ;;  %4535 = vmatprep.subr.mxu1 %v8238_v61  ;;  %8397 = vst [vmem:[#allocation31_spill] sm:$0xff] %v7716_v22  ;;  %v7723_v23 = vld [vmem:[%s8111_s3 + $0x98] sm:$0xff]  ;;  %v7730_v8 = vld [vmem:[%s8111_s3 + $0x90] sm:$0xff] }
 0x607   :  { %4746 = vtanh.f32 %v2748_v4  ;;  %3047 = vmatpush1.msra.mxu0 %v7692_v45  ;;  %4536 = vmatpush3.msra.mxu1 %v7697_v49  ;;  %8398 = vst [vmem:[#allocation32_spill] sm:$0xff] %v7723_v23  ;;  %8399 = vst [vmem:[#allocation33_spill] sm:$0xff] %v7730_v8  ;;  %v7735_v4 = vld [vmem:[%s8111_s3 + $0xa0] sm:$0xff]  ;;  %v7749_v49 = vld [vmem:[%s8111_s3 + $0x78] sm:$0xff] }
 0x608   :  { %3048 = vmatprep.subr.mxu0 %v7704_v50  ;;  %4537 = vmatprep.subr.mxu1 %v8238_v61  ;;  %8400 = vst [vmem:[#allocation34_spill] sm:$0xff] %v7735_v4  ;;  %v7742_v50 = vld [vmem:[%s8111_s3 + $0x80] sm:$0xff]  ;;  %8402 = vst [vmem:[#allocation4_spill] sm:$0xff] %v7749_v49  ;;  %v7806_v45 = vld [vmem:[%s8111_s3 + $0x30] sm:$0xff] }
 0x609   :  { %3049 = vmatpush1.msra.mxu0 %v7711_v17  ;;  %4538 = vmatpush3.msra.mxu1 %v7716_v22  ;;  %8401 = vst [vmem:[#allocation16_spill] sm:$0xff] %v7742_v50  ;;  %v7754_v17 = vld [vmem:[%s8111_s3 + $0x88] sm:$0xff]  ;;  %v7768_v22 = vld [vmem:[%s8111_s3 + $0x60] sm:$0xff]  ;;  %8411 = vst [vmem:[#allocation10_spill] sm:$0xff] %v7806_v45 }
 0x60a   :  { %3050 = vmatprep.subr.mxu0 %v7723_v23  ;;  %4539 = vmatprep.subr.mxu1 %v8238_v61  ;;  %8403 = vst [vmem:[#allocation5_spill] sm:$0xff] %v7754_v17  ;;  %v7761_v23 = vld [vmem:[%s8111_s3 + $0x68] sm:$0xff]  ;;  %8405 = vst [vmem:[#allocation6_spill] sm:$0xff] %v7768_v22 }
 0x60b   :  { %3051 = vmatpush1.msra.mxu0 %v7730_v8  ;;  %4540 = vmatpush3.msra.mxu1 %v7735_v4  ;;  %8404 = vst [vmem:[#allocation19_spill] sm:$0xff] %v7761_v23  ;;  %v7773_v8 = vld [vmem:[%s8111_s3 + $0x70] sm:$0xff]  ;;  %v7787_v4 = vld [vmem:[%s8111_s3 + $0x48] sm:$0xff] }
 0x60c   :  { %3052 = vmatprep.subr.mxu0 %v7742_v50  ;;  %4541 = vmatprep.subr.mxu1 %v8238_v61  ;;  %8406 = vst [vmem:[#allocation7_spill] sm:$0xff] %v7773_v8  ;;  %v7780_v50 = vld [vmem:[%s8111_s3 + $0x50] sm:$0xff]  ;;  %8408 = vst [vmem:[#allocation8_spill] sm:$0xff] %v7787_v4 }
 0x60d   :  { %3053 = vmatpush1.msra.mxu0 %v7749_v49  ;;  %4542 = vmatpush3.msra.mxu1 %v7754_v17  ;;  %8407 = vst [vmem:[#allocation22_spill] sm:$0xff] %v7780_v50  ;;  %v7792_v49 = vld [vmem:[%s8111_s3 + $0x58] sm:$0xff]  ;;  %v4745_v17 = vpop.eup %4744 }
 0x60e   :  { %3054 = vmatprep.subr.mxu0 %v7761_v23  ;;  %4543 = vmatprep.subr.mxu1 %v8238_v61  ;;  %8409 = vst [vmem:[#allocation9_spill] sm:$0xff] %v7792_v49  ;;  %v7799_v23 = vld [vmem:[%s8111_s3 + $0x38] sm:$0xff]  ;;  %v2752_v51 = vmul.f32 %v4745_v17, %v7283_v5 }
 0x60f   :  { %3055 = vmatpush1.msra.mxu0 %v7768_v22  ;;  %4544 = vmatpush3.msra.mxu1 %v7773_v8  ;;  %8410 = vst [vmem:[#allocation25_spill] sm:$0xff] %v7799_v23  ;;  %v7811_v22 = vld [vmem:[%s8111_s3 + $0x40] sm:$0xff]  ;;  %v7825_v8 = vld [vmem:[%s8111_s3 + $0x18] sm:$0xff] }
 0x610   :  { %3056 = vmatprep.subr.mxu0 %v7780_v50  ;;  %4545 = vmatprep.subr.mxu1 %v8238_v61  ;;  %8412 = vst [vmem:[#allocation11_spill] sm:$0xff] %v7811_v22  ;;  %v7818_v50 = vld [vmem:[%s8111_s3 + $0x20] sm:$0xff]  ;;  %v3257_v5 = vld [vmem:[%s8110_s2 + $0x178] sm:$0xff] }
 0x611   :  { %3057 = vmatpush1.msra.mxu0 %v7787_v4  ;;  %4546 = vmatpush3.msra.mxu1 %v7792_v49  ;;  %8413 = vst [vmem:[#allocation28_spill] sm:$0xff] %v7818_v50  ;;  %v7830_v4 = vld [vmem:[%s8111_s3 + $0x28] sm:$0xff]  ;;  %v2750_v49 = vsub.f32 1.0, %v4745_v17 }
 0x612   :  { %3058 = vmatprep.subr.mxu0 %v7799_v23  ;;  %4547 = vmatprep.subr.mxu1 %v8238_v61  ;;  %v7837_v23 = vld [vmem:[%s8111_s3 + $0x8] sm:$0xff] }
 0x613   :  { %3059 = vmatpush1.msra.mxu0 %v7806_v45  ;;  %4548 = vmatpush3.msra.mxu1 %v7811_v22  ;;  %v7851_v22 = vld [vmem:[%s8111_s3 + $0x10] sm:$0xff] }
 0x614   :  { %v4747_v59 = vpop.eup %4746  ;;  %3060 = vmatprep.subr.mxu0 %v7818_v50  ;;  %4549 = vmatprep.subr.mxu1 %v8238_v61 }
 0x615   :  { %3061 = vmatpush1.msra.mxu0 %v7825_v8  ;;  %4550 = vmatpush3.msra.mxu1 %v7830_v4  ;;  %v2751_v45 = vmul.f32 %v4747_v59, %v2750_v49 }
 0x616   :  { %3062 = vmatprep.subr.mxu0 %v7837_v23  ;;  %4551 = vmatprep.subr.mxu1 %v8238_v61 }
 0x617   :  { %3063 = vmatpush1.msra.mxu0 %v7844_v52  ;;  %3096 = vmatprep.mubr.f32.mxu0 %v8238_v61  ;;  %v7858_v50 = vadd.f32 %v2752_v51, %v2751_v45  ;;  %v3772_v45 = vld [vmem:[%s8112_s0 + $0xa0] sm:$0xff] }
 0x618   :  { %4552 = vmatpush3.msra.mxu1 %v7851_v22  ;;  %4553 = vmatprep.mubr.msk.f32.mxu1 %vm4789_vm0, %v8238_v61 }
 0x619   :  { %3769 = vst [vmem:[%s8117_s7 + $0x10] sm:$0xff] %v7858_v50  ;;  %3097 = vmatmul.mubr.f32.vlgmr.msra.gmra.mxu0 %v7858_v50  ;;  %4554 = vmatmul.mubr.f32.vlgmr.msra.gmra.mxu1 %v7858_v50 }
 0x61a   :  { %3258 = vmatprep.subr.mxu0 %v7333_v48  ;;  %4556 = vmatprep.subr.mxu1 %v8238_v61  ;;  %v3254_v48 = vld [vmem:[%s8110_s2 + $0x160] sm:$0xff] }
 0x61b   :  { %3259 = vmatpush1.msra.mxu0 %v7339_v29  ;;  %3322 = vmatprep.mubr.f32.mxu0 %v8238_v61  ;;  %v3251_v29 = vld [vmem:[%s8110_s2 + $0x148] sm:$0xff] }
 0x61c   :  { %3260 = vmatprep.subr.mxu0 %v7345_v10  ;;  %4588 = vmatprep.mubr.msk.f32.mxu1 %vm4789_vm0, %v8238_v61  ;;  %v3248_v10 = vld [vmem:[%s8110_s2 + $0x130] sm:$0xff] }
 0x61d   :  { %3261 = vmatpush1.msra.mxu0 %v7351_v31  ;;  %4557 = vmatpush3.msra.mxu1 %v3257_v5  ;;  %v3245_v31 = vld [vmem:[%s8110_s2 + $0x118] sm:$0xff] }
 0x61e   :  { %3262 = vmatprep.subr.mxu0 %v7357_v19  ;;  %4558 = vmatprep.subr.mxu1 %v8238_v61  ;;  %v3242_v19 = vld [vmem:[%s8110_s2 + $0x100] sm:$0xff] }
 0x61f   :  { %3263 = vmatpush1.msra.mxu0 %v7363_v20  ;;  %4559 = vmatpush3.msra.mxu1 %v3254_v48  ;;  %v3239_v20 = vld [vmem:[%s8110_s2 + $0xe8] sm:$0xff] }
 0x620   :  { %3264 = vmatprep.subr.mxu0 %v7369_v25  ;;  %4560 = vmatprep.subr.mxu1 %v8238_v61  ;;  %v3236_v25 = vld [vmem:[%s8110_s2 + $0xd0] sm:$0xff] }
 0x621   :  { %3265 = vmatpush1.msra.mxu0 %v7375_v6  ;;  %4561 = vmatpush3.msra.mxu1 %v3251_v29  ;;  %v3233_v6 = vld [vmem:[%s8110_s2 + $0xb8] sm:$0xff] }
 0x622   :  { %3266 = vmatprep.subr.mxu0 %v7381_v43  ;;  %4562 = vmatprep.subr.mxu1 %v8238_v61  ;;  %v3230_v43 = vld [vmem:[%s8110_s2 + $0xa0] sm:$0xff] }
 0x623   :  { %3267 = vmatpush1.msra.mxu0 %v7387_v34  ;;  %4563 = vmatpush3.msra.mxu1 %v3248_v10  ;;  %v3227_v34 = vld [vmem:[%s8110_s2 + $0x88] sm:$0xff]  ;;  %v3777_v10 = vld [vmem:[%s8114_s1 + $0x20] sm:$0xff] }
 0x624   :  { %3268 = vmatprep.subr.mxu0 %v7393_v38  ;;  %4564 = vmatprep.subr.mxu1 %v8238_v61  ;;  %v3224_v38 = vld [vmem:[%s8110_s2 + $0x70] sm:$0xff] }
 0x625   :  { %3269 = vmatpush1.msra.mxu0 %v7399_v41  ;;  %4565 = vmatpush3.msra.mxu1 %v3245_v31  ;;  %v3221_v41 = vld [vmem:[%s8110_s2 + $0x58] sm:$0xff] }
 0x626   :  { %3270 = vmatprep.subr.mxu0 %v7405_v12  ;;  %4566 = vmatprep.subr.mxu1 %v8238_v61  ;;  %v3218_v12 = vld [vmem:[%s8110_s2 + $0x40] sm:$0xff] }
 0x627   :  { %3271 = vmatpush1.msra.mxu0 %v7411_v47  ;;  %4567 = vmatpush3.msra.mxu1 %v3242_v19  ;;  %v3215_v47 = vld [vmem:[%s8110_s2 + $0x28] sm:$0xff] }
 0x628   :  { %3272 = vmatprep.subr.mxu0 %v7417_v14  ;;  %4568 = vmatprep.subr.mxu1 %v8238_v61  ;;  %v3212_v14 = vld [vmem:[%s8110_s2 + $0x10] sm:$0xff] }
 0x629   :  { %3273 = vmatpush1.msra.mxu0 %v7423_v16  ;;  %4569 = vmatpush3.msra.mxu1 %v3239_v20  ;;  %v3770_v16 = vld [vmem:[%s8112_s0 + $0x90] sm:$0xff] }
 0x62a   :  { %3274 = vmatprep.subr.mxu0 %v7429_v18  ;;  %4570 = vmatprep.subr.mxu1 %v8238_v61 }
 0x62b   :  { %3275 = vmatpush1.msra.mxu0 %v7435_v21  ;;  %4571 = vmatpush3.msra.mxu1 %v3236_v25 }
 0x62c   :  { %3276 = vmatprep.subr.mxu0 %v7441_v24  ;;  %4572 = vmatprep.subr.mxu1 %v8238_v61 }
 0x62d   :  { %3277 = vmatpush1.msra.mxu0 %v7447_v27  ;;  %4573 = vmatpush3.msra.mxu1 %v3233_v6 }
 0x62e   :  { %3278 = vmatprep.subr.mxu0 %v7453_v30  ;;  %4574 = vmatprep.subr.mxu1 %v8238_v61 }
 0x62f   :  { %3279 = vmatpush1.msra.mxu0 %v7459_v33  ;;  %4575 = vmatpush3.msra.mxu1 %v3230_v43  ;;  %v3771_v33 = vld [vmem:[%s8112_s0 + $0x98] sm:$0xff] }
 0x630   :  { %3280 = vmatprep.subr.mxu0 %v7465_v40  ;;  %4576 = vmatprep.subr.mxu1 %v8238_v61 }
 0x631   :  { %3281 = vmatpush1.msra.mxu0 %v7471_v54  ;;  %4577 = vmatpush3.msra.mxu1 %v3227_v34 }
 0x632   :  { %3282 = vmatprep.subr.mxu0 %v7477_v7  ;;  %4578 = vmatprep.subr.mxu1 %v8238_v61 }
 0x633   :  { %3283 = vmatpush1.msra.mxu0 %v7483_v26  ;;  %4579 = vmatpush3.msra.mxu1 %v3224_v38 }
 0x634   :  { %3284 = vmatprep.subr.mxu0 %v7489_v37  ;;  %4580 = vmatprep.subr.mxu1 %v8238_v61 }
 0x635   :  { %3285 = vmatpush1.msra.mxu0 %v7495_v56  ;;  %4581 = vmatpush3.msra.mxu1 %v3221_v41 }
 0x636   :  { %3286 = vmatprep.subr.mxu0 %v7501_v58  ;;  %4582 = vmatprep.subr.mxu1 %v8238_v61  ;;  %v7979_v58 = vld [vmem:[%s8113_s4] ss:$0 sm:$0xff] }
 0x637   :  { %3287 = vmatpush1.msra.mxu0 %v7507_v1  ;;  %4583 = vmatpush3.msra.mxu1 %v3218_v12 }
 0x638   :  { %3288 = vmatprep.subr.mxu0 %v7513_v28  ;;  %4584 = vmatprep.subr.mxu1 %v8238_v61  ;;  %v3776_v28 = vld [vmem:[%s8114_s1 + $0x18] sm:$0xff] }
 0x639   :  { %3289 = vmatpush1.msra.mxu0 %v7519_v0  ;;  %4585 = vmatpush3.msra.mxu1 %v3215_v47 }
 0x63a   :  { %3479 = vmatprep.subr.mxu0 %v7525_v60  ;;  %4586 = vmatprep.subr.mxu1 %v8238_v61 }
 0x63b   :  { %4587 = vmatpush3.msra.mxu1 %v3212_v14  ;;  %v3478_v14 = vld [vmem:[%s8111_s3 + $0x178] sm:$0xff] }
 0x63c   :  { %4591 = vmatprep.subr.mxu1 %v8238_v61 }
 0x6b8   :  { %v2876_v18 = vpop.f32.mrf.mxu0  ;;  %v2947_v21 = vpop.f32.mrf.mxu1 }
 0x6b9   :  { %v2951_v24 = vadd.f32 %v3770_v16, %v2876_v18  ;;  %v2972_v0 = vadd.f32 %v7979_v58, %v2947_v21  ;;  %v8425_v16 = vld [vmem:[#allocation34_spill] sm:$0xff]  ;;  %v8426_v18 = vld [vmem:[#allocation16_spill] sm:$0xff] }
 0x6ba   :  { %v4520_v27 = vpop.f32.mrf.mxu1  ;;  %v2878_v40 = vpop.f32.mrf.mxu0  ;;  %v8427_v21 = vld [vmem:[#allocation4_spill] sm:$0xff] }
 0x6bb   :  { %v3773_v30 = vmul.f32 -1.442695, %v2951_v24  ;;  %v2958_v54 = vadd.f32 %v3771_v33, %v2878_v40  ;;  %v8428_v24 = vld [vmem:[#allocation5_spill] sm:$0xff]  ;;  %v8429_v27 = vld [vmem:[#allocation19_spill] sm:$0xff] }
 0x6bc   :  { %v8431_v33 = vld [vmem:[#allocation7_spill] sm:$0xff] }
 0x6bd   :  { %4748 = vpow2.f32 %v3773_v30  ;;  %v3774_v7 = vmul.f32 -1.442695, %v2958_v54  ;;  %v8430_v30 = vld [vmem:[#allocation6_spill] sm:$0xff] }
 0x6be   :  { %v8432_v54 = vld [vmem:[#allocation22_spill] sm:$0xff] }
 0x6bf   :  { %4750 = vpow2.f32 %v3774_v7  ;;  %v8433_v7 = vld [vmem:[#allocation8_spill] sm:$0xff] }
 0x6ca   :  { %v4749_v26 = vpop.eup %4748 }
 0x6cb   :  { %v2955_v37 = vadd.f32 1.0, %v4749_v26  ;;  %v8434_v26 = vld [vmem:[#allocation9_spill] sm:$0xff] }
 0x6cc   :  { %v4751_v56 = vpop.eup %4750 }
 0x6cd   :  { %4752 = vrcp.f32 %v2955_v37  ;;  %v2962_v1 = vadd.f32 1.0, %v4751_v56  ;;  %v8435_v37 = vld [vmem:[#allocation25_spill] sm:$0xff]  ;;  %v8436_v56 = vld [vmem:[#allocation10_spill] sm:$0xff] }
 0x6cf   :  { %4754 = vrcp.f32 %v2962_v1  ;;  %v8437_v1 = vld [vmem:[#allocation11_spill] sm:$0xff] }
 0x6d9   :  { %v3098_v60 = vpop.f32.mrf.mxu0  ;;  %v3169_v51 = vpop.f32.mrf.mxu1 }
 0x6da   :  { %v4753_v59 = vpop.eup %4752  ;;  %v3173_v49 = vadd.f32 %v3776_v28, %v3098_v60  ;;  %v8438_v60 = vld [vmem:[#allocation28_spill] sm:$0xff] }
 0x6db   :  { %v2973_v17 = vmul.f32 %v4753_v59, %v2972_v0  ;;  %v4555_v5 = vpop.f32.mrf.mxu1  ;;  %v3100_v31 = vpop.f32.mrf.mxu0 }
 0x6dc   :  { %v3779_v48 = vmul.f32 -1.442695, %v3173_v49  ;;  %v3180_v19 = vadd.f32 %v3777_v10, %v3100_v31  ;;  %v4755_v25 = vpop.eup %4754 }
 0x6dd   :  { %v2974_v29 = vadd.f32 %v3772_v45, %v2973_v17  ;;  %v2976_v43 = vsub.f32 1.0, %v4755_v25  ;;  %v2978_v12 = vmul.f32 %v4755_v25, %v7547_v32 }
 0x6de   :  { %4756 = vpow2.f32 %v3779_v48  ;;  %v3780_v20 = vmul.f32 -1.442695, %v3180_v19  ;;  %v3428_v19 = vld [vmem:[%s8114_s1] sm:$0xff] }
 0x6df   :  { %4758 = vtanh.f32 %v2974_v29 }
 0x6e0   :  { %4760 = vpow2.f32 %v3780_v20 }
 0x6eb   :  { %v4757_v6 = vpop.eup %4756 }
 0x6ec   :  { %v4759_v34 = vpop.eup %4758  ;;  %v3177_v38 = vadd.f32 1.0, %v4757_v6 }
 0x6ed   :  { %v2977_v41 = vmul.f32 %v4759_v34, %v2976_v43  ;;  %v4761_v32 = vpop.eup %4760  ;;  %v3786_v34 = vld [vmem:[%s8112_s0 + $0xb8] sm:$0xff] }
 0x6ee   :  { %4762 = vrcp.f32 %v3177_v38 }
 0x6ef   :  { %v7992_v47 = vadd.f32 %v2978_v12, %v2977_v41 }
 0x6f1   :  { %3782 = vst [vmem:[%s8115_s6 + $0x30] sm:$0xff] %v7992_v47  ;;  %3323 = vmatmul.mubr.f32.vlgmr.msra.gmra.mxu0 %v7992_v47  ;;  %4589 = vmatmul.mubr.f32.vlgmr.msra.gmra.mxu1 %v7992_v47 }
 0x6f2   :  { %3480 = vmatpush1.msra.mxu0 %v7552_v35  ;;  %4592 = vmatpush3.msra.mxu1 %v3478_v14  ;;  %v3184_v35 = vadd.f32 1.0, %v4761_v32 }
 0x6f3   :  { %3481 = vmatprep.subr.mxu0 %v7557_v13  ;;  %4593 = vmatprep.subr.mxu1 %v8238_v61  ;;  %v3194_v13 = vadd.f32 %v7623_v53, %v3169_v51  ;;  %v8419_v53 = vld [vmem:[#allocation27_spill] sm:$0xff] }
 0x6f4   :  { %3482 = vmatpush1.msra.mxu0 %v7568_v57  ;;  %4594 = vmatpush3.msra.mxu1 %v7573_v3  ;;  %v3778_v3 = vld [vmem:[%s8114_s1 + $0x28] sm:$0xff]  ;;  %4764 = vrcp.f32 %v3184_v35 }
 0x6f5   :  { %3483 = vmatprep.subr.mxu0 %v7580_v36  ;;  %4595 = vmatprep.subr.mxu1 %v8238_v61  ;;  %v3429_v35 = vld [vmem:[%s8114_s1 + $0x8] sm:$0xff] }
 0x6f6   :  { %3484 = vmatpush1.msra.mxu0 %v7587_v39  ;;  %4596 = vmatpush3.msra.mxu1 %v7592_v46  ;;  %v8414_v39 = vld [vmem:[#allocation20_spill] sm:$0xff] }
 0x6f7   :  { %3485 = vmatprep.subr.mxu0 %v7599_v63  ;;  %4597 = vmatprep.subr.mxu1 %v8238_v61  ;;  %v8415_v63 = vld [vmem:[#allocation21_spill] sm:$0xff] }
 0x6f8   :  { %3486 = vmatpush1.msra.mxu0 %v7606_v42  ;;  %4598 = vmatpush3.msra.mxu1 %v7611_v55  ;;  %v8416_v42 = vld [vmem:[#allocation23_spill] sm:$0xff]  ;;  %v8417_v55 = vld [vmem:[#allocation24_spill] sm:$0xff] }
 0x6f9   :  { %3487 = vmatprep.subr.mxu0 %v7618_v44  ;;  %4599 = vmatprep.subr.mxu1 %v8238_v61  ;;  %v8418_v44 = vld [vmem:[#allocation26_spill] sm:$0xff] }
 0x6fa   :  { %3488 = vmatpush1.msra.mxu0 %v7630_v2  ;;  %4600 = vmatpush3.msra.mxu1 %v7635_v9  ;;  %v8420_v2 = vld [vmem:[#allocation29_spill] sm:$0xff]  ;;  %v8421_v9 = vld [vmem:[#allocation30_spill] sm:$0xff] }
 0x6fb   :  { %v4763_v57 = vpop.eup %4762  ;;  %3489 = vmatprep.subr.mxu0 %v7642_v62  ;;  %4601 = vmatprep.subr.mxu1 %v8238_v61  ;;  %v8422_v62 = vld [vmem:[#allocation31_spill] sm:$0xff] }
 0x6fc   :  { %v3195_v36 = vmul.f32 %v4763_v57, %v3194_v13  ;;  %3490 = vmatpush1.msra.mxu0 %v7649_v15  ;;  %4602 = vmatpush3.msra.mxu1 %v7654_v11  ;;  %v8423_v15 = vld [vmem:[#allocation32_spill] sm:$0xff]  ;;  %v8424_v11 = vld [vmem:[#allocation33_spill] sm:$0xff] }
 0x6fd   :  { %3491 = vmatprep.subr.mxu0 %v8414_v39  ;;  %4603 = vmatprep.subr.mxu1 %v8238_v61 }
 0x6fe   :  { %v3196_v46 = vadd.f32 %v3778_v3, %v3195_v36  ;;  %3492 = vmatpush1.msra.mxu0 %v8415_v63  ;;  %4604 = vmatpush3.msra.mxu1 %v8416_v42 }
 0x6ff   :  { %3493 = vmatprep.subr.mxu0 %v8417_v55  ;;  %4605 = vmatprep.subr.mxu1 %v8238_v61 }
 0x700   :  { %4766 = vtanh.f32 %v3196_v46  ;;  %3494 = vmatpush1.msra.mxu0 %v8418_v44  ;;  %4606 = vmatpush3.msra.mxu1 %v8419_v53 }
 0x701   :  { %3495 = vmatprep.subr.mxu0 %v8420_v2  ;;  %4607 = vmatprep.subr.mxu1 %v8238_v61  ;;  %v4765_v40 = vpop.eup %4764  ;;  %v3792_v2 = vld [vmem:[%s8116_s5] ss:$0 sm:$0xff] }
 0x702   :  { %3496 = vmatpush1.msra.mxu0 %v8421_v9  ;;  %4608 = vmatpush3.msra.mxu1 %v8422_v62  ;;  %v3198_v28 = vsub.f32 1.0, %v4765_v40  ;;  %v3200_v59 = vmul.f32 %v4765_v40, %v7858_v50 }
 0x703   :  { %3497 = vmatprep.subr.mxu0 %v8423_v15  ;;  %4609 = vmatprep.subr.mxu1 %v8238_v61 }
 0x704   :  { %3498 = vmatpush1.msra.mxu0 %v8424_v11  ;;  %4610 = vmatpush3.msra.mxu1 %v8425_v16  ;;  %v3430_v11 = vld [vmem:[%s8114_s1 + $0x10] sm:$0xff] }
 0x705   :  { %3499 = vmatprep.subr.mxu0 %v8426_v18  ;;  %4611 = vmatprep.subr.mxu1 %v8238_v61 }
 0x706   :  { %3500 = vmatpush1.msra.mxu0 %v8427_v21  ;;  %4612 = vmatpush3.msra.mxu1 %v8428_v24 }
 0x707   :  { %3501 = vmatprep.subr.mxu0 %v8429_v27  ;;  %4613 = vmatprep.subr.mxu1 %v8238_v61 }
 0x708   :  { %3502 = vmatpush1.msra.mxu0 %v8430_v30  ;;  %4614 = vmatpush3.msra.mxu1 %v8431_v33 }
 0x709   :  { %3503 = vmatprep.subr.mxu0 %v8432_v54  ;;  %4615 = vmatprep.subr.mxu1 %v8238_v61 }
 0x70a   :  { %3504 = vmatpush1.msra.mxu0 %v8433_v7  ;;  %4616 = vmatpush3.msra.mxu1 %v8434_v26 }
 0x70b   :  { %3505 = vmatprep.subr.mxu0 %v8435_v37  ;;  %4617 = vmatprep.subr.mxu1 %v8238_v61 }
 0x70c   :  { %3506 = vmatpush1.msra.mxu0 %v8436_v56  ;;  %4618 = vmatpush3.msra.mxu1 %v8437_v1 }
 0x70d   :  { %v4767_v0 = vpop.eup %4766  ;;  %3507 = vmatprep.subr.mxu0 %v8438_v60  ;;  %4619 = vmatprep.subr.mxu1 %v8238_v61 }
 0x70e   :  { %3508 = vmatpush1.msra.mxu0 %v7825_v8  ;;  %4620 = vmatpush3.msra.mxu1 %v7830_v4  ;;  %v3199_v51 = vmul.f32 %v4767_v0, %v3198_v28 }
 0x70f   :  { %3509 = vmatprep.subr.mxu0 %v7837_v23  ;;  %4621 = vmatprep.subr.mxu1 %v8238_v61 }
 0x710   :  { %3510 = vmatpush1.msra.mxu0 %v7844_v52  ;;  %3543 = vmatprep.mubr.f32.mxu0 %v8238_v61  ;;  %v8069_v45 = vadd.f32 %v3200_v59, %v3199_v51  ;;  %v3784_v52 = vld [vmem:[%s8112_s0 + $0xa8] sm:$0xff] }
 0x711   :  { %4622 = vmatpush3.msra.mxu1 %v7851_v22  ;;  %4623 = vmatprep.mubr.msk.f32.mxu1 %vm4789_vm0, %v8238_v61  ;;  %v3785_v61 = vld [vmem:[%s8112_s0 + $0xb0] sm:$0xff] }
 0x712   :  { %3783 = vst [vmem:[%s8117_s7 + $0x8] sm:$0xff] %v8069_v45  ;;  %3544 = vmatmul.mubr.f32.vlgmr.msra.gmra.mxu0 %v8069_v45  ;;  %4624 = vmatmul.mubr.f32.vlgmr.msra.gmra.mxu1 %v8069_v45 }
 0x7b1   :  { %v3324_v8 = vpop.f32.mrf.mxu0  ;;  %v3395_v50 = vpop.f32.mrf.mxu1 }
 0x7b2   :  { %v3399_v23 = vadd.f32 %v3784_v52, %v3324_v8  ;;  %v3420_v20 = vadd.f32 %v7979_v58, %v3395_v50 }
 0x7b3   :  { %v4590_v22 = vpop.f32.mrf.mxu1  ;;  %v3326_v49 = vpop.f32.mrf.mxu0 }
 0x7b4   :  { %v3787_v4 = vmul.f32 -1.442695, %v3399_v23  ;;  %v3406_v17 = vadd.f32 %v3785_v61, %v3326_v49 }
 0x7b6   :  { %4768 = vpow2.f32 %v3787_v4  ;;  %v3788_v5 = vmul.f32 -1.442695, %v3406_v17 }
 0x7b8   :  { %4770 = vpow2.f32 %v3788_v5 }
 0x7c3   :  { %v4769_v48 = vpop.eup %4768 }
 0x7c4   :  { %v3403_v29 = vadd.f32 1.0, %v4769_v48 }
 0x7c5   :  { %v4771_v10 = vpop.eup %4770 }
 0x7c6   :  { %4772 = vrcp.f32 %v3403_v29  ;;  %v3410_v31 = vadd.f32 1.0, %v4771_v10 }
 0x7c8   :  { %4774 = vrcp.f32 %v3410_v31 }
 0x7d2   :  { %v3545_v25 = vpop.f32.mrf.mxu0  ;;  %v3616_v6 = vpop.f32.mrf.mxu1 }
 0x7d3   :  { %v4773_v43 = vpop.eup %4772  ;;  %v3620_v38 = vadd.f32 %v3545_v25, %v3428_v19  ;;  %v3641_v62 = vadd.f32 %v3792_v2, %v3616_v6 }
 0x7d4   :  { %v3421_v41 = vmul.f32 %v4773_v43, %v3420_v20  ;;  %v4625_v12 = vpop.f32.mrf.mxu1  ;;  %v3547_v13 = vpop.f32.mrf.mxu0 }
 0x7d5   :  { %v3790_v14 = vmul.f32 -1.442695, %v3620_v38  ;;  %v3627_v58 = vadd.f32 %v3547_v13, %v3429_v35  ;;  %v4775_v3 = vpop.eup %4774 }
 0x7d6   :  { %v3422_v32 = vadd.f32 %v3786_v34, %v3421_v41  ;;  %v3424_v39 = vsub.f32 1.0, %v4775_v3  ;;  %v3426_v55 = vmul.f32 %v4775_v3, %v7992_v47 }
 0x7d7   :  { %4776 = vpow2.f32 %v3790_v14  ;;  %v3791_v57 = vmul.f32 -1.442695, %v3627_v58 }
 0x7d8   :  { %4778 = vtanh.f32 %v3422_v32 }
 0x7d9   :  { %4780 = vpow2.f32 %v3791_v57 }
 0x7e4   :  { %v4777_v36 = vpop.eup %4776 }
 0x7e5   :  { %v4779_v46 = vpop.eup %4778  ;;  %v3624_v63 = vadd.f32 1.0, %v4777_v36 }
 0x7e6   :  { %v3425_v42 = vmul.f32 %v4779_v46, %v3424_v39  ;;  %v4781_v53 = vpop.eup %4780 }
 0x7e7   :  { %4782 = vrcp.f32 %v3624_v63  ;;  %v3631_v9 = vadd.f32 1.0, %v4781_v53 }
 0x7e8   :  { %v3427_v44 = vadd.f32 %v3426_v55, %v3425_v42 }
 0x7e9   :  { %4784 = vrcp.f32 %v3631_v9 }
 0x7ea   :  { %3793 = vst [vmem:[%s8115_s6 + $0x38] sm:$0xff] %v3427_v44 }
 0x7f4   :  { %v4783_v15 = vpop.eup %4782 }
 0x7f5   :  { %v3642_v16 = vmul.f32 %v4783_v15, %v3641_v62 }
 0x7f6   :  { %v4785_v18 = vpop.eup %4784 }
 0x7f7   :  { %v3643_v47 = vadd.f32 %v3642_v16, %v3430_v11  ;;  %v3645_v21 = vsub.f32 1.0, %v4785_v18  ;;  %v3647_v30 = vmul.f32 %v4785_v18, %v8069_v45 }
 0x7f9   :  { %4786 = vtanh.f32 %v3643_v47 }
 0x806   :  { %v4787_v24 = vpop.eup %4786 }
 0x807   :  { %v3646_v27 = vmul.f32 %v4787_v24, %v3645_v21 }
 0x809   :  { %v3648_v33 = vadd.f32 %v3647_v30, %v3646_v27 }
 0x80b   :  { %3651 = vst [vmem:[%s8117_s7] sm:$0xff] %v3648_v33 }

</bundles_post_ra>
